<compile_context>
chip_gen: v7x
topology: tpu7x:2x2x1
jax: 0.10.0
libtpu: 0.0.40
codegen_flags: <defaults>
</compile_context>

<pallas_src>
from functools import partial

import jax
import jax.numpy as jnp
from jax import lax
from jax.experimental import pallas as pl
from jax.experimental.pallas import tpu as pltpu


def _conv_tile(x_ref, w_ref, patches_ref, r0):
    """3x3 conv (stride 1) for TH output rows starting at padded row r0.

    x_ref       : (1, H+2, W+2, Cin)  zero-padded NHWC input block
    w_ref       : (9*Cin, Cout)       im2col weights, K ordered (dy, dx, ci)
    patches_ref : (TH, W, 9*Cin)      VMEM scratch for the im2col patches
    returns     : (TH*W, Cout) f32 conv result for those rows
    """
    TH, W, K9 = patches_ref.shape
    Cin = K9 // 9
    # Stage the 9 shifted taps into the im2col scratch (static lane ranges,
    # dynamic row offset), then contract them in a single MXU matmul.
    for k in range(9):
        dy, dx = divmod(k, 3)
        patches_ref[:, :, k * Cin:(k + 1) * Cin] = (
            x_ref[0, pl.ds(r0 + dy, TH), pl.ds(dx, W), :])
    patches = patches_ref[...].reshape(TH * W, K9)   # leading-dim merge (no-op)
    return jnp.dot(patches, w_ref[...], preferred_element_type=jnp.float32)


def _duc_stats_kernel(x_ref, w_ref, stats_ref, patches_ref):
    # Phase 1: conv + per-channel sum / sum-of-squares for this batch element.
    TH, W, _ = patches_ref.shape
    Cout = w_ref.shape[1]
    H = x_ref.shape[1] - 2
    n_tiles = H // TH

    def body(i, carry):
        s, ss = carry
        r0 = pl.multiple_of(i * TH, TH)
        acc = _conv_tile(x_ref, w_ref, patches_ref, r0)
        return (s + jnp.sum(acc, axis=0, keepdims=True),
                ss + jnp.sum(acc * acc, axis=0, keepdims=True))

    zero = jnp.zeros((1, Cout), jnp.float32)
    s, ss = lax.fori_loop(0, n_tiles, body, (zero, zero), unroll=n_tiles <= 8)
    stats_ref[0] = jnp.concatenate([s, ss], axis=0)   # (2, Cout)


def _duc_norm_kernel(x_ref, w_ref, scale_ref, shift_ref, out_ref, patches_ref):
    # Phase 2: recompute conv, apply folded BN (scale*x + shift) + ReLU, store.
    TH, W, _ = patches_ref.shape
    Cout = w_ref.shape[1]
    H = x_ref.shape[1] - 2
    n_tiles = H // TH

    def body(i, carry):
        r0 = pl.multiple_of(i * TH, TH)
        acc = _conv_tile(x_ref, w_ref, patches_ref, r0)
        y = jnp.maximum(acc * scale_ref[...] + shift_ref[...], 0.0)
        out_ref[0, pl.ds(r0, TH), :, :] = y.reshape(TH, W, Cout)
        return carry

    lax.fori_loop(0, n_tiles, body, 0, unroll=n_tiles <= 8)


@partial(jax.jit, static_argnums=(4, 5, 6))
def _duc_impl(x_nchw, weight, gamma, beta, class_num, sx, sy):
    B, Cin, H, W = x_nchw.shape
    Cout = class_num * sx * sy
    assert weight.shape == (Cout, Cin, 3, 3)
    TH = 8 if H % 8 == 0 else H          # row-tile height inside the kernel
    assert H % TH == 0
    Hp, Wp = H + 2, W + 2

    # Layout glue (XLA): NCHW -> padded NHWC; weights -> (9*Cin, Cout) im2col.
    # TODO(synk): halo-aware input BlockSpecs could fuse this pad/transpose into
    # the kernel's input DMA; left as XLA glue (the input is the smallest tensor).
    x_pad = jnp.pad(jnp.transpose(x_nchw, (0, 2, 3, 1)).astype(jnp.float32),
                    ((0, 0), (1, 1), (1, 1), (0, 0)))            # (B,H+2,W+2,Cin)
    wmat = jnp.transpose(weight.astype(jnp.float32),
                         (2, 3, 1, 0)).reshape(9 * Cin, Cout)     # K=(dy,dx,ci)

    cparams = pltpu.CompilerParams(
        dimension_semantics=("parallel",),        # batch grid -> both v7x TCs
        vmem_limit_bytes=32 * 1024 * 1024,
    )

    # ---- phase 1: conv + per-batch per-channel sum / sum-of-squares --------
    stats = pl.pallas_call(
        _duc_stats_kernel,
        out_shape=jax.ShapeDtypeStruct((B, 2, Cout), jnp.float32),
        grid=(B,),
        in_specs=[pl.BlockSpec((1, Hp, Wp, Cin), lambda b: (b, 0, 0, 0)),
                  pl.BlockSpec((9 * Cin, Cout), lambda b: (0, 0))],
        out_specs=pl.BlockSpec((1, 2, Cout), lambda b: (b, 0, 0)),
        scratch_shapes=[pltpu.VMEM((TH, W, 9 * Cin), jnp.float32)],
        compiler_params=cparams,
    )(x_pad, wmat)

    # ---- tiny glue: fold train-mode BN (biased var, eps=1e-5) into scale/shift.
    # The conv bias is dropped entirely: a per-channel constant is exactly
    # cancelled by the BN mean subtraction and leaves the variance unchanged.
    n = jnp.float32(B * H * W)
    total = jnp.sum(stats, axis=0)                     # (2, Cout)
    mean = total[0] / n
    var = total[1] / n - mean * mean
    scale = gamma.astype(jnp.float32) * lax.rsqrt(var + 1e-5)
    shift = beta.astype(jnp.float32) - mean * scale

    # ---- phase 2: recompute conv, fused scale*x+shift + ReLU, write NHWC ----
    y_nhwc = pl.pallas_call(
        _duc_norm_kernel,
        out_shape=jax.ShapeDtypeStruct((B, H, W, Cout), jnp.float32),
        grid=(B,),
        in_specs=[pl.BlockSpec((1, Hp, Wp, Cin), lambda b: (b, 0, 0, 0)),
                  pl.BlockSpec((9 * Cin, Cout), lambda b: (0, 0)),
                  pl.BlockSpec((1, Cout), lambda b: (0, 0)),
                  pl.BlockSpec((1, Cout), lambda b: (0, 0))],
        out_specs=pl.BlockSpec((1, H, W, Cout), lambda b: (b, 0, 0, 0)),
        scratch_shapes=[pltpu.VMEM((TH, W, 9 * Cin), jnp.float32)],
        compiler_params=cparams,
    )(x_pad, wmat, scale.reshape(1, Cout), shift.reshape(1, Cout))

    # ---- PixelShuffle2D (is_reverse=False) as one XLA permute of the output.
    # TODO(synk): could be fused into the kernel's out_spec index_map, but at
    # Cout=12 the in-kernel permute is lane-sparse; left in XLA.
    y = y_nhwc.reshape(B, H, W, class_num, sx, sy)
    y = jnp.transpose(y, (0, 3, 1, 4, 2, 5))           # (B, cls, H, sx, W, sy)
    return y.reshape(B, class_num, H * sx, W * sy)


def duc_forward(x_nchw, weight, bias, gamma, beta, class_num, sx, sy):
    """DUC forward. x_nchw: (B, Cin, H, W). Returns (B, class_num, H*sx, W*sy)."""
    del bias  # exactly cancelled by train-mode BatchNorm (see _duc_impl)
    return _duc_impl(x_nchw, weight, gamma, beta, class_num, sx, sy)


def duc_reference(x_nchw, weight, bias, gamma, beta, class_num, sx, sy):
    """Pure-JAX reference matching the PyTorch module (training-mode BN)."""
    y = lax.conv_general_dilated(
        x_nchw.astype(jnp.float32), weight.astype(jnp.float32),
        window_strides=(1, 1), padding=((1, 1), (1, 1)),
        dimension_numbers=("NCHW", "OIHW", "NCHW"))
    y = y + bias.reshape(1, -1, 1, 1)
    mean = jnp.mean(y, axis=(0, 2, 3), keepdims=True)
    var = jnp.mean((y - mean) ** 2, axis=(0, 2, 3), keepdims=True)
    y = (y - mean) / jnp.sqrt(var + 1e-5) * gamma.reshape(1, -1, 1, 1) \
        + beta.reshape(1, -1, 1, 1)
    y = jnp.maximum(y, 0.0)
    B, C, H, W = y.shape
    y = y.reshape(B, class_num, sx, sy, H, W)
    y = jnp.transpose(y, (0, 1, 4, 2, 5, 3)).reshape(B, class_num, H * sx, W * sy)
    return y


if __name__ == "__main__":
    # Shapes consistent with DUC(upscale_factor=2, class_num=3, in_channels=4)
    B, Cin, H, W = 2, 4, 16, 16
    class_num, sx, sy = 3, 2, 2
    Cout = class_num * sx * sy  # 12

    key = jax.random.PRNGKey(0)
    kx, kw, kb, kg, kbe = jax.random.split(key, 5)
    x = jax.random.normal(kx, (B, Cin, H, W), dtype=jnp.float32)
    weight = 0.1 * jax.random.normal(kw, (Cout, Cin, 3, 3), dtype=jnp.float32)
    bias = 0.1 * jax.random.normal(kb, (Cout,), dtype=jnp.float32)
    gamma = 1.0 + 0.1 * jax.random.normal(kg, (Cout,), dtype=jnp.float32)
    beta = 0.1 * jax.random.normal(kbe, (Cout,), dtype=jnp.float32)

    out = duc_forward(x, weight, bias, gamma, beta, class_num, sx, sy)
    out = jax.block_until_ready(out)

    ref = duc_reference(x, weight, bias, gamma, beta, class_num, sx, sy)
    assert out.shape == (B, class_num, H * sx, W * sy), out.shape
    max_err = float(jnp.max(jnp.abs(out - ref)))
    assert max_err < 2e-4, max_err

    print("KERNEL_OK")
</pallas_src>

<mosaic_0001>
module attributes {stable_mosaic.version = 11 : i64} {
  func.func @_duc_stats_kernel(%arg0: i32, %arg1: memref<1x18x18x4xf32, #tpu.memory_space<vmem>>, %arg2: memref<36x12xf32, #tpu.memory_space<vmem>>, %arg3: memref<1x2x12xf32, #tpu.memory_space<vmem>>, %arg4: memref<8x16x36xf32, #tpu.memory_space<vmem>>) attributes {dimension_semantics = [#tpu.dimension_semantics<parallel>], iteration_bounds = array<i64: 2>, scalar_prefetch = 0 : i64, scratch_operands = 1 : i64, tpu.core_type = #tpu.core_type<tc>, window_params = [{transform_indices = @transform_0, window_bounds = array<i64: 1, 18, 18, 4>}, {pipeline_mode = #tpu.pipeline_mode<synchronous>, transform_indices = @transform_1, window_bounds = array<i64: 36, 12>}, {transform_indices = @transform_2, window_bounds = array<i64: 1, 2, 12>}]} {
    %cst = arith.constant 0.000000e+00 : f32
    %0 = vector.broadcast %cst : f32 to vector<1x12xf32>
    %c0_i32 = arith.constant 0 : i32
    %c8_i32 = arith.constant 8 : i32
    %1 = arith.muli %c0_i32, %c8_i32 : i32
    %2 = tpu.assume_multiple %1, 8 : i32
    %c0_i32_0 = arith.constant 0 : i32
    %3 = arith.addi %2, %c0_i32_0 : i32
    %c0 = arith.constant 0 : index
    %4 = arith.index_cast %3 : i32 to index
    %c0_1 = arith.constant 0 : index
    %c0_2 = arith.constant 0 : index
    %5 = vector.load %arg1[%c0, %4, %c0_1, %c0_2] : memref<1x18x18x4xf32, #tpu.memory_space<vmem>>, vector<1x8x16x4xf32>
    %6 = vector.shape_cast %5 : vector<1x8x16x4xf32> to vector<8x16x4xf32>
    %c0_3 = arith.constant 0 : index
    %c0_4 = arith.constant 0 : index
    %c0_5 = arith.constant 0 : index
    %7 = vector.load %arg4[%c0_3, %c0_4, %c0_5] : memref<8x16x36xf32, #tpu.memory_space<vmem>>, vector<8x16x4xf32>
    tpu.vector_store %arg4[%c0_3, %c0_4, %c0_5], %6 {strides = array<i32>} : memref<8x16x36xf32, #tpu.memory_space<vmem>>, vector<8x16x4xf32>,
    %c0_i32_6 = arith.constant 0 : i32
    %8 = arith.addi %2, %c0_i32_6 : i32
    %c0_7 = arith.constant 0 : index
    %9 = arith.index_cast %8 : i32 to index
    %c1 = arith.constant 1 : index
    %c0_8 = arith.constant 0 : index
    %10 = vector.load %arg1[%c0_7, %9, %c1, %c0_8] : memref<1x18x18x4xf32, #tpu.memory_space<vmem>>, vector<1x8x16x4xf32>
    %11 = vector.shape_cast %10 : vector<1x8x16x4xf32> to vector<8x16x4xf32>
    %c0_9 = arith.constant 0 : index
    %c0_10 = arith.constant 0 : index
    %c4 = arith.constant 4 : index
    %12 = vector.load %arg4[%c0_9, %c0_10, %c4] : memref<8x16x36xf32, #tpu.memory_space<vmem>>, vector<8x16x4xf32>
    tpu.vector_store %arg4[%c0_9, %c0_10, %c4], %11 {strides = array<i32>} : memref<8x16x36xf32, #tpu.memory_space<vmem>>, vector<8x16x4xf32>,
    %c0_i32_11 = arith.constant 0 : i32
    %13 = arith.addi %2, %c0_i32_11 : i32
    %c0_12 = arith.constant 0 : index
    %14 = arith.index_cast %13 : i32 to index
    %c2 = arith.constant 2 : index
    %c0_13 = arith.constant 0 : index
    %15 = vector.load %arg1[%c0_12, %14, %c2, %c0_13] : memref<1x18x18x4xf32, #tpu.memory_space<vmem>>, vector<1x8x16x4xf32>
    %16 = vector.shape_cast %15 : vector<1x8x16x4xf32> to vector<8x16x4xf32>
    %c0_14 = arith.constant 0 : index
    %c0_15 = arith.constant 0 : index
    %c8 = arith.constant 8 : index
    %17 = vector.load %arg4[%c0_14, %c0_15, %c8] : memref<8x16x36xf32, #tpu.memory_space<vmem>>, vector<8x16x4xf32>
    tpu.vector_store %arg4[%c0_14, %c0_15, %c8], %16 {strides = array<i32>} : memref<8x16x36xf32, #tpu.memory_space<vmem>>, vector<8x16x4xf32>,
    %c1_i32 = arith.constant 1 : i32
    %18 = arith.addi %2, %c1_i32 : i32
    %c0_16 = arith.constant 0 : index
    %19 = arith.index_cast %18 : i32 to index
    %c0_17 = arith.constant 0 : index
    %c0_18 = arith.constant 0 : index
    %20 = vector.load %arg1[%c0_16, %19, %c0_17, %c0_18] : memref<1x18x18x4xf32, #tpu.memory_space<vmem>>, vector<1x8x16x4xf32>
    %21 = vector.shape_cast %20 : vector<1x8x16x4xf32> to vector<8x16x4xf32>
    %c0_19 = arith.constant 0 : index
    %c0_20 = arith.constant 0 : index
    %c12 = arith.constant 12 : index
    %22 = vector.load %arg4[%c0_19, %c0_20, %c12] : memref<8x16x36xf32, #tpu.memory_space<vmem>>, vector<8x16x4xf32>
    tpu.vector_store %arg4[%c0_19, %c0_20, %c12], %21 {strides = array<i32>} : memref<8x16x36xf32, #tpu.memory_space<vmem>>, vector<8x16x4xf32>,
    %c1_i32_21 = arith.constant 1 : i32
    %23 = arith.addi %2, %c1_i32_21 : i32
    %c0_22 = arith.constant 0 : index
    %24 = arith.index_cast %23 : i32 to index
    %c1_23 = arith.constant 1 : index
    %c0_24 = arith.constant 0 : index
    %25 = vector.load %arg1[%c0_22, %24, %c1_23, %c0_24] : memref<1x18x18x4xf32, #tpu.memory_space<vmem>>, vector<1x8x16x4xf32>
    %26 = vector.shape_cast %25 : vector<1x8x16x4xf32> to vector<8x16x4xf32>
    %c0_25 = arith.constant 0 : index
    %c0_26 = arith.constant 0 : index
    %c16 = arith.constant 16 : index
    %27 = vector.load %arg4[%c0_25, %c0_26, %c16] : memref<8x16x36xf32, #tpu.memory_space<vmem>>, vector<8x16x4xf32>
    tpu.vector_store %arg4[%c0_25, %c0_26, %c16], %26 {strides = array<i32>} : memref<8x16x36xf32, #tpu.memory_space<vmem>>, vector<8x16x4xf32>,
    %c1_i32_27 = arith.constant 1 : i32
    %28 = arith.addi %2, %c1_i32_27 : i32
    %c0_28 = arith.constant 0 : index
    %29 = arith.index_cast %28 : i32 to index
    %c2_29 = arith.constant 2 : index
    %c0_30 = arith.constant 0 : index
    %30 = vector.load %arg1[%c0_28, %29, %c2_29, %c0_30] : memref<1x18x18x4xf32, #tpu.memory_space<vmem>>, vector<1x8x16x4xf32>
    %31 = vector.shape_cast %30 : vector<1x8x16x4xf32> to vector<8x16x4xf32>
    %c0_31 = arith.constant 0 : index
    %c0_32 = arith.constant 0 : index
    %c20 = arith.constant 20 : index
    %32 = vector.load %arg4[%c0_31, %c0_32, %c20] : memref<8x16x36xf32, #tpu.memory_space<vmem>>, vector<8x16x4xf32>
    tpu.vector_store %arg4[%c0_31, %c0_32, %c20], %31 {strides = array<i32>} : memref<8x16x36xf32, #tpu.memory_space<vmem>>, vector<8x16x4xf32>,
    %c2_i32 = arith.constant 2 : i32
    %33 = arith.addi %2, %c2_i32 : i32
    %c0_33 = arith.constant 0 : index
    %34 = arith.index_cast %33 : i32 to index
    %c0_34 = arith.constant 0 : index
    %c0_35 = arith.constant 0 : index
    %35 = vector.load %arg1[%c0_33, %34, %c0_34, %c0_35] : memref<1x18x18x4xf32, #tpu.memory_space<vmem>>, vector<1x8x16x4xf32>
    %36 = vector.shape_cast %35 : vector<1x8x16x4xf32> to vector<8x16x4xf32>
    %c0_36 = arith.constant 0 : index
    %c0_37 = arith.constant 0 : index
    %c24 = arith.constant 24 : index
    %37 = vector.load %arg4[%c0_36, %c0_37, %c24] : memref<8x16x36xf32, #tpu.memory_space<vmem>>, vector<8x16x4xf32>
    tpu.vector_store %arg4[%c0_36, %c0_37, %c24], %36 {strides = array<i32>} : memref<8x16x36xf32, #tpu.memory_space<vmem>>, vector<8x16x4xf32>,
    %c2_i32_38 = arith.constant 2 : i32
    %38 = arith.addi %2, %c2_i32_38 : i32
    %c0_39 = arith.constant 0 : index
    %39 = arith.index_cast %38 : i32 to index
    %c1_40 = arith.constant 1 : index
    %c0_41 = arith.constant 0 : index
    %40 = vector.load %arg1[%c0_39, %39, %c1_40, %c0_41] : memref<1x18x18x4xf32, #tpu.memory_space<vmem>>, vector<1x8x16x4xf32>
    %41 = vector.shape_cast %40 : vector<1x8x16x4xf32> to vector<8x16x4xf32>
    %c0_42 = arith.constant 0 : index
    %c0_43 = arith.constant 0 : index
    %c28 = arith.constant 28 : index
    %42 = vector.load %arg4[%c0_42, %c0_43, %c28] : memref<8x16x36xf32, #tpu.memory_space<vmem>>, vector<8x16x4xf32>
    tpu.vector_store %arg4[%c0_42, %c0_43, %c28], %41 {strides = array<i32>} : memref<8x16x36xf32, #tpu.memory_space<vmem>>, vector<8x16x4xf32>,
    %c2_i32_44 = arith.constant 2 : i32
    %43 = arith.addi %2, %c2_i32_44 : i32
    %c0_45 = arith.constant 0 : index
    %44 = arith.index_cast %43 : i32 to index
    %c2_46 = arith.constant 2 : index
    %c0_47 = arith.constant 0 : index
    %45 = vector.load %arg1[%c0_45, %44, %c2_46, %c0_47] : memref<1x18x18x4xf32, #tpu.memory_space<vmem>>, vector<1x8x16x4xf32>
    %46 = vector.shape_cast %45 : vector<1x8x16x4xf32> to vector<8x16x4xf32>
    %c0_48 = arith.constant 0 : index
    %c0_49 = arith.constant 0 : index
    %c32 = arith.constant 32 : index
    %47 = vector.load %arg4[%c0_48, %c0_49, %c32] : memref<8x16x36xf32, #tpu.memory_space<vmem>>, vector<8x16x4xf32>
    tpu.vector_store %arg4[%c0_48, %c0_49, %c32], %46 {strides = array<i32>} : memref<8x16x36xf32, #tpu.memory_space<vmem>>, vector<8x16x4xf32>,
    %c0_50 = arith.constant 0 : index
    %c0_51 = arith.constant 0 : index
    %c0_52 = arith.constant 0 : index
    %48 = vector.load %arg4[%c0_50, %c0_51, %c0_52] : memref<8x16x36xf32, #tpu.memory_space<vmem>>, vector<8x16x36xf32>
    %49 = vector.shape_cast %48 : vector<8x16x36xf32> to vector<128x36xf32>
    %c0_53 = arith.constant 0 : index
    %c0_54 = arith.constant 0 : index
    %50 = vector.load %arg2[%c0_53, %c0_54] : memref<36x12xf32, #tpu.memory_space<vmem>>, vector<36x12xf32>
    %cst_55 = arith.constant dense<0.000000e+00> : vector<128x12xf32>
    %51 = tpu.matmul %49, %50, %cst_55 {dimension_numbers = #tpu.dot_dimension_numbers<[1], [0], [0], [1], [0, 0, 1, 1], [], []>} : vector<128x36xf32>, vector<36x12xf32>, vector<128x12xf32> -> vector<128x12xf32>
    %cst_56 = arith.constant dense<0.000000e+00> : vector<12xf32>
    %52 = vector.multi_reduction <add>, %51, %cst_56 [0] : vector<128x12xf32> to vector<12xf32>
    %53 = vector.shape_cast %52 : vector<12xf32> to vector<1x12xf32>
    %54 = arith.addf %0, %53 : vector<1x12xf32>
    %55 = arith.mulf %51, %51 : vector<128x12xf32>
    %cst_57 = arith.constant dense<0.000000e+00> : vector<12xf32>
    %56 = vector.multi_reduction <add>, %55, %cst_57 [0] : vector<128x12xf32> to vector<12xf32>
    %57 = vector.shape_cast %56 : vector<12xf32> to vector<1x12xf32>
    %58 = arith.addf %0, %57 : vector<1x12xf32>
    %c1_i32_58 = arith.constant 1 : i32
    %c8_i32_59 = arith.constant 8 : i32
    %59 = arith.muli %c1_i32_58, %c8_i32_59 : i32
    %60 = tpu.assume_multiple %59, 8 : i32
    %c0_i32_60 = arith.constant 0 : i32
    %61 = arith.addi %60, %c0_i32_60 : i32
    %c0_61 = arith.constant 0 : index
    %62 = arith.index_cast %61 : i32 to index
    %c0_62 = arith.constant 0 : index
    %c0_63 = arith.constant 0 : index
    %63 = vector.load %arg1[%c0_61, %62, %c0_62, %c0_63] : memref<1x18x18x4xf32, #tpu.memory_space<vmem>>, vector<1x8x16x4xf32>
    %64 = vector.shape_cast %63 : vector<1x8x16x4xf32> to vector<8x16x4xf32>
    %c0_64 = arith.constant 0 : index
    %c0_65 = arith.constant 0 : index
    %c0_66 = arith.constant 0 : index
    %65 = vector.load %arg4[%c0_64, %c0_65, %c0_66] : memref<8x16x36xf32, #tpu.memory_space<vmem>>, vector<8x16x4xf32>
    tpu.vector_store %arg4[%c0_64, %c0_65, %c0_66], %64 {strides = array<i32>} : memref<8x16x36xf32, #tpu.memory_space<vmem>>, vector<8x16x4xf32>,
    %c0_i32_67 = arith.constant 0 : i32
    %66 = arith.addi %60, %c0_i32_67 : i32
    %c0_68 = arith.constant 0 : index
    %67 = arith.index_cast %66 : i32 to index
    %c1_69 = arith.constant 1 : index
    %c0_70 = arith.constant 0 : index
    %68 = vector.load %arg1[%c0_68, %67, %c1_69, %c0_70] : memref<1x18x18x4xf32, #tpu.memory_space<vmem>>, vector<1x8x16x4xf32>
    %69 = vector.shape_cast %68 : vector<1x8x16x4xf32> to vector<8x16x4xf32>
    %c0_71 = arith.constant 0 : index
    %c0_72 = arith.constant 0 : index
    %c4_73 = arith.constant 4 : index
    %70 = vector.load %arg4[%c0_71, %c0_72, %c4_73] : memref<8x16x36xf32, #tpu.memory_space<vmem>>, vector<8x16x4xf32>
    tpu.vector_store %arg4[%c0_71, %c0_72, %c4_73], %69 {strides = array<i32>} : memref<8x16x36xf32, #tpu.memory_space<vmem>>, vector<8x16x4xf32>,
    %c0_i32_74 = arith.constant 0 : i32
    %71 = arith.addi %60, %c0_i32_74 : i32
    %c0_75 = arith.constant 0 : index
    %72 = arith.index_cast %71 : i32 to index
    %c2_76 = arith.constant 2 : index
    %c0_77 = arith.constant 0 : index
    %73 = vector.load %arg1[%c0_75, %72, %c2_76, %c0_77] : memref<1x18x18x4xf32, #tpu.memory_space<vmem>>, vector<1x8x16x4xf32>
    %74 = vector.shape_cast %73 : vector<1x8x16x4xf32> to vector<8x16x4xf32>
    %c0_78 = arith.constant 0 : index
    %c0_79 = arith.constant 0 : index
    %c8_80 = arith.constant 8 : index
    %75 = vector.load %arg4[%c0_78, %c0_79, %c8_80] : memref<8x16x36xf32, #tpu.memory_space<vmem>>, vector<8x16x4xf32>
    tpu.vector_store %arg4[%c0_78, %c0_79, %c8_80], %74 {strides = array<i32>} : memref<8x16x36xf32, #tpu.memory_space<vmem>>, vector<8x16x4xf32>,
    %c1_i32_81 = arith.constant 1 : i32
    %76 = arith.addi %60, %c1_i32_81 : i32
    %c0_82 = arith.constant 0 : index
    %77 = arith.index_cast %76 : i32 to index
    %c0_83 = arith.constant 0 : index
    %c0_84 = arith.constant 0 : index
    %78 = vector.load %arg1[%c0_82, %77, %c0_83, %c0_84] : memref<1x18x18x4xf32, #tpu.memory_space<vmem>>, vector<1x8x16x4xf32>
    %79 = vector.shape_cast %78 : vector<1x8x16x4xf32> to vector<8x16x4xf32>
    %c0_85 = arith.constant 0 : index
    %c0_86 = arith.constant 0 : index
    %c12_87 = arith.constant 12 : index
    %80 = vector.load %arg4[%c0_85, %c0_86, %c12_87] : memref<8x16x36xf32, #tpu.memory_space<vmem>>, vector<8x16x4xf32>
    tpu.vector_store %arg4[%c0_85, %c0_86, %c12_87], %79 {strides = array<i32>} : memref<8x16x36xf32, #tpu.memory_space<vmem>>, vector<8x16x4xf32>,
    %c1_i32_88 = arith.constant 1 : i32
    %81 = arith.addi %60, %c1_i32_88 : i32
    %c0_89 = arith.constant 0 : index
    %82 = arith.index_cast %81 : i32 to index
    %c1_90 = arith.constant 1 : index
    %c0_91 = arith.constant 0 : index
    %83 = vector.load %arg1[%c0_89, %82, %c1_90, %c0_91] : memref<1x18x18x4xf32, #tpu.memory_space<vmem>>, vector<1x8x16x4xf32>
    %84 = vector.shape_cast %83 : vector<1x8x16x4xf32> to vector<8x16x4xf32>
    %c0_92 = arith.constant 0 : index
    %c0_93 = arith.constant 0 : index
    %c16_94 = arith.constant 16 : index
    %85 = vector.load %arg4[%c0_92, %c0_93, %c16_94] : memref<8x16x36xf32, #tpu.memory_space<vmem>>, vector<8x16x4xf32>
    tpu.vector_store %arg4[%c0_92, %c0_93, %c16_94], %84 {strides = array<i32>} : memref<8x16x36xf32, #tpu.memory_space<vmem>>, vector<8x16x4xf32>,
    %c1_i32_95 = arith.constant 1 : i32
    %86 = arith.addi %60, %c1_i32_95 : i32
    %c0_96 = arith.constant 0 : index
    %87 = arith.index_cast %86 : i32 to index
    %c2_97 = arith.constant 2 : index
    %c0_98 = arith.constant 0 : index
    %88 = vector.load %arg1[%c0_96, %87, %c2_97, %c0_98] : memref<1x18x18x4xf32, #tpu.memory_space<vmem>>, vector<1x8x16x4xf32>
    %89 = vector.shape_cast %88 : vector<1x8x16x4xf32> to vector<8x16x4xf32>
    %c0_99 = arith.constant 0 : index
    %c0_100 = arith.constant 0 : index
    %c20_101 = arith.constant 20 : index
    %90 = vector.load %arg4[%c0_99, %c0_100, %c20_101] : memref<8x16x36xf32, #tpu.memory_space<vmem>>, vector<8x16x4xf32>
    tpu.vector_store %arg4[%c0_99, %c0_100, %c20_101], %89 {strides = array<i32>} : memref<8x16x36xf32, #tpu.memory_space<vmem>>, vector<8x16x4xf32>,
    %c2_i32_102 = arith.constant 2 : i32
    %91 = arith.addi %60, %c2_i32_102 : i32
    %c0_103 = arith.constant 0 : index
    %92 = arith.index_cast %91 : i32 to index
    %c0_104 = arith.constant 0 : index
    %c0_105 = arith.constant 0 : index
    %93 = vector.load %arg1[%c0_103, %92, %c0_104, %c0_105] : memref<1x18x18x4xf32, #tpu.memory_space<vmem>>, vector<1x8x16x4xf32>
    %94 = vector.shape_cast %93 : vector<1x8x16x4xf32> to vector<8x16x4xf32>
    %c0_106 = arith.constant 0 : index
    %c0_107 = arith.constant 0 : index
    %c24_108 = arith.constant 24 : index
    %95 = vector.load %arg4[%c0_106, %c0_107, %c24_108] : memref<8x16x36xf32, #tpu.memory_space<vmem>>, vector<8x16x4xf32>
    tpu.vector_store %arg4[%c0_106, %c0_107, %c24_108], %94 {strides = array<i32>} : memref<8x16x36xf32, #tpu.memory_space<vmem>>, vector<8x16x4xf32>,
    %c2_i32_109 = arith.constant 2 : i32
    %96 = arith.addi %60, %c2_i32_109 : i32
    %c0_110 = arith.constant 0 : index
    %97 = arith.index_cast %96 : i32 to index
    %c1_111 = arith.constant 1 : index
    %c0_112 = arith.constant 0 : index
    %98 = vector.load %arg1[%c0_110, %97, %c1_111, %c0_112] : memref<1x18x18x4xf32, #tpu.memory_space<vmem>>, vector<1x8x16x4xf32>
    %99 = vector.shape_cast %98 : vector<1x8x16x4xf32> to vector<8x16x4xf32>
    %c0_113 = arith.constant 0 : index
    %c0_114 = arith.constant 0 : index
    %c28_115 = arith.constant 28 : index
    %100 = vector.load %arg4[%c0_113, %c0_114, %c28_115] : memref<8x16x36xf32, #tpu.memory_space<vmem>>, vector<8x16x4xf32>
    tpu.vector_store %arg4[%c0_113, %c0_114, %c28_115], %99 {strides = array<i32>} : memref<8x16x36xf32, #tpu.memory_space<vmem>>, vector<8x16x4xf32>,
    %c2_i32_116 = arith.constant 2 : i32
    %101 = arith.addi %60, %c2_i32_116 : i32
    %c0_117 = arith.constant 0 : index
    %102 = arith.index_cast %101 : i32 to index
    %c2_118 = arith.constant 2 : index
    %c0_119 = arith.constant 0 : index
    %103 = vector.load %arg1[%c0_117, %102, %c2_118, %c0_119] : memref<1x18x18x4xf32, #tpu.memory_space<vmem>>, vector<1x8x16x4xf32>
    %104 = vector.shape_cast %103 : vector<1x8x16x4xf32> to vector<8x16x4xf32>
    %c0_120 = arith.constant 0 : index
    %c0_121 = arith.constant 0 : index
    %c32_122 = arith.constant 32 : index
    %105 = vector.load %arg4[%c0_120, %c0_121, %c32_122] : memref<8x16x36xf32, #tpu.memory_space<vmem>>, vector<8x16x4xf32>
    tpu.vector_store %arg4[%c0_120, %c0_121, %c32_122], %104 {strides = array<i32>} : memref<8x16x36xf32, #tpu.memory_space<vmem>>, vector<8x16x4xf32>,
    %c0_123 = arith.constant 0 : index
    %c0_124 = arith.constant 0 : index
    %c0_125 = arith.constant 0 : index
    %106 = vector.load %arg4[%c0_123, %c0_124, %c0_125] : memref<8x16x36xf32, #tpu.memory_space<vmem>>, vector<8x16x36xf32>
    %107 = vector.shape_cast %106 : vector<8x16x36xf32> to vector<128x36xf32>
    %c0_126 = arith.constant 0 : index
    %c0_127 = arith.constant 0 : index
    %108 = vector.load %arg2[%c0_126, %c0_127] : memref<36x12xf32, #tpu.memory_space<vmem>>, vector<36x12xf32>
    %cst_128 = arith.constant dense<0.000000e+00> : vector<128x12xf32>
    %109 = tpu.matmul %107, %108, %cst_128 {dimension_numbers = #tpu.dot_dimension_numbers<[1], [0], [0], [1], [0, 0, 1, 1], [], []>} : vector<128x36xf32>, vector<36x12xf32>, vector<128x12xf32> -> vector<128x12xf32>
    %cst_129 = arith.constant dense<0.000000e+00> : vector<12xf32>
    %110 = vector.multi_reduction <add>, %109, %cst_129 [0] : vector<128x12xf32> to vector<12xf32>
    %111 = vector.shape_cast %110 : vector<12xf32> to vector<1x12xf32>
    %112 = arith.addf %54, %111 : vector<1x12xf32>
    %113 = arith.mulf %109, %109 : vector<128x12xf32>
    %cst_130 = arith.constant dense<0.000000e+00> : vector<12xf32>
    %114 = vector.multi_reduction <add>, %113, %cst_130 [0] : vector<128x12xf32> to vector<12xf32>
    %115 = vector.shape_cast %114 : vector<12xf32> to vector<1x12xf32>
    %116 = arith.addf %58, %115 : vector<1x12xf32>
    %c2_i32_131 = arith.constant 2 : i32
    %117 = tpu.concatenate %112, %116 in 0 : vector<1x12xf32>, vector<1x12xf32> -> vector<2x12xf32>
    %c0_132 = arith.constant 0 : index
    %c0_133 = arith.constant 0 : index
    %c0_134 = arith.constant 0 : index
    %118 = vector.load %arg3[%c0_132, %c0_133, %c0_134] : memref<1x2x12xf32, #tpu.memory_space<vmem>>, vector<1x2x12xf32>
    %119 = vector.shape_cast %118 : vector<1x2x12xf32> to vector<2x12xf32>
    %120 = vector.shape_cast %117 : vector<2x12xf32> to vector<1x2x12xf32>
    tpu.vector_store %arg3[%c0_132, %c0_133, %c0_134], %120 {strides = array<i32>} : memref<1x2x12xf32, #tpu.memory_space<vmem>>, vector<1x2x12xf32>,
    return
  }
  func.func @transform_0(%arg0: i32) -> (i32, i32, i32, i32) {
    %c0_i32 = arith.constant 0 : i32
    %c0_i32_0 = arith.constant 0 : i32
    %c0_i32_1 = arith.constant 0 : i32
    %c0_i32_2 = arith.constant 0 : i32
    return %arg0, %c0_i32, %c0_i32_0, %c0_i32_1 : i32, i32, i32, i32
  }
  func.func @transform_1(%arg0: i32) -> (i32, i32) {
    %c0_i32 = arith.constant 0 : i32
    %c0_i32_0 = arith.constant 0 : i32
    %c0_i32_1 = arith.constant 0 : i32
    return %c0_i32, %c0_i32_0 : i32, i32
  }
  func.func @transform_2(%arg0: i32) -> (i32, i32, i32) {
    %c0_i32 = arith.constant 0 : i32
    %c0_i32_0 = arith.constant 0 : i32
    %c0_i32_1 = arith.constant 0 : i32
    return %arg0, %c0_i32, %c0_i32_0 : i32, i32, i32
  }
}

module attributes {stable_mosaic.version = 11 : i64} {
  func.func @_duc_norm_kernel(%arg0: i32, %arg1: memref<1x18x18x4xf32, #tpu.memory_space<vmem>>, %arg2: memref<36x12xf32, #tpu.memory_space<vmem>>, %arg3: memref<1x12xf32, #tpu.memory_space<vmem>>, %arg4: memref<1x12xf32, #tpu.memory_space<vmem>>, %arg5: memref<1x16x16x12xf32, #tpu.memory_space<vmem>>, %arg6: memref<8x16x36xf32, #tpu.memory_space<vmem>>) attributes {dimension_semantics = [#tpu.dimension_semantics<parallel>], iteration_bounds = array<i64: 2>, scalar_prefetch = 0 : i64, scratch_operands = 1 : i64, tpu.core_type = #tpu.core_type<tc>, window_params = [{transform_indices = @transform_0, window_bounds = array<i64: 1, 18, 18, 4>}, {pipeline_mode = #tpu.pipeline_mode<synchronous>, transform_indices = @transform_1, window_bounds = array<i64: 36, 12>}, {pipeline_mode = #tpu.pipeline_mode<synchronous>, transform_indices = @transform_2, window_bounds = array<i64: 1, 12>}, {pipeline_mode = #tpu.pipeline_mode<synchronous>, transform_indices = @transform_3, window_bounds = array<i64: 1, 12>}, {transform_indices = @transform_4, window_bounds = array<i64: 1, 16, 16, 12>}]} {
    %c0_i32 = arith.constant 0 : i32
    %c8_i32 = arith.constant 8 : i32
    %0 = arith.muli %c0_i32, %c8_i32 : i32
    %1 = tpu.assume_multiple %0, 8 : i32
    %c0_i32_0 = arith.constant 0 : i32
    %2 = arith.addi %1, %c0_i32_0 : i32
    %c0 = arith.constant 0 : index
    %3 = arith.index_cast %2 : i32 to index
    %c0_1 = arith.constant 0 : index
    %c0_2 = arith.constant 0 : index
    %4 = vector.load %arg1[%c0, %3, %c0_1, %c0_2] : memref<1x18x18x4xf32, #tpu.memory_space<vmem>>, vector<1x8x16x4xf32>
    %5 = vector.shape_cast %4 : vector<1x8x16x4xf32> to vector<8x16x4xf32>
    %c0_3 = arith.constant 0 : index
    %c0_4 = arith.constant 0 : index
    %c0_5 = arith.constant 0 : index
    %6 = vector.load %arg6[%c0_3, %c0_4, %c0_5] : memref<8x16x36xf32, #tpu.memory_space<vmem>>, vector<8x16x4xf32>
    tpu.vector_store %arg6[%c0_3, %c0_4, %c0_5], %5 {strides = array<i32>} : memref<8x16x36xf32, #tpu.memory_space<vmem>>, vector<8x16x4xf32>,
    %c0_i32_6 = arith.constant 0 : i32
    %7 = arith.addi %1, %c0_i32_6 : i32
    %c0_7 = arith.constant 0 : index
    %8 = arith.index_cast %7 : i32 to index
    %c1 = arith.constant 1 : index
    %c0_8 = arith.constant 0 : index
    %9 = vector.load %arg1[%c0_7, %8, %c1, %c0_8] : memref<1x18x18x4xf32, #tpu.memory_space<vmem>>, vector<1x8x16x4xf32>
    %10 = vector.shape_cast %9 : vector<1x8x16x4xf32> to vector<8x16x4xf32>
    %c0_9 = arith.constant 0 : index
    %c0_10 = arith.constant 0 : index
    %c4 = arith.constant 4 : index
    %11 = vector.load %arg6[%c0_9, %c0_10, %c4] : memref<8x16x36xf32, #tpu.memory_space<vmem>>, vector<8x16x4xf32>
    tpu.vector_store %arg6[%c0_9, %c0_10, %c4], %10 {strides = array<i32>} : memref<8x16x36xf32, #tpu.memory_space<vmem>>, vector<8x16x4xf32>,
    %c0_i32_11 = arith.constant 0 : i32
    %12 = arith.addi %1, %c0_i32_11 : i32
    %c0_12 = arith.constant 0 : index
    %13 = arith.index_cast %12 : i32 to index
    %c2 = arith.constant 2 : index
    %c0_13 = arith.constant 0 : index
    %14 = vector.load %arg1[%c0_12, %13, %c2, %c0_13] : memref<1x18x18x4xf32, #tpu.memory_space<vmem>>, vector<1x8x16x4xf32>
    %15 = vector.shape_cast %14 : vector<1x8x16x4xf32> to vector<8x16x4xf32>
    %c0_14 = arith.constant 0 : index
    %c0_15 = arith.constant 0 : index
    %c8 = arith.constant 8 : index
    %16 = vector.load %arg6[%c0_14, %c0_15, %c8] : memref<8x16x36xf32, #tpu.memory_space<vmem>>, vector<8x16x4xf32>
    tpu.vector_store %arg6[%c0_14, %c0_15, %c8], %15 {strides = array<i32>} : memref<8x16x36xf32, #tpu.memory_space<vmem>>, vector<8x16x4xf32>,
    %c1_i32 = arith.constant 1 : i32
    %17 = arith.addi %1, %c1_i32 : i32
    %c0_16 = arith.constant 0 : index
    %18 = arith.index_cast %17 : i32 to index
    %c0_17 = arith.constant 0 : index
    %c0_18 = arith.constant 0 : index
    %19 = vector.load %arg1[%c0_16, %18, %c0_17, %c0_18] : memref<1x18x18x4xf32, #tpu.memory_space<vmem>>, vector<1x8x16x4xf32>
    %20 = vector.shape_cast %19 : vector<1x8x16x4xf32> to vector<8x16x4xf32>
    %c0_19 = arith.constant 0 : index
    %c0_20 = arith.constant 0 : index
    %c12 = arith.constant 12 : index
    %21 = vector.load %arg6[%c0_19, %c0_20, %c12] : memref<8x16x36xf32, #tpu.memory_space<vmem>>, vector<8x16x4xf32>
    tpu.vector_store %arg6[%c0_19, %c0_20, %c12], %20 {strides = array<i32>} : memref<8x16x36xf32, #tpu.memory_space<vmem>>, vector<8x16x4xf32>,
    %c1_i32_21 = arith.constant 1 : i32
    %22 = arith.addi %1, %c1_i32_21 : i32
    %c0_22 = arith.constant 0 : index
    %23 = arith.index_cast %22 : i32 to index
    %c1_23 = arith.constant 1 : index
    %c0_24 = arith.constant 0 : index
    %24 = vector.load %arg1[%c0_22, %23, %c1_23, %c0_24] : memref<1x18x18x4xf32, #tpu.memory_space<vmem>>, vector<1x8x16x4xf32>
    %25 = vector.shape_cast %24 : vector<1x8x16x4xf32> to vector<8x16x4xf32>
    %c0_25 = arith.constant 0 : index
    %c0_26 = arith.constant 0 : index
    %c16 = arith.constant 16 : index
    %26 = vector.load %arg6[%c0_25, %c0_26, %c16] : memref<8x16x36xf32, #tpu.memory_space<vmem>>, vector<8x16x4xf32>
    tpu.vector_store %arg6[%c0_25, %c0_26, %c16], %25 {strides = array<i32>} : memref<8x16x36xf32, #tpu.memory_space<vmem>>, vector<8x16x4xf32>,
    %c1_i32_27 = arith.constant 1 : i32
    %27 = arith.addi %1, %c1_i32_27 : i32
    %c0_28 = arith.constant 0 : index
    %28 = arith.index_cast %27 : i32 to index
    %c2_29 = arith.constant 2 : index
    %c0_30 = arith.constant 0 : index
    %29 = vector.load %arg1[%c0_28, %28, %c2_29, %c0_30] : memref<1x18x18x4xf32, #tpu.memory_space<vmem>>, vector<1x8x16x4xf32>
    %30 = vector.shape_cast %29 : vector<1x8x16x4xf32> to vector<8x16x4xf32>
    %c0_31 = arith.constant 0 : index
    %c0_32 = arith.constant 0 : index
    %c20 = arith.constant 20 : index
    %31 = vector.load %arg6[%c0_31, %c0_32, %c20] : memref<8x16x36xf32, #tpu.memory_space<vmem>>, vector<8x16x4xf32>
    tpu.vector_store %arg6[%c0_31, %c0_32, %c20], %30 {strides = array<i32>} : memref<8x16x36xf32, #tpu.memory_space<vmem>>, vector<8x16x4xf32>,
    %c2_i32 = arith.constant 2 : i32
    %32 = arith.addi %1, %c2_i32 : i32
    %c0_33 = arith.constant 0 : index
    %33 = arith.index_cast %32 : i32 to index
    %c0_34 = arith.constant 0 : index
    %c0_35 = arith.constant 0 : index
    %34 = vector.load %arg1[%c0_33, %33, %c0_34, %c0_35] : memref<1x18x18x4xf32, #tpu.memory_space<vmem>>, vector<1x8x16x4xf32>
    %35 = vector.shape_cast %34 : vector<1x8x16x4xf32> to vector<8x16x4xf32>
    %c0_36 = arith.constant 0 : index
    %c0_37 = arith.constant 0 : index
    %c24 = arith.constant 24 : index
    %36 = vector.load %arg6[%c0_36, %c0_37, %c24] : memref<8x16x36xf32, #tpu.memory_space<vmem>>, vector<8x16x4xf32>
    tpu.vector_store %arg6[%c0_36, %c0_37, %c24], %35 {strides = array<i32>} : memref<8x16x36xf32, #tpu.memory_space<vmem>>, vector<8x16x4xf32>,
    %c2_i32_38 = arith.constant 2 : i32
    %37 = arith.addi %1, %c2_i32_38 : i32
    %c0_39 = arith.constant 0 : index
    %38 = arith.index_cast %37 : i32 to index
    %c1_40 = arith.constant 1 : index
    %c0_41 = arith.constant 0 : index
    %39 = vector.load %arg1[%c0_39, %38, %c1_40, %c0_41] : memref<1x18x18x4xf32, #tpu.memory_space<vmem>>, vector<1x8x16x4xf32>
    %40 = vector.shape_cast %39 : vector<1x8x16x4xf32> to vector<8x16x4xf32>
    %c0_42 = arith.constant 0 : index
    %c0_43 = arith.constant 0 : index
    %c28 = arith.constant 28 : index
    %41 = vector.load %arg6[%c0_42, %c0_43, %c28] : memref<8x16x36xf32, #tpu.memory_space<vmem>>, vector<8x16x4xf32>
    tpu.vector_store %arg6[%c0_42, %c0_43, %c28], %40 {strides = array<i32>} : memref<8x16x36xf32, #tpu.memory_space<vmem>>, vector<8x16x4xf32>,
    %c2_i32_44 = arith.constant 2 : i32
    %42 = arith.addi %1, %c2_i32_44 : i32
    %c0_45 = arith.constant 0 : index
    %43 = arith.index_cast %42 : i32 to index
    %c2_46 = arith.constant 2 : index
    %c0_47 = arith.constant 0 : index
    %44 = vector.load %arg1[%c0_45, %43, %c2_46, %c0_47] : memref<1x18x18x4xf32, #tpu.memory_space<vmem>>, vector<1x8x16x4xf32>
    %45 = vector.shape_cast %44 : vector<1x8x16x4xf32> to vector<8x16x4xf32>
    %c0_48 = arith.constant 0 : index
    %c0_49 = arith.constant 0 : index
    %c32 = arith.constant 32 : index
    %46 = vector.load %arg6[%c0_48, %c0_49, %c32] : memref<8x16x36xf32, #tpu.memory_space<vmem>>, vector<8x16x4xf32>
    tpu.vector_store %arg6[%c0_48, %c0_49, %c32], %45 {strides = array<i32>} : memref<8x16x36xf32, #tpu.memory_space<vmem>>, vector<8x16x4xf32>,
    %c0_50 = arith.constant 0 : index
    %c0_51 = arith.constant 0 : index
    %c0_52 = arith.constant 0 : index
    %47 = vector.load %arg6[%c0_50, %c0_51, %c0_52] : memref<8x16x36xf32, #tpu.memory_space<vmem>>, vector<8x16x36xf32>
    %48 = vector.shape_cast %47 : vector<8x16x36xf32> to vector<128x36xf32>
    %c0_53 = arith.constant 0 : index
    %c0_54 = arith.constant 0 : index
    %49 = vector.load %arg2[%c0_53, %c0_54] : memref<36x12xf32, #tpu.memory_space<vmem>>, vector<36x12xf32>
    %cst = arith.constant dense<0.000000e+00> : vector<128x12xf32>
    %50 = tpu.matmul %48, %49, %cst {dimension_numbers = #tpu.dot_dimension_numbers<[1], [0], [0], [1], [0, 0, 1, 1], [], []>} : vector<128x36xf32>, vector<36x12xf32>, vector<128x12xf32> -> vector<128x12xf32>
    %c0_55 = arith.constant 0 : index
    %c0_56 = arith.constant 0 : index
    %51 = vector.load %arg3[%c0_55, %c0_56] : memref<1x12xf32, #tpu.memory_space<vmem>>, vector<1x12xf32>
    %52 = vector.broadcast %51 : vector<1x12xf32> to vector<128x12xf32>
    %53 = arith.mulf %50, %52 : vector<128x12xf32>
    %c0_57 = arith.constant 0 : index
    %c0_58 = arith.constant 0 : index
    %54 = vector.load %arg4[%c0_57, %c0_58] : memref<1x12xf32, #tpu.memory_space<vmem>>, vector<1x12xf32>
    %55 = vector.broadcast %54 : vector<1x12xf32> to vector<128x12xf32>
    %56 = arith.addf %53, %55 : vector<128x12xf32>
    %cst_59 = arith.constant 0.000000e+00 : f32
    %57 = vector.broadcast %cst_59 : f32 to vector<128x12xf32>
    %58 = arith.maximumf %56, %57 : vector<128x12xf32>
    %59 = vector.shape_cast %58 : vector<128x12xf32> to vector<8x16x12xf32>
    %c0_60 = arith.constant 0 : index
    %60 = arith.index_cast %1 : i32 to index
    %c0_61 = arith.constant 0 : index
    %c0_62 = arith.constant 0 : index
    %61 = vector.load %arg5[%c0_60, %60, %c0_61, %c0_62] : memref<1x16x16x12xf32, #tpu.memory_space<vmem>>, vector<1x8x16x12xf32>
    %62 = vector.shape_cast %61 : vector<1x8x16x12xf32> to vector<8x16x12xf32>
    %63 = vector.shape_cast %59 : vector<8x16x12xf32> to vector<1x8x16x12xf32>
    tpu.vector_store %arg5[%c0_60, %60, %c0_61, %c0_62], %63 {strides = array<i32>} : memref<1x16x16x12xf32, #tpu.memory_space<vmem>>, vector<1x8x16x12xf32>,
    %c1_i32_63 = arith.constant 1 : i32
    %c8_i32_64 = arith.constant 8 : i32
    %64 = arith.muli %c1_i32_63, %c8_i32_64 : i32
    %65 = tpu.assume_multiple %64, 8 : i32
    %c0_i32_65 = arith.constant 0 : i32
    %66 = arith.addi %65, %c0_i32_65 : i32
    %c0_66 = arith.constant 0 : index
    %67 = arith.index_cast %66 : i32 to index
    %c0_67 = arith.constant 0 : index
    %c0_68 = arith.constant 0 : index
    %68 = vector.load %arg1[%c0_66, %67, %c0_67, %c0_68] : memref<1x18x18x4xf32, #tpu.memory_space<vmem>>, vector<1x8x16x4xf32>
    %69 = vector.shape_cast %68 : vector<1x8x16x4xf32> to vector<8x16x4xf32>
    %c0_69 = arith.constant 0 : index
    %c0_70 = arith.constant 0 : index
    %c0_71 = arith.constant 0 : index
    %70 = vector.load %arg6[%c0_69, %c0_70, %c0_71] : memref<8x16x36xf32, #tpu.memory_space<vmem>>, vector<8x16x4xf32>
    tpu.vector_store %arg6[%c0_69, %c0_70, %c0_71], %69 {strides = array<i32>} : memref<8x16x36xf32, #tpu.memory_space<vmem>>, vector<8x16x4xf32>,
    %c0_i32_72 = arith.constant 0 : i32
    %71 = arith.addi %65, %c0_i32_72 : i32
    %c0_73 = arith.constant 0 : index
    %72 = arith.index_cast %71 : i32 to index
    %c1_74 = arith.constant 1 : index
    %c0_75 = arith.constant 0 : index
    %73 = vector.load %arg1[%c0_73, %72, %c1_74, %c0_75] : memref<1x18x18x4xf32, #tpu.memory_space<vmem>>, vector<1x8x16x4xf32>
    %74 = vector.shape_cast %73 : vector<1x8x16x4xf32> to vector<8x16x4xf32>
    %c0_76 = arith.constant 0 : index
    %c0_77 = arith.constant 0 : index
    %c4_78 = arith.constant 4 : index
    %75 = vector.load %arg6[%c0_76, %c0_77, %c4_78] : memref<8x16x36xf32, #tpu.memory_space<vmem>>, vector<8x16x4xf32>
    tpu.vector_store %arg6[%c0_76, %c0_77, %c4_78], %74 {strides = array<i32>} : memref<8x16x36xf32, #tpu.memory_space<vmem>>, vector<8x16x4xf32>,
    %c0_i32_79 = arith.constant 0 : i32
    %76 = arith.addi %65, %c0_i32_79 : i32
    %c0_80 = arith.constant 0 : index
    %77 = arith.index_cast %76 : i32 to index
    %c2_81 = arith.constant 2 : index
    %c0_82 = arith.constant 0 : index
    %78 = vector.load %arg1[%c0_80, %77, %c2_81, %c0_82] : memref<1x18x18x4xf32, #tpu.memory_space<vmem>>, vector<1x8x16x4xf32>
    %79 = vector.shape_cast %78 : vector<1x8x16x4xf32> to vector<8x16x4xf32>
    %c0_83 = arith.constant 0 : index
    %c0_84 = arith.constant 0 : index
    %c8_85 = arith.constant 8 : index
    %80 = vector.load %arg6[%c0_83, %c0_84, %c8_85] : memref<8x16x36xf32, #tpu.memory_space<vmem>>, vector<8x16x4xf32>
    tpu.vector_store %arg6[%c0_83, %c0_84, %c8_85], %79 {strides = array<i32>} : memref<8x16x36xf32, #tpu.memory_space<vmem>>, vector<8x16x4xf32>,
    %c1_i32_86 = arith.constant 1 : i32
    %81 = arith.addi %65, %c1_i32_86 : i32
    %c0_87 = arith.constant 0 : index
    %82 = arith.index_cast %81 : i32 to index
    %c0_88 = arith.constant 0 : index
    %c0_89 = arith.constant 0 : index
    %83 = vector.load %arg1[%c0_87, %82, %c0_88, %c0_89] : memref<1x18x18x4xf32, #tpu.memory_space<vmem>>, vector<1x8x16x4xf32>
    %84 = vector.shape_cast %83 : vector<1x8x16x4xf32> to vector<8x16x4xf32>
    %c0_90 = arith.constant 0 : index
    %c0_91 = arith.constant 0 : index
    %c12_92 = arith.constant 12 : index
    %85 = vector.load %arg6[%c0_90, %c0_91, %c12_92] : memref<8x16x36xf32, #tpu.memory_space<vmem>>, vector<8x16x4xf32>
    tpu.vector_store %arg6[%c0_90, %c0_91, %c12_92], %84 {strides = array<i32>} : memref<8x16x36xf32, #tpu.memory_space<vmem>>, vector<8x16x4xf32>,
    %c1_i32_93 = arith.constant 1 : i32
    %86 = arith.addi %65, %c1_i32_93 : i32
    %c0_94 = arith.constant 0 : index
    %87 = arith.index_cast %86 : i32 to index
    %c1_95 = arith.constant 1 : index
    %c0_96 = arith.constant 0 : index
    %88 = vector.load %arg1[%c0_94, %87, %c1_95, %c0_96] : memref<1x18x18x4xf32, #tpu.memory_space<vmem>>, vector<1x8x16x4xf32>
    %89 = vector.shape_cast %88 : vector<1x8x16x4xf32> to vector<8x16x4xf32>
    %c0_97 = arith.constant 0 : index
    %c0_98 = arith.constant 0 : index
    %c16_99 = arith.constant 16 : index
    %90 = vector.load %arg6[%c0_97, %c0_98, %c16_99] : memref<8x16x36xf32, #tpu.memory_space<vmem>>, vector<8x16x4xf32>
    tpu.vector_store %arg6[%c0_97, %c0_98, %c16_99], %89 {strides = array<i32>} : memref<8x16x36xf32, #tpu.memory_space<vmem>>, vector<8x16x4xf32>,
    %c1_i32_100 = arith.constant 1 : i32
    %91 = arith.addi %65, %c1_i32_100 : i32
    %c0_101 = arith.constant 0 : index
    %92 = arith.index_cast %91 : i32 to index
    %c2_102 = arith.constant 2 : index
    %c0_103 = arith.constant 0 : index
    %93 = vector.load %arg1[%c0_101, %92, %c2_102, %c0_103] : memref<1x18x18x4xf32, #tpu.memory_space<vmem>>, vector<1x8x16x4xf32>
    %94 = vector.shape_cast %93 : vector<1x8x16x4xf32> to vector<8x16x4xf32>
    %c0_104 = arith.constant 0 : index
    %c0_105 = arith.constant 0 : index
    %c20_106 = arith.constant 20 : index
    %95 = vector.load %arg6[%c0_104, %c0_105, %c20_106] : memref<8x16x36xf32, #tpu.memory_space<vmem>>, vector<8x16x4xf32>
    tpu.vector_store %arg6[%c0_104, %c0_105, %c20_106], %94 {strides = array<i32>} : memref<8x16x36xf32, #tpu.memory_space<vmem>>, vector<8x16x4xf32>,
    %c2_i32_107 = arith.constant 2 : i32
    %96 = arith.addi %65, %c2_i32_107 : i32
    %c0_108 = arith.constant 0 : index
    %97 = arith.index_cast %96 : i32 to index
    %c0_109 = arith.constant 0 : index
    %c0_110 = arith.constant 0 : index
    %98 = vector.load %arg1[%c0_108, %97, %c0_109, %c0_110] : memref<1x18x18x4xf32, #tpu.memory_space<vmem>>, vector<1x8x16x4xf32>
    %99 = vector.shape_cast %98 : vector<1x8x16x4xf32> to vector<8x16x4xf32>
    %c0_111 = arith.constant 0 : index
    %c0_112 = arith.constant 0 : index
    %c24_113 = arith.constant 24 : index
    %100 = vector.load %arg6[%c0_111, %c0_112, %c24_113] : memref<8x16x36xf32, #tpu.memory_space<vmem>>, vector<8x16x4xf32>
    tpu.vector_store %arg6[%c0_111, %c0_112, %c24_113], %99 {strides = array<i32>} : memref<8x16x36xf32, #tpu.memory_space<vmem>>, vector<8x16x4xf32>,
    %c2_i32_114 = arith.constant 2 : i32
    %101 = arith.addi %65, %c2_i32_114 : i32
    %c0_115 = arith.constant 0 : index
    %102 = arith.index_cast %101 : i32 to index
    %c1_116 = arith.constant 1 : index
    %c0_117 = arith.constant 0 : index
    %103 = vector.load %arg1[%c0_115, %102, %c1_116, %c0_117] : memref<1x18x18x4xf32, #tpu.memory_space<vmem>>, vector<1x8x16x4xf32>
    %104 = vector.shape_cast %103 : vector<1x8x16x4xf32> to vector<8x16x4xf32>
    %c0_118 = arith.constant 0 : index
    %c0_119 = arith.constant 0 : index
    %c28_120 = arith.constant 28 : index
    %105 = vector.load %arg6[%c0_118, %c0_119, %c28_120] : memref<8x16x36xf32, #tpu.memory_space<vmem>>, vector<8x16x4xf32>
    tpu.vector_store %arg6[%c0_118, %c0_119, %c28_120], %104 {strides = array<i32>} : memref<8x16x36xf32, #tpu.memory_space<vmem>>, vector<8x16x4xf32>,
    %c2_i32_121 = arith.constant 2 : i32
    %106 = arith.addi %65, %c2_i32_121 : i32
    %c0_122 = arith.constant 0 : index
    %107 = arith.index_cast %106 : i32 to index
    %c2_123 = arith.constant 2 : index
    %c0_124 = arith.constant 0 : index
    %108 = vector.load %arg1[%c0_122, %107, %c2_123, %c0_124] : memref<1x18x18x4xf32, #tpu.memory_space<vmem>>, vector<1x8x16x4xf32>
    %109 = vector.shape_cast %108 : vector<1x8x16x4xf32> to vector<8x16x4xf32>
    %c0_125 = arith.constant 0 : index
    %c0_126 = arith.constant 0 : index
    %c32_127 = arith.constant 32 : index
    %110 = vector.load %arg6[%c0_125, %c0_126, %c32_127] : memref<8x16x36xf32, #tpu.memory_space<vmem>>, vector<8x16x4xf32>
    tpu.vector_store %arg6[%c0_125, %c0_126, %c32_127], %109 {strides = array<i32>} : memref<8x16x36xf32, #tpu.memory_space<vmem>>, vector<8x16x4xf32>,
    %c0_128 = arith.constant 0 : index
    %c0_129 = arith.constant 0 : index
    %c0_130 = arith.constant 0 : index
    %111 = vector.load %arg6[%c0_128, %c0_129, %c0_130] : memref<8x16x36xf32, #tpu.memory_space<vmem>>, vector<8x16x36xf32>
    %112 = vector.shape_cast %111 : vector<8x16x36xf32> to vector<128x36xf32>
    %c0_131 = arith.constant 0 : index
    %c0_132 = arith.constant 0 : index
    %113 = vector.load %arg2[%c0_131, %c0_132] : memref<36x12xf32, #tpu.memory_space<vmem>>, vector<36x12xf32>
    %cst_133 = arith.constant dense<0.000000e+00> : vector<128x12xf32>
    %114 = tpu.matmul %112, %113, %cst_133 {dimension_numbers = #tpu.dot_dimension_numbers<[1], [0], [0], [1], [0, 0, 1, 1], [], []>} : vector<128x36xf32>, vector<36x12xf32>, vector<128x12xf32> -> vector<128x12xf32>
    %c0_134 = arith.constant 0 : index
    %c0_135 = arith.constant 0 : index
    %115 = vector.load %arg3[%c0_134, %c0_135] : memref<1x12xf32, #tpu.memory_space<vmem>>, vector<1x12xf32>
    %116 = vector.broadcast %115 : vector<1x12xf32> to vector<128x12xf32>
    %117 = arith.mulf %114, %116 : vector<128x12xf32>
    %c0_136 = arith.constant 0 : index
    %c0_137 = arith.constant 0 : index
    %118 = vector.load %arg4[%c0_136, %c0_137] : memref<1x12xf32, #tpu.memory_space<vmem>>, vector<1x12xf32>
    %119 = vector.broadcast %118 : vector<1x12xf32> to vector<128x12xf32>
    %120 = arith.addf %117, %119 : vector<128x12xf32>
    %cst_138 = arith.constant 0.000000e+00 : f32
    %121 = vector.broadcast %cst_138 : f32 to vector<128x12xf32>
    %122 = arith.maximumf %120, %121 : vector<128x12xf32>
    %123 = vector.shape_cast %122 : vector<128x12xf32> to vector<8x16x12xf32>
    %c0_139 = arith.constant 0 : index
    %124 = arith.index_cast %65 : i32 to index
    %c0_140 = arith.constant 0 : index
    %c0_141 = arith.constant 0 : index
    %125 = vector.load %arg5[%c0_139, %124, %c0_140, %c0_141] : memref<1x16x16x12xf32, #tpu.memory_space<vmem>>, vector<1x8x16x12xf32>
    %126 = vector.shape_cast %125 : vector<1x8x16x12xf32> to vector<8x16x12xf32>
    %127 = vector.shape_cast %123 : vector<8x16x12xf32> to vector<1x8x16x12xf32>
    tpu.vector_store %arg5[%c0_139, %124, %c0_140, %c0_141], %127 {strides = array<i32>} : memref<1x16x16x12xf32, #tpu.memory_space<vmem>>, vector<1x8x16x12xf32>,
    %c2_i32_142 = arith.constant 2 : i32
    return
  }
  func.func @transform_0(%arg0: i32) -> (i32, i32, i32, i32) {
    %c0_i32 = arith.constant 0 : i32
    %c0_i32_0 = arith.constant 0 : i32
    %c0_i32_1 = arith.constant 0 : i32
    %c0_i32_2 = arith.constant 0 : i32
    return %arg0, %c0_i32, %c0_i32_0, %c0_i32_1 : i32, i32, i32, i32
  }
  func.func @transform_1(%arg0: i32) -> (i32, i32) {
    %c0_i32 = arith.constant 0 : i32
    %c0_i32_0 = arith.constant 0 : i32
    %c0_i32_1 = arith.constant 0 : i32
    return %c0_i32, %c0_i32_0 : i32, i32
  }
  func.func @transform_2(%arg0: i32) -> (i32, i32) {
    %c0_i32 = arith.constant 0 : i32
    %c0_i32_0 = arith.constant 0 : i32
    %c0_i32_1 = arith.constant 0 : i32
    return %c0_i32, %c0_i32_0 : i32, i32
  }
  func.func @transform_3(%arg0: i32) -> (i32, i32) {
    %c0_i32 = arith.constant 0 : i32
    %c0_i32_0 = arith.constant 0 : i32
    %c0_i32_1 = arith.constant 0 : i32
    return %c0_i32, %c0_i32_0 : i32, i32
  }
  func.func @transform_4(%arg0: i32) -> (i32, i32, i32, i32) {
    %c0_i32 = arith.constant 0 : i32
    %c0_i32_0 = arith.constant 0 : i32
    %c0_i32_1 = arith.constant 0 : i32
    %c0_i32_2 = arith.constant 0 : i32
    return %arg0, %c0_i32, %c0_i32_0, %c0_i32_1 : i32, i32, i32, i32
  }
}

</mosaic_0001>

<bundles_post_ra>
// kernel: _duc_impl.2
= control target key start
LH: loop header
LB: loop body
LE: loop exit
PB: predicated region body
PF: predicated region fallthrough
CT: control target
= control target key end

     0   :  { %s2907_s9 = smov 0   ;;  %s4024_s0 = inlined_call_operand.vmem [shape: f32[2,18,18,4], index: 0, kind: input, shape index: {}]   ;;  %s4025_s1 = inlined_call_operand.vmem [shape: f32[36,12], index: 1, kind: input, shape index: {}]   ;;  %s4026_s2 = inlined_call_operand.vmem [shape: f32[2,2,12], index: 2, kind: output, shape index: {}]  }
   0x1 LB: > { %s2450_s10 = sadd.s32 4294967295, %s2882_s9   ;;  %p2454_p0 = scmp.ge.s32.totalorder %s2882_s9, 1  ;;  %s2882_s9 = sphi %s2907_s9, %s12_s9  }
   0x2   : > { %p112_p1 = scmp.lt.s32.totalorder %s2882_s9, 3 }
   0x4   : > { %p113_p2 = pnand %p2454_p0, %p112_p1 }
   0x5   : > { %p133_p3 = scmp.lt.s32.totalorder (!%p113_p2), %s2450_s10, 1  ;;  %s2884_s15 = smov (!%p113_p2), 4   ;;  %vm160_vm0 = vcmask (!%p113_p2), 31744   ;;  %vm257_vm1 = vcmask (!%p113_p2), 64544   ;;  %vm354_vm2 = vcmask (!%p113_p2), 97344   ;;  %vm1029_vm3 = vcmask (!%p113_p2), 1043456  }
   0x6   : > { %116 = sbr.rel (%p113_p2) target bundleno = 887 (0x377), region = 28  ;;  %s2885_s16 = smov (!%p113_p2), 8   ;;  %vm454_vm4 = vcmask (!%p113_p2), 130144   ;;  %vm551_vm5 = vcmask (!%p113_p2), 162944   ;;  %vm648_vm6 = vcmask (!%p113_p2), 195744   ;;  %vm748_vm7 = vcmask (!%p113_p2), 228544  }
   0x7   : > { %s2886_s17 = smov (!%p113_p2), 12   ;;  %s2887_s18 = smov (!%p113_p2), 16   ;;  %vm845_vm8 = vcmask (!%p113_p2), 261344   ;;  %vm942_vm9 = vcmask (!%p113_p2), 294144   ;;  %vm980_vm10 = vcmask (!%p113_p2), 293888   ;;  %vm1178_vm11 = vcmask (!%p113_p2), 97280  }
   0x8   : > { %s2888_s19 = smov (!%p113_p2), 20   ;;  %s2889_s28 = smov (!%p113_p2), 24   ;;  %vm2388_vm12 = vcmask (!%p113_p2), 1040384   ;;  %vm2390_vm13 = vcmask (!%p113_p2), 91136  }
   0x9   : > { %s2890_s29 = smov (!%p113_p2), 28   ;;  %s2891_s4 = smov (!%p113_p2), 32  }
   0xd   : > { %s4028_s10 = smov (!%p133_p3, %s2450_s10), 1 }
   0xe   : > { %s2859_s11 = smul.u32 432, %s4028_s10  ;;  %s2456_s7 = sshll.u32 %s4028_s10, 1 }
   0xf   : > { %s141_s12 = scalar_lea.vmem %s4026_s2, %s2456_s7 }
  0x10   : > { %s2921_s14 = scalar_lea.vmem %s4024_s0, %s2859_s11 }
  0x11   : > { %v2924_v0 = vld [vmem:[%s2921_s14 + $0x19] sm:$0xff]  ;;  %v177_v1 = vld [vmem:[%s2921_s14 + $0x1] sm:$0xff]  ;;  %v178_v3 = vld [vmem:[%s2921_s14 + $0x9] sm:$0xff] }
  0x12   : > { %213 = vrot.lane.b32.xlu1 %v2924_v0, %s2884_s15  ;;  %209 = vrot.lane.b32.xlu0 %v177_v1, %s2884_s15  ;;  %v2931_v2 = vld [vmem:[%s2921_s14 + $0x21] sm:$0xff]  ;;  %v2938_v4 = vld [vmem:[%s2921_s14 + $0x39] sm:$0xff] }
  0x13   : > { %v2941_v5 = vld [vmem:[%s2921_s14 + $0x31] sm:$0xff]  ;;  %v2951_v7 = vld [vmem:[%s2921_s14 + $0x49] sm:$0xff]  ;;  %v2954_v8 = vld [vmem:[%s2921_s14 + $0x20] sm:$0xff] }
  0x14   : > { %v2948_v6 = vld [vmem:[%s2921_s14 + $0x51] sm:$0xff]  ;;  %v2957_v9 = vld [vmem:[%s2921_s14 + $0x69] sm:$0xff]  ;;  %v2960_v10 = vld [vmem:[%s2921_s14 + $0x61] sm:$0xff]  ;;  %164 = vst.msk [vmem:[#allocation2 + $0x18] sm:$0xff] %vm160_vm0, %v2954_v8 }
  0x15   : > { %v2963_v11 = vld [vmem:[%s2921_s14 + $0x18] sm:$0xff]  ;;  %v2969_v13 = vld [vmem:[%s2921_s14 + $0x30] sm:$0xff]  ;;  %v2981_v15 = vld [vmem:[%s2921_s14 + $0x48] sm:$0xff] }
  0x16   : > { %215 = vrot.lane.b32.xlu1 %v2931_v2, %s2884_s15  ;;  %211 = vrot.lane.b32.xlu0 %v178_v3, %s2884_s15  ;;  %v2966_v12 = vld [vmem:[%s2921_s14 + $0x38] sm:$0xff]  ;;  %v2978_v14 = vld [vmem:[%s2921_s14 + $0x50] sm:$0xff]  ;;  %163 = vst.msk [vmem:[#allocation2 + $0x10] sm:$0xff] %vm160_vm0, %v2963_v11  ;;  %165 = vst.msk [vmem:[#allocation2 + $0x20] sm:$0xff] %vm160_vm0, %v2969_v13 }
  0x17   : > { %166 = vst.msk [vmem:[#allocation2 + $0x28] sm:$0xff] %vm160_vm0, %v2966_v12  ;;  %v2990_v16 = vld [vmem:[%s2921_s14 + $0x68] sm:$0xff]  ;;  %v2993_v17 = vld [vmem:[%s2921_s14 + $0x60] sm:$0xff]  ;;  %168 = vst.msk [vmem:[#allocation2 + $0x38] sm:$0xff] %vm160_vm0, %v2978_v14 }
  0x18   : > { %v2996_v18 = vld [vmem:[%s2921_s14 + $0x80] sm:$0xff]  ;;  %167 = vst.msk [vmem:[#allocation2 + $0x30] sm:$0xff] %vm160_vm0, %v2981_v15  ;;  %v3003_v19 = vld [vmem:[%s2921_s14 + $0x78] sm:$0xff]  ;;  %v3009_v21 = vld [vmem:[%s2921_s14 + $0x90] sm:$0xff] }
  0x19   : > { %v3006_v20 = vld [vmem:[%s2921_s14 + $0x98] sm:$0xff]  ;;  %170 = vst.msk [vmem:[#allocation2 + $0x48] sm:$0xff] %vm160_vm0, %v2990_v16  ;;  %169 = vst.msk [vmem:[#allocation2 + $0x40] sm:$0xff] %vm160_vm0, %v2993_v17  ;;  %v3018_v22 = vld [vmem:[%s2921_s14 + $0xb0] sm:$0xff] }
  0x1a   : > { %219 = vrot.lane.b32.xlu1 %v2938_v4, %s2884_s15  ;;  %217 = vrot.lane.b32.xlu0 %v2941_v5, %s2884_s15  ;;  %172 = vst.msk [vmem:[#allocation2 + $0x58] sm:$0xff] %vm160_vm0, %v2996_v18  ;;  %v3021_v23 = vld [vmem:[%s2921_s14 + $0xa8] sm:$0xff]  ;;  %171 = vst.msk [vmem:[#allocation2 + $0x50] sm:$0xff] %vm160_vm0, %v3003_v19  ;;  %v144_v24 = vld [vmem:[%s2921_s14] sm:$0xff] }
  0x1b   : > { %174 = vst.msk [vmem:[#allocation2 + $0x68] sm:$0xff] %vm160_vm0, %v3006_v20  ;;  %173 = vst.msk [vmem:[#allocation2 + $0x60] sm:$0xff] %vm160_vm0, %v3009_v21  ;;  %v3039_v25 = vld [vmem:[%s2921_s14 + $0x81] sm:$0xff]  ;;  %v3042_v26 = vld [vmem:[%s2921_s14 + $0x79] sm:$0xff] }
  0x1c   : > { %176 = vst.msk [vmem:[#allocation2 + $0x78] sm:$0xff] %vm160_vm0, %v3018_v22  ;;  %175 = vst.msk [vmem:[#allocation2 + $0x70] sm:$0xff] %vm160_vm0, %v3021_v23  ;;  %v145_v27 = vld [vmem:[%s2921_s14 + $0x8] sm:$0xff]  ;;  %v3052_v28 = vld [vmem:[%s2921_s14 + $0x99] sm:$0xff] }
  0x1d   : > { %161 = vst.msk [vmem:[#allocation2] sm:$0xff] %vm160_vm0, %v144_v24  ;;  %162 = vst.msk [vmem:[#allocation2 + $0x8] sm:$0xff] %vm160_vm0, %v145_v27  ;;  %v3055_v29 = vld [vmem:[%s2921_s14 + $0x91] sm:$0xff]  ;;  %v3065_v31 = vld [vmem:[%s2921_s14 + $0xa9] sm:$0xff] }
  0x1e   : > { %223 = vrot.lane.b32.xlu1 %v2948_v6, %s2884_s15  ;;  %221 = vrot.lane.b32.xlu0 %v2951_v7, %s2884_s15  ;;  %v3062_v30 = vld [vmem:[%s2921_s14 + $0xb1] sm:$0xff]  ;;  %v274_v33 = vld [vmem:[%s2921_s14 + $0x2] sm:$0xff] }
  0x1f   : > { %v275_v32 = vld [vmem:[%s2921_s14 + $0xa] sm:$0xff]  ;;  %v3076_v34 = vld [vmem:[%s2921_s14 + $0x22] sm:$0xff]  ;;  %v3079_v35 = vld [vmem:[%s2921_s14 + $0x1a] sm:$0xff] }
  0x20   : > { %v3086_v36 = vld [vmem:[%s2921_s14 + $0x3a] sm:$0xff]  ;;  %v3089_v37 = vld [vmem:[%s2921_s14 + $0x32] sm:$0xff]  ;;  %v3099_v39 = vld [vmem:[%s2921_s14 + $0x4a] sm:$0xff] }
  0x21   : > { %v3096_v38 = vld [vmem:[%s2921_s14 + $0x52] sm:$0xff]  ;;  %v3106_v40 = vld [vmem:[%s2921_s14 + $0x6a] sm:$0xff]  ;;  %v3109_v41 = vld [vmem:[%s2921_s14 + $0x62] sm:$0xff] }
  0x22   : > { %227 = vrot.lane.b32.xlu1 %v2957_v9, %s2884_s15  ;;  %225 = vrot.lane.b32.xlu0 %v2960_v10, %s2884_s15  ;;  %v3116_v42 = vld [vmem:[%s2921_s14 + $0x82] sm:$0xff]  ;;  %v3119_v43 = vld [vmem:[%s2921_s14 + $0x7a] sm:$0xff] }
  0x23   : > { %v3126_v44 = vld [vmem:[%s2921_s14 + $0x9a] sm:$0xff]  ;;  %v3129_v45 = vld [vmem:[%s2921_s14 + $0x92] sm:$0xff]  ;;  %v3139_v47 = vld [vmem:[%s2921_s14 + $0xaa] sm:$0xff] }
  0x24   : > { %v3136_v46 = vld [vmem:[%s2921_s14 + $0xb2] sm:$0xff]  ;;  %v3174_v48 = vld [vmem:[%s2921_s14 + $0xc8] sm:$0xff]  ;;  %v3177_v49 = vld [vmem:[%s2921_s14 + $0xc0] sm:$0xff] }
  0x25   : > { %v3216_v54 = vld [vmem:[%s2921_s14 + $0xc9] sm:$0xff]  ;;  %v3219_v55 = vld [vmem:[%s2921_s14 + $0xc1] sm:$0xff] }
  0x26   : > { %231 = vrot.lane.b32.xlu1 %v3039_v25, %s2884_s15  ;;  %229 = vrot.lane.b32.xlu0 %v3042_v26, %s2884_s15 }
  0x2a   : > { %235 = vrot.lane.b32.xlu1 %v3052_v28, %s2884_s15  ;;  %233 = vrot.lane.b32.xlu0 %v3055_v29, %s2884_s15 }
  0x2e   : > { %239 = vrot.lane.b32.xlu1 %v3062_v30, %s2884_s15  ;;  %237 = vrot.lane.b32.xlu0 %v3065_v31, %s2884_s15 }
  0x32   : > { %308 = vrot.lane.b32.xlu1 %v275_v32, %s2885_s16  ;;  %306 = vrot.lane.b32.xlu0 %v274_v33, %s2885_s16  ;;  %v3270_v32 = vld [vmem:[%s2921_s14 + $0xca] sm:$0xff]  ;;  %v3273_v33 = vld [vmem:[%s2921_s14 + $0xc2] sm:$0xff] }
  0x36   : > { %312 = vrot.lane.b32.xlu1 %v3076_v34, %s2885_s16  ;;  %310 = vrot.lane.b32.xlu0 %v3079_v35, %s2885_s16 }
  0x3a   : > { %316 = vrot.lane.b32.xlu1 %v3086_v36, %s2885_s16  ;;  %314 = vrot.lane.b32.xlu0 %v3089_v37, %s2885_s16 }
  0x3e   : > { %320 = vrot.lane.b32.xlu1 %v3096_v38, %s2885_s16  ;;  %318 = vrot.lane.b32.xlu0 %v3099_v39, %s2885_s16 }
  0x42   : > { %324 = vrot.lane.b32.xlu1 %v3106_v40, %s2885_s16  ;;  %322 = vrot.lane.b32.xlu0 %v3109_v41, %s2885_s16 }
  0x46   : > { %328 = vrot.lane.b32.xlu1 %v3116_v42, %s2885_s16  ;;  %326 = vrot.lane.b32.xlu0 %v3119_v43, %s2885_s16 }
  0x4a   : > { %332 = vrot.lane.b32.xlu1 %v3126_v44, %s2885_s16  ;;  %330 = vrot.lane.b32.xlu0 %v3129_v45, %s2885_s16 }
  0x4e   : > { %336 = vrot.lane.b32.xlu1 %v3136_v46, %s2885_s16  ;;  %334 = vrot.lane.b32.xlu0 %v3139_v47, %s2885_s16 }
  0x52   : > { %408 = vrot.lane.b32.xlu1 %v2954_v8, %s2886_s17  ;;  %406 = vrot.lane.b32.xlu0 %v2963_v11, %s2886_s17 }
  0x56   : > { %412 = vrot.lane.b32.xlu1 %v2966_v12, %s2886_s17  ;;  %410 = vrot.lane.b32.xlu0 %v2969_v13, %s2886_s17 }
  0x5a   : > { %416 = vrot.lane.b32.xlu1 %v2978_v14, %s2886_s17  ;;  %414 = vrot.lane.b32.xlu0 %v2981_v15, %s2886_s17 }
  0x5e   : > { %420 = vrot.lane.b32.xlu1 %v2990_v16, %s2886_s17  ;;  %418 = vrot.lane.b32.xlu0 %v2993_v17, %s2886_s17 }
  0x62   : > { %424 = vrot.lane.b32.xlu1 %v2996_v18, %s2886_s17  ;;  %422 = vrot.lane.b32.xlu0 %v3003_v19, %s2886_s17 }
  0x66   : > { %428 = vrot.lane.b32.xlu1 %v3006_v20, %s2886_s17  ;;  %426 = vrot.lane.b32.xlu0 %v3009_v21, %s2886_s17 }
  0x6a   : > { %432 = vrot.lane.b32.xlu1 %v3018_v22, %s2886_s17  ;;  %430 = vrot.lane.b32.xlu0 %v3021_v23, %s2886_s17 }
  0x6e   : > { %436 = vrot.lane.b32.xlu1 %v3174_v48, %s2886_s17  ;;  %434 = vrot.lane.b32.xlu0 %v3177_v49, %s2886_s17 }
  0x72   : > { %505 = vrot.lane.b32.xlu1 %v2931_v2, %s2887_s18  ;;  %503 = vrot.lane.b32.xlu0 %v2924_v0, %s2887_s18 }
  0x76   : > { %509 = vrot.lane.b32.xlu1 %v2938_v4, %s2887_s18  ;;  %507 = vrot.lane.b32.xlu0 %v2941_v5, %s2887_s18 }
  0x7a   : > { %513 = vrot.lane.b32.xlu1 %v2948_v6, %s2887_s18  ;;  %511 = vrot.lane.b32.xlu0 %v2951_v7, %s2887_s18 }
  0x7e   : > { %517 = vrot.lane.b32.xlu1 %v2957_v9, %s2887_s18  ;;  %515 = vrot.lane.b32.xlu0 %v2960_v10, %s2887_s18 }
  0x82   : > { %521 = vrot.lane.b32.xlu1 %v3039_v25, %s2887_s18  ;;  %519 = vrot.lane.b32.xlu0 %v3042_v26, %s2887_s18 }
  0x84   : > { %v214_v50 = vpop.permute.xlu1 %213  ;;  %v210_v51 = vpop.permute.xlu0 %209 }
  0x85   : > { %260 = vst.msk [vmem:[#allocation2 + $0x10] sm:$0xff] %vm257_vm1, %v214_v50  ;;  %258 = vst.msk [vmem:[#allocation2] sm:$0xff] %vm257_vm1, %v210_v51  ;;  %v975_v50 = vld [vmem:[%s4025_s1] sm:$0xff]  ;;  %v976_v51 = vld [vmem:[%s4025_s1 + $0x8] sm:$0xff] }
  0x86   : > { %525 = vrot.lane.b32.xlu1 %v3052_v28, %s2887_s18  ;;  %523 = vrot.lane.b32.xlu0 %v3055_v29, %s2887_s18 }
  0x88   : > { %v216_v52 = vpop.permute.xlu1 %215  ;;  %v212_v53 = vpop.permute.xlu0 %211 }
  0x89   : > { %261 = vst.msk [vmem:[#allocation2 + $0x18] sm:$0xff] %vm257_vm1, %v216_v52  ;;  %259 = vst.msk [vmem:[#allocation2 + $0x8] sm:$0xff] %vm257_vm1, %v212_v53  ;;  %v2843_v52 = vpack.c.bf16 %v976_v51, %v975_v50 }
  0x8a   : > { %529 = vrot.lane.b32.xlu1 %v3062_v30, %s2887_s18  ;;  %527 = vrot.lane.b32.xlu0 %v3065_v31, %s2887_s18 }
  0x8b   : > { %2844 = vmatprep.subr.bf16.mxu0 %v2843_v52  ;;  %2852 = vmatprep.subr.bf16.mxu1 %v2843_v52 }
  0x8c   : > { %v220_v56 = vpop.permute.xlu1 %219  ;;  %v218_v57 = vpop.permute.xlu0 %217  ;;  %2846 = vmatpush3.bf16.msra.mxu0 %v2843_v52  ;;  %2854 = vmatpush3.bf16.msra.mxu1 %v2843_v52 }
  0x8d   : > { %263 = vst.msk [vmem:[#allocation2 + $0x28] sm:$0xff] %vm257_vm1, %v220_v56  ;;  %262 = vst.msk [vmem:[#allocation2 + $0x20] sm:$0xff] %vm257_vm1, %v218_v57  ;;  %v977_v57 = vld [vmem:[%s4025_s1 + $0x10] sm:$0xff] }
  0x8e   : > { %533 = vrot.lane.b32.xlu1 %v3216_v54, %s2887_s18  ;;  %531 = vrot.lane.b32.xlu0 %v3219_v55, %s2887_s18 }
  0x90   : > { %v224_v58 = vpop.permute.xlu1 %223  ;;  %v222_v59 = vpop.permute.xlu0 %221 }
  0x91   : > { %265 = vst.msk [vmem:[#allocation2 + $0x38] sm:$0xff] %vm257_vm1, %v224_v58  ;;  %264 = vst.msk [vmem:[#allocation2 + $0x30] sm:$0xff] %vm257_vm1, %v222_v59  ;;  %v978_v58 = vld [vmem:[%s4025_s1 + $0x18] sm:$0xff] }
  0x92   : > { %602 = vrot.lane.b32.xlu1 %v3076_v34, %s2888_s19  ;;  %600 = vrot.lane.b32.xlu0 %v3079_v35, %s2888_s19  ;;  %v2847_v59 = vpack.c.bf16 %v978_v58, %v977_v57  ;;  %v3431_v57 = vld [vmem:[%s2921_s14 + $0xf0] sm:$0xff] }
  0x94   : > { %v228_v60 = vpop.permute.xlu1 %227  ;;  %v226_v61 = vpop.permute.xlu0 %225  ;;  %2848 = vmatprep.subr.bf16.mxu0 %v2847_v59  ;;  %2856 = vmatprep.subr.bf16.mxu1 %v2847_v59 }
  0x95   : > { %267 = vst.msk [vmem:[#allocation2 + $0x48] sm:$0xff] %vm257_vm1, %v228_v60  ;;  %266 = vst.msk [vmem:[#allocation2 + $0x40] sm:$0xff] %vm257_vm1, %v226_v61  ;;  %2850 = vmatpush3.bf16.msra.mxu0 %v2847_v59  ;;  %2858 = vmatpush3.bf16.msra.mxu1 %v2847_v59 }
  0x96   : > { %606 = vrot.lane.b32.xlu1 %v3086_v36, %s2888_s19  ;;  %604 = vrot.lane.b32.xlu0 %v3089_v37, %s2888_s19 }
  0x98   : > { %v232_v62 = vpop.permute.xlu1 %231  ;;  %v230_v63 = vpop.permute.xlu0 %229 }
  0x99   : > { %269 = vst.msk [vmem:[#allocation2 + $0x58] sm:$0xff] %vm257_vm1, %v232_v62  ;;  %268 = vst.msk [vmem:[#allocation2 + $0x50] sm:$0xff] %vm257_vm1, %v230_v63 }
  0x9a   : > { %610 = vrot.lane.b32.xlu1 %v3096_v38, %s2888_s19  ;;  %608 = vrot.lane.b32.xlu0 %v3099_v39, %s2888_s19 }
  0x9c   : > { %v236_v0 = vpop.permute.xlu1 %235  ;;  %v234_v1 = vpop.permute.xlu0 %233 }
  0x9d   : > { %271 = vst.msk [vmem:[#allocation2 + $0x68] sm:$0xff] %vm257_vm1, %v236_v0  ;;  %270 = vst.msk [vmem:[#allocation2 + $0x60] sm:$0xff] %vm257_vm1, %v234_v1 }
  0x9e   : > { %614 = vrot.lane.b32.xlu1 %v3106_v40, %s2888_s19  ;;  %612 = vrot.lane.b32.xlu0 %v3109_v41, %s2888_s19 }
  0xa0   : > { %v240_v2 = vpop.permute.xlu1 %239  ;;  %v238_v3 = vpop.permute.xlu0 %237 }
  0xa1   : > { %273 = vst.msk [vmem:[#allocation2 + $0x78] sm:$0xff] %vm257_vm1, %v240_v2  ;;  %272 = vst.msk [vmem:[#allocation2 + $0x70] sm:$0xff] %vm257_vm1, %v238_v3 }
  0xa2   : > { %618 = vrot.lane.b32.xlu1 %v3116_v42, %s2888_s19  ;;  %616 = vrot.lane.b32.xlu0 %v3119_v43, %s2888_s19 }
  0xa4   : > { %v309_v8 = vpop.permute.xlu1 %308  ;;  %v307_v11 = vpop.permute.xlu0 %306 }
  0xa5   : > { %356 = vst.msk [vmem:[#allocation2 + $0x8] sm:$0xff] %vm354_vm2, %v309_v8  ;;  %355 = vst.msk [vmem:[#allocation2] sm:$0xff] %vm354_vm2, %v307_v11  ;;  %v3389_v8 = vld [vmem:[%s2921_s14 + $0xe0] sm:$0xff] }
  0xa6   : > { %622 = vrot.lane.b32.xlu1 %v3126_v44, %s2888_s19  ;;  %620 = vrot.lane.b32.xlu0 %v3129_v45, %s2888_s19 }
  0xa8   : > { %v313_v24 = vpop.permute.xlu1 %312  ;;  %v311_v27 = vpop.permute.xlu0 %310 }
  0xa9   : > { %358 = vst.msk [vmem:[#allocation2 + $0x18] sm:$0xff] %vm354_vm2, %v313_v24  ;;  %357 = vst.msk [vmem:[#allocation2 + $0x10] sm:$0xff] %vm354_vm2, %v311_v27 }
  0xaa   : > { %626 = vrot.lane.b32.xlu1 %v3136_v46, %s2888_s19  ;;  %624 = vrot.lane.b32.xlu0 %v3139_v47, %s2888_s19 }
  0xac   : > { %v317_v34 = vpop.permute.xlu1 %316  ;;  %v315_v35 = vpop.permute.xlu0 %314 }
  0xad   : > { %360 = vst.msk [vmem:[#allocation2 + $0x28] sm:$0xff] %vm354_vm2, %v317_v34  ;;  %359 = vst.msk [vmem:[#allocation2 + $0x20] sm:$0xff] %vm354_vm2, %v315_v35  ;;  %v3407_v34 = vld [vmem:[%s2921_s14 + $0xe1] sm:$0xff] }
  0xae   : > { %630 = vrot.lane.b32.xlu1 %v3270_v32, %s2888_s19  ;;  %628 = vrot.lane.b32.xlu0 %v3273_v33, %s2888_s19 }
  0xb0   : > { %v321_v53 = vpop.permute.xlu1 %320  ;;  %v319_v56 = vpop.permute.xlu0 %318 }
  0xb1   : > { %362 = vst.msk [vmem:[#allocation2 + $0x38] sm:$0xff] %vm354_vm2, %v321_v53  ;;  %361 = vst.msk [vmem:[#allocation2 + $0x30] sm:$0xff] %vm354_vm2, %v319_v56 }
  0xb2   : > { %702 = vrot.lane.b32.xlu1 %v2966_v12, %s2889_s28  ;;  %700 = vrot.lane.b32.xlu0 %v2969_v13, %s2889_s28  ;;  %v979_v12 = vld [vmem:[%s4025_s1 + $0x20] sm:$0xf] }
  0xb3   : > { %2783 = vmatprep.subr.msk.mxu0 %vm1029_vm3, %v979_v12 }
  0xb4   : > { %v325_v60 = vpop.permute.xlu1 %324  ;;  %v323_v61 = vpop.permute.xlu0 %322  ;;  %2784 = vmatpush3.msk.msra.mxu0 %vm1029_vm3, %v979_v12 }
  0xb5   : > { %364 = vst.msk [vmem:[#allocation2 + $0x48] sm:$0xff] %vm354_vm2, %v325_v60  ;;  %363 = vst.msk [vmem:[#allocation2 + $0x40] sm:$0xff] %vm354_vm2, %v323_v61  ;;  %v3446_v61 = vld [vmem:[%s2921_s14 + $0xf8] sm:$0xff] }
  0xb6   : > { %797 = vrot.lane.b32.xlu1 %v2941_v5, %s2890_s29  ;;  %704 = vrot.lane.b32.xlu0 %v2981_v15, %s2889_s28 }
  0xb8   : > { %v329_v13 = vpop.permute.xlu1 %328  ;;  %v327_v62 = vpop.permute.xlu0 %326 }
  0xb9   : > { %366 = vst.msk [vmem:[#allocation2 + $0x58] sm:$0xff] %vm354_vm2, %v329_v13  ;;  %365 = vst.msk [vmem:[#allocation2 + $0x50] sm:$0xff] %vm354_vm2, %v327_v62  ;;  %v2682_v13 = vld [vmem:[%s2921_s14 + $0xf1] sm:$0xff] }
  0xba   : > { %894 = vrot.lane.b32.xlu1 %v3089_v37, %s2891_s4  ;;  %799 = vrot.lane.b32.xlu0 %v2938_v4, %s2890_s29 }
  0xbc   : > { %v333_v5 = vpop.permute.xlu1 %332  ;;  %v331_v15 = vpop.permute.xlu0 %330 }
  0xbd   : > { %368 = vst.msk [vmem:[#allocation2 + $0x68] sm:$0xff] %vm354_vm2, %v333_v5  ;;  %367 = vst.msk [vmem:[#allocation2 + $0x60] sm:$0xff] %vm354_vm2, %v331_v15 }
  0xbe   : > { %706 = vrot.lane.b32.xlu1 %v2978_v14, %s2889_s28  ;;  %896 = vrot.lane.b32.xlu0 %v3086_v36, %s2891_s4 }
  0xc0   : > { %v337_v63 = vpop.permute.xlu1 %336  ;;  %v335_v0 = vpop.permute.xlu0 %334 }
  0xc1   : > { %370 = vst.msk [vmem:[#allocation2 + $0x78] sm:$0xff] %vm354_vm2, %v337_v63  ;;  %369 = vst.msk [vmem:[#allocation2 + $0x70] sm:$0xff] %vm354_vm2, %v335_v0  ;;  %v2683_v63 = vld [vmem:[%s2921_s14 + $0xf9] sm:$0xff] }
  0xc2   : > { %803 = vrot.lane.b32.xlu1 %v2948_v6, %s2890_s29  ;;  %801 = vrot.lane.b32.xlu0 %v2951_v7, %s2890_s29 }
  0xc4   : > { %v409_v4 = vpop.permute.xlu1 %408  ;;  %v407_v37 = vpop.permute.xlu0 %406 }
  0xc5   : > { %456 = vst.msk [vmem:[#allocation2 + $0x8] sm:$0xff] %vm454_vm4, %v409_v4  ;;  %455 = vst.msk [vmem:[#allocation2] sm:$0xff] %vm454_vm4, %v407_v37 }
  0xc6   : > { %900 = vrot.lane.b32.xlu1 %v3096_v38, %s2891_s4  ;;  %898 = vrot.lane.b32.xlu0 %v3099_v39, %s2891_s4 }
  0xc8   : > { %v413_v14 = vpop.permute.xlu1 %412  ;;  %v411_v36 = vpop.permute.xlu0 %410 }
  0xc9   : > { %458 = vst.msk [vmem:[#allocation2 + $0x18] sm:$0xff] %vm454_vm4, %v413_v14  ;;  %457 = vst.msk [vmem:[#allocation2 + $0x10] sm:$0xff] %vm454_vm4, %v411_v36 }
  0xca   : > { %710 = vrot.lane.b32.xlu1 %v2990_v16, %s2889_s28  ;;  %708 = vrot.lane.b32.xlu0 %v2993_v17, %s2889_s28 }
  0xcc   : > { %v417_v6 = vpop.permute.xlu1 %416  ;;  %v415_v7 = vpop.permute.xlu0 %414 }
  0xcd   : > { %460 = vst.msk [vmem:[#allocation2 + $0x28] sm:$0xff] %vm454_vm4, %v417_v6  ;;  %459 = vst.msk [vmem:[#allocation2 + $0x20] sm:$0xff] %vm454_vm4, %v415_v7 }
  0xce   : > { %807 = vrot.lane.b32.xlu1 %v2957_v9, %s2890_s29  ;;  %805 = vrot.lane.b32.xlu0 %v2960_v10, %s2890_s29 }
  0xd0   : > { %v421_v38 = vpop.permute.xlu1 %420  ;;  %v419_v39 = vpop.permute.xlu0 %418 }
  0xd1   : > { %462 = vst.msk [vmem:[#allocation2 + $0x38] sm:$0xff] %vm454_vm4, %v421_v38  ;;  %461 = vst.msk [vmem:[#allocation2 + $0x30] sm:$0xff] %vm454_vm4, %v419_v39 }
  0xd2   : > { %904 = vrot.lane.b32.xlu1 %v3106_v40, %s2891_s4  ;;  %902 = vrot.lane.b32.xlu0 %v3109_v41, %s2891_s4 }
  0xd4   : > { %v425_v16 = vpop.permute.xlu1 %424  ;;  %v423_v17 = vpop.permute.xlu0 %422 }
  0xd5   : > { %464 = vst.msk [vmem:[#allocation2 + $0x48] sm:$0xff] %vm454_vm4, %v425_v16  ;;  %463 = vst.msk [vmem:[#allocation2 + $0x40] sm:$0xff] %vm454_vm4, %v423_v17 }
  0xd6   : > { %712 = vrot.lane.b32.xlu1 %v3003_v19, %s2889_s28  ;;  %1337 = vrot.lane.b32.xlu0 %v3219_v55, %s2884_s15  ;;  %v3371_v19 = vld [vmem:[%s2921_s14 + $0xd8] sm:$0xff] }
  0xd8   : > { %v429_v9 = vpop.permute.xlu1 %428  ;;  %v427_v10 = vpop.permute.xlu0 %426 }
  0xd9   : > { %466 = vst.msk [vmem:[#allocation2 + $0x58] sm:$0xff] %vm454_vm4, %v429_v9  ;;  %465 = vst.msk [vmem:[#allocation2 + $0x50] sm:$0xff] %vm454_vm4, %v427_v10  ;;  %v3501_v10 = vld [vmem:[%s2921_s14 + $0x108] sm:$0xff] }
  0xda   : > { %1433 = vrot.lane.b32.xlu1 %v3273_v33, %s2885_s16  ;;  %1339 = vrot.lane.b32.xlu0 %v3216_v54, %s2884_s15 }
  0xdc   : > { %v433_v40 = vpop.permute.xlu1 %432  ;;  %v431_v41 = vpop.permute.xlu0 %430 }
  0xdd   : > { %468 = vst.msk [vmem:[#allocation2 + $0x68] sm:$0xff] %vm454_vm4, %v433_v40  ;;  %467 = vst.msk [vmem:[#allocation2 + $0x60] sm:$0xff] %vm454_vm4, %v431_v41 }
  0xde   : > { %809 = vrot.lane.b32.xlu1 %v3042_v26, %s2890_s29  ;;  %714 = vrot.lane.b32.xlu0 %v2996_v18, %s2889_s28  ;;  %v3386_v18 = vld [vmem:[%s2921_s14 + $0xd9] sm:$0xff] }
  0xe0   : > { %v437_v1 = vpop.permute.xlu1 %436  ;;  %v435_v2 = vpop.permute.xlu0 %434 }
  0xe1   : > { %470 = vst.msk [vmem:[#allocation2 + $0x78] sm:$0xff] %vm454_vm4, %v437_v1  ;;  %469 = vst.msk [vmem:[#allocation2 + $0x70] sm:$0xff] %vm454_vm4, %v435_v2  ;;  %v3515_v2 = vld [vmem:[%s2921_s14 + $0x110] sm:$0xff] }
  0xe2   : > { %1532 = vrot.lane.b32.xlu1 %v3371_v19, %s2886_s17  ;;  %1435 = vrot.lane.b32.xlu0 %v3270_v32, %s2885_s16 }
  0xe4   : > { %v506_v26 = vpop.permute.xlu1 %505  ;;  %v504_v3 = vpop.permute.xlu0 %503 }
  0xe5   : > { %553 = vst.msk [vmem:[#allocation2 + $0x8] sm:$0xff] %vm551_vm5, %v506_v26  ;;  %552 = vst.msk [vmem:[#allocation2] sm:$0xff] %vm551_vm5, %v504_v3  ;;  %v2684_v3 = vld [vmem:[%s2921_s14 + $0x109] sm:$0xff] }
  0xe6   : > { %906 = vrot.lane.b32.xlu1 %v3119_v43, %s2891_s4  ;;  %811 = vrot.lane.b32.xlu0 %v3039_v25, %s2890_s29  ;;  %v3404_v25 = vld [vmem:[%s2921_s14 + $0xda] sm:$0xff] }
  0xe8   : > { %v510_v11 = vpop.permute.xlu1 %509  ;;  %v508_v24 = vpop.permute.xlu0 %507 }
  0xe9   : > { %555 = vst.msk [vmem:[#allocation2 + $0x18] sm:$0xff] %vm551_vm5, %v510_v11  ;;  %554 = vst.msk [vmem:[#allocation2 + $0x10] sm:$0xff] %vm551_vm5, %v508_v24 }
  0xea   : > { %1628 = vrot.lane.b32.xlu1 %v3386_v18, %s2887_s18  ;;  %1534 = vrot.lane.b32.xlu0 %v3389_v8, %s2886_s17 }
  0xec   : > { %v514_v43 = vpop.permute.xlu1 %513  ;;  %v512_v27 = vpop.permute.xlu0 %511 }
  0xed   : > { %557 = vst.msk [vmem:[#allocation2 + $0x28] sm:$0xff] %vm551_vm5, %v514_v43  ;;  %556 = vst.msk [vmem:[#allocation2 + $0x20] sm:$0xff] %vm551_vm5, %v512_v27 }
  0xee   : > { %1341 = vrot.lane.b32.xlu1 %v3386_v18, %s2884_s15  ;;  %908 = vrot.lane.b32.xlu0 %v3116_v42, %s2891_s4  ;;  %v3422_v42 = vld [vmem:[%s2921_s14 + $0xe2] sm:$0xff] }
  0xf0   : > { %v518_v35 = vpop.permute.xlu1 %517  ;;  %v516_v50 = vpop.permute.xlu0 %515 }
  0xf1   : > { %559 = vst.msk [vmem:[#allocation2 + $0x38] sm:$0xff] %vm551_vm5, %v518_v35  ;;  %558 = vst.msk [vmem:[#allocation2 + $0x30] sm:$0xff] %vm551_vm5, %v516_v50 }
  0xf2   : > { %1724 = vrot.lane.b32.xlu1 %v3404_v25, %s2888_s19  ;;  %1630 = vrot.lane.b32.xlu0 %v3407_v34, %s2887_s18 }
  0xf4   : > { %v522_v51 = vpop.permute.xlu1 %521  ;;  %v520_v52 = vpop.permute.xlu0 %519 }
  0xf5   : > { %561 = vst.msk [vmem:[#allocation2 + $0x48] sm:$0xff] %vm551_vm5, %v522_v51  ;;  %560 = vst.msk [vmem:[#allocation2 + $0x40] sm:$0xff] %vm551_vm5, %v520_v52  ;;  %v2700_v52 = vld [vmem:[%s2921_s14 + $0x10a] sm:$0xff] }
  0xf6   : > { %1343 = vrot.lane.b32.xlu1 %v3407_v34, %s2884_s15  ;;  %716 = vrot.lane.b32.xlu0 %v3009_v21, %s2889_s28 }
  0xf8   : > { %v526_v53 = vpop.permute.xlu1 %525  ;;  %v524_v56 = vpop.permute.xlu0 %523 }
  0xf9   : > { %563 = vst.msk [vmem:[#allocation2 + $0x58] sm:$0xff] %vm551_vm5, %v526_v53  ;;  %562 = vst.msk [vmem:[#allocation2 + $0x50] sm:$0xff] %vm551_vm5, %v524_v56 }
  0xfa   : > { %1726 = vrot.lane.b32.xlu1 %v3422_v42, %s2888_s19  ;;  %1437 = vrot.lane.b32.xlu0 %v3404_v25, %s2885_s16 }
  0xfc   : > { %v530_v58 = vpop.permute.xlu1 %529  ;;  %v528_v59 = vpop.permute.xlu0 %527 }
  0xfd   : > { %565 = vst.msk [vmem:[#allocation2 + $0x68] sm:$0xff] %vm551_vm5, %v530_v58  ;;  %564 = vst.msk [vmem:[#allocation2 + $0x60] sm:$0xff] %vm551_vm5, %v528_v59 }
  0xfe   : > { %718 = vrot.lane.b32.xlu1 %v3006_v20, %s2889_s28  ;;  %1823 = vrot.lane.b32.xlu0 %v3431_v57, %s2889_s28 }
 0x100   : > { %v534_v21 = vpop.permute.xlu1 %533  ;;  %v532_v60 = vpop.permute.xlu0 %531 }
 0x101   : > { %567 = vst.msk [vmem:[#allocation2 + $0x78] sm:$0xff] %vm551_vm5, %v534_v21  ;;  %566 = vst.msk [vmem:[#allocation2 + $0x70] sm:$0xff] %vm551_vm5, %v532_v60  ;;  %v2701_v21 = vld [vmem:[%s2921_s14 + $0x112] sm:$0xff] }
 0x102   : > { %1439 = vrot.lane.b32.xlu1 %v3422_v42, %s2885_s16  ;;  %813 = vrot.lane.b32.xlu0 %v3055_v29, %s2890_s29 }
 0x104   : > { %v603_v20 = vpop.permute.xlu1 %602  ;;  %v601_v12 = vpop.permute.xlu0 %600 }
 0x105   : > { %650 = vst.msk [vmem:[#allocation2 + $0x8] sm:$0xff] %vm648_vm6, %v603_v20  ;;  %649 = vst.msk [vmem:[#allocation2] sm:$0xff] %vm648_vm6, %v601_v12 }
 0x106   : > { %1825 = vrot.lane.b32.xlu1 %v3446_v61, %s2889_s28  ;;  %1536 = vrot.lane.b32.xlu0 %v3431_v57, %s2886_s17 }
 0x108   : > { %v607_v62 = vpop.permute.xlu1 %606  ;;  %v605_v5 = vpop.permute.xlu0 %604 }
 0x109   : > { %652 = vst.msk [vmem:[#allocation2 + $0x18] sm:$0xff] %vm648_vm6, %v607_v62  ;;  %651 = vst.msk [vmem:[#allocation2 + $0x10] sm:$0xff] %vm648_vm6, %v605_v5 }
 0x10a   : > { %815 = vrot.lane.b32.xlu1 %v3052_v28, %s2890_s29  ;;  %1919 = vrot.lane.b32.xlu0 %v2682_v13, %s2890_s29  ;;  %v2698_v28 = vld [vmem:[%s2921_s14 + $0xf2] sm:$0xff] }
 0x10c   : > { %v611_v29 = vpop.permute.xlu1 %610  ;;  %v609_v15 = vpop.permute.xlu0 %608 }
 0x10d   : > { %654 = vst.msk [vmem:[#allocation2 + $0x28] sm:$0xff] %vm648_vm6, %v611_v29  ;;  %653 = vst.msk [vmem:[#allocation2 + $0x20] sm:$0xff] %vm648_vm6, %v609_v15 }
 0x10e   : > { %1538 = vrot.lane.b32.xlu1 %v3446_v61, %s2886_s17  ;;  %910 = vrot.lane.b32.xlu0 %v3129_v45, %s2891_s4  ;;  %v2099_v45 = vld [vmem:[%s4025_s1 + $0x20] sm:$0xf] }
 0x10f   : > { %2817 = vmatprep.subr.msk.mxu1 %vm1029_vm3, %v2099_v45 }
 0x110   : > { %v615_v0 = vpop.permute.xlu1 %614  ;;  %v613_v4 = vpop.permute.xlu0 %612  ;;  %2818 = vmatpush3.msk.msra.mxu1 %vm1029_vm3, %v2099_v45 }
 0x111   : > { %656 = vst.msk [vmem:[#allocation2 + $0x38] sm:$0xff] %vm648_vm6, %v615_v0  ;;  %655 = vst.msk [vmem:[#allocation2 + $0x30] sm:$0xff] %vm648_vm6, %v613_v4  ;;  %v3597_v4 = vld [vmem:[%s2921_s14 + $0x128] sm:$0xff] }
 0x112   : > { %1921 = vrot.lane.b32.xlu1 %v2683_v63, %s2890_s29  ;;  %1632 = vrot.lane.b32.xlu0 %v2682_v13, %s2887_s18 }
 0x114   : > { %v619_v37 = vpop.permute.xlu1 %618  ;;  %v617_v14 = vpop.permute.xlu0 %616 }
 0x115   : > { %658 = vst.msk [vmem:[#allocation2 + $0x48] sm:$0xff] %vm648_vm6, %v619_v37  ;;  %657 = vst.msk [vmem:[#allocation2 + $0x40] sm:$0xff] %vm648_vm6, %v617_v14  ;;  %v2686_v14 = vld [vmem:[%s2921_s14 + $0x121] sm:$0xff] }
 0x116   : > { %912 = vrot.lane.b32.xlu1 %v3126_v44, %s2891_s4  ;;  %2015 = vrot.lane.b32.xlu0 %v2698_v28, %s2891_s4  ;;  %v2699_v44 = vld [vmem:[%s2921_s14 + $0xfa] sm:$0xff] }
 0x118   : > { %v623_v36 = vpop.permute.xlu1 %622  ;;  %v621_v6 = vpop.permute.xlu0 %620 }
 0x119   : > { %660 = vst.msk [vmem:[#allocation2 + $0x58] sm:$0xff] %vm648_vm6, %v623_v36  ;;  %659 = vst.msk [vmem:[#allocation2 + $0x50] sm:$0xff] %vm648_vm6, %v621_v6 }
 0x11a   : > { %1634 = vrot.lane.b32.xlu1 %v2683_v63, %s2887_s18  ;;  %1345 = vrot.lane.b32.xlu0 %v2682_v13, %s2884_s15 }
 0x11c   : > { %v627_v7 = vpop.permute.xlu1 %626  ;;  %v625_v38 = vpop.permute.xlu0 %624 }
 0x11d   : > { %662 = vst.msk [vmem:[#allocation2 + $0x68] sm:$0xff] %vm648_vm6, %v627_v7  ;;  %661 = vst.msk [vmem:[#allocation2 + $0x60] sm:$0xff] %vm648_vm6, %v625_v38  ;;  %v2687_v7 = vld [vmem:[%s2921_s14 + $0x129] sm:$0xff] }
 0x11e   : > { %2017 = vrot.lane.b32.xlu1 %v2699_v44, %s2891_s4  ;;  %1728 = vrot.lane.b32.xlu0 %v2698_v28, %s2888_s19 }
 0x120   : > { %v631_v39 = vpop.permute.xlu1 %630  ;;  %v629_v16 = vpop.permute.xlu0 %628 }
 0x121   : > { %664 = vst.msk [vmem:[#allocation2 + $0x78] sm:$0xff] %vm648_vm6, %v631_v39  ;;  %663 = vst.msk [vmem:[#allocation2 + $0x70] sm:$0xff] %vm648_vm6, %v629_v16 }
 0x122   : > { %1347 = vrot.lane.b32.xlu1 %v2683_v63, %s2884_s15  ;;  %720 = vrot.lane.b32.xlu0 %v3021_v23, %s2889_s28 }
 0x124   : > { %v703_v17 = vpop.permute.xlu1 %702  ;;  %v701_v9 = vpop.permute.xlu0 %700 }
 0x125   : > { %750 = vst.msk [vmem:[#allocation2 + $0x8] sm:$0xff] %vm748_vm7, %v703_v17  ;;  %749 = vst.msk [vmem:[#allocation2] sm:$0xff] %vm748_vm7, %v701_v9 }
 0x126   : > { %1730 = vrot.lane.b32.xlu1 %v2699_v44, %s2888_s19  ;;  %1441 = vrot.lane.b32.xlu0 %v2698_v28, %s2885_s16 }
 0x128   : > { %v798_v40 = vpop.permute.xlu1 %797  ;;  %v705_v41 = vpop.permute.xlu0 %704 }
 0x129   : > { %846 = vst.msk [vmem:[#allocation2] sm:$0xff] %vm845_vm8, %v798_v40  ;;  %v2703_v40 = vld [vmem:[%s2921_s14 + $0x12a] sm:$0xff] }
 0x12a   : > { %751 = vst.msk [vmem:[#allocation2 + $0x10] sm:$0xff] %vm748_vm7, %v705_v41  ;;  %722 = vrot.lane.b32.xlu1 %v3018_v22, %s2889_s28  ;;  %1827 = vrot.lane.b32.xlu0 %v3501_v10, %s2889_s28 }
 0x12c   : > { %v895_v23 = vpop.permute.xlu1 %894  ;;  %v800_v1 = vpop.permute.xlu0 %799 }
 0x12d   : > { %943 = vst.msk [vmem:[#allocation2] sm:$0xff] %vm942_vm9, %v895_v23 }
 0x12e   : > { %847 = vst.msk [vmem:[#allocation2 + $0x8] sm:$0xff] %vm845_vm8, %v800_v1  ;;  %1443 = vrot.lane.b32.xlu1 %v2699_v44, %s2885_s16  ;;  %817 = vrot.lane.b32.xlu0 %v3065_v31, %s2890_s29 }
 0x130   : > { %v707_v26 = vpop.permute.xlu1 %706  ;;  %v897_v22 = vpop.permute.xlu0 %896 }
 0x131   : > { %752 = vst.msk [vmem:[#allocation2 + $0x18] sm:$0xff] %vm748_vm7, %v707_v26 }
 0x132   : > { %944 = vst.msk [vmem:[#allocation2 + $0x8] sm:$0xff] %vm942_vm9, %v897_v22  ;;  %1829 = vrot.lane.b32.xlu1 %v3515_v2, %s2889_s28  ;;  %1540 = vrot.lane.b32.xlu0 %v3501_v10, %s2886_s17  ;;  %v3653_v22 = vld [vmem:[%s2921_s14 + $0x138] sm:$0xff] }
 0x134   : > { %v804_v11 = vpop.permute.xlu1 %803  ;;  %v802_v24 = vpop.permute.xlu0 %801  ;;  %v959_v43 = vld [vmem:[#allocation2] sm:$0xff] }
 0x135   : > { %849 = vst.msk [vmem:[#allocation2 + $0x18] sm:$0xff] %vm845_vm8, %v804_v11  ;;  %848 = vst.msk [vmem:[#allocation2 + $0x10] sm:$0xff] %vm845_vm8, %v802_v24  ;;  %2785 = vmatprep.mubr.msk.f32.mxu0 %vm980_vm10, %v959_v43  ;;  %v3667_v43 = vld [vmem:[%s2921_s14 + $0x140] sm:$0xff] }
 0x136   : > { %1289 = vst.msk [vmem:[#allocation2] sm:$0xff] %vm160_vm0, %v3177_v49  ;;  %819 = vrot.lane.b32.xlu1 %v3062_v30, %s2890_s29  ;;  %1923 = vrot.lane.b32.xlu0 %v2684_v3, %s2890_s29  ;;  %v2685_v30 = vld [vmem:[%s2921_s14 + $0x111] sm:$0xff] }
 0x138   : > { %v901_v31 = vpop.permute.xlu1 %900  ;;  %v899_v27 = vpop.permute.xlu0 %898 }
 0x139   : > { %v960_v35 = vld [vmem:[#allocation2 + $0x8] sm:$0xff]  ;;  %946 = vst.msk [vmem:[#allocation2 + $0x18] sm:$0xff] %vm942_vm9, %v901_v31  ;;  %945 = vst.msk [vmem:[#allocation2 + $0x10] sm:$0xff] %vm942_vm9, %v899_v27 }
 0x13a   : > { %2786 = vmatmul.mubr.msk.f32.vlgmr.msra.gmra.mrb[0].mxu0 %vm980_vm10, %v960_v35  ;;  %1290 = vst.msk [vmem:[#allocation2 + $0x8] sm:$0xff] %vm160_vm0, %v3174_v48  ;;  %1542 = vrot.lane.b32.xlu1 %v3515_v2, %s2886_s17 }
 0x13b   : > { %914 = vrot.lane.b32.xlu0 %v3139_v47, %s2891_s4 }
 0x13c   : > { %v711_v50 = vpop.permute.xlu1 %710  ;;  %v709_v51 = vpop.permute.xlu0 %708 }
 0x13d   : > { %754 = vst.msk [vmem:[#allocation2 + $0x28] sm:$0xff] %vm748_vm7, %v711_v50  ;;  %753 = vst.msk [vmem:[#allocation2 + $0x20] sm:$0xff] %vm748_vm7, %v709_v51 }
 0x13e   : > { %1925 = vrot.lane.b32.xlu1 %v2685_v30, %s2890_s29 }
 0x13f   : > { %1636 = vrot.lane.b32.xlu0 %v2684_v3, %s2887_s18 }
 0x140   : > { %v808_v53 = vpop.permute.xlu1 %807  ;;  %v806_v48 = vpop.permute.xlu0 %805  ;;  %v961_v56 = vld [vmem:[#allocation2 + $0x10] sm:$0xff]  ;;  %v962_v58 = vld [vmem:[#allocation2 + $0x18] sm:$0xff] }
 0x141   : > { %851 = vst.msk [vmem:[#allocation2 + $0x28] sm:$0xff] %vm845_vm8, %v808_v53  ;;  %850 = vst.msk [vmem:[#allocation2 + $0x20] sm:$0xff] %vm845_vm8, %v806_v48  ;;  %2788 = vmatprep.mubr.msk.f32.mxu0 %vm980_vm10, %v961_v56 }
 0x142   : > { %1291 = vst.msk [vmem:[#allocation2 + $0x10] sm:$0xff] %vm160_vm0, %v3371_v19  ;;  %1292 = vst.msk [vmem:[#allocation2 + $0x18] sm:$0xff] %vm160_vm0, %v3389_v8  ;;  %916 = vrot.lane.b32.xlu1 %v3136_v46, %s2891_s4  ;;  %2789 = vmatmul.mubr.msk.f32.gmra.mrb[2].mxu0 %vm980_vm10, %v962_v58  ;;  %v2704_v58 = vld [vmem:[%s2921_s14 + $0x13a] sm:$0xff] }
 0x143   : > { %2019 = vrot.lane.b32.xlu0 %v2700_v52, %s2891_s4 }
 0x144   : > { %v905_v47 = vpop.permute.xlu1 %904  ;;  %v903_v59 = vpop.permute.xlu0 %902 }
 0x145   : > { %948 = vst.msk [vmem:[#allocation2 + $0x28] sm:$0xff] %vm942_vm9, %v905_v47  ;;  %947 = vst.msk [vmem:[#allocation2 + $0x20] sm:$0xff] %vm942_vm9, %v903_v59 }
 0x146   : > { %1638 = vrot.lane.b32.xlu1 %v2685_v30, %s2887_s18 }
 0x147   : > { %1349 = vrot.lane.b32.xlu0 %v2684_v3, %s2884_s15 }
 0x148   : > { %v713_v60 = vpop.permute.xlu1 %712  ;;  %v1338_v20 = vpop.permute.xlu0 %1337 }
 0x149   : > { %755 = vst.msk [vmem:[#allocation2 + $0x30] sm:$0xff] %vm748_vm7, %v713_v60 }
 0x14a   : > { %1385 = vst.msk [vmem:[#allocation2] sm:$0xff] %vm257_vm1, %v1338_v20  ;;  %2021 = vrot.lane.b32.xlu1 %v2701_v21, %s2891_s4  ;;  %v2705_v20 = vld [vmem:[%s2921_s14 + $0x142] sm:$0xff] }
 0x14b   : > { %1732 = vrot.lane.b32.xlu0 %v2700_v52, %s2888_s19 }
 0x14c   : > { %v1434_v46 = vpop.permute.xlu1 %1433  ;;  %v1340_v12 = vpop.permute.xlu0 %1339  ;;  %v963_v13 = vld [vmem:[#allocation2 + $0x20] sm:$0xff]  ;;  %v964_v62 = vld [vmem:[#allocation2 + $0x28] sm:$0xff] }
 0x14d   : > { %1481 = vst.msk [vmem:[#allocation2] sm:$0xff] %vm354_vm2, %v1434_v46  ;;  %2791 = vmatprep.mubr.msk.f32.mxu0 %vm980_vm10, %v963_v13 }
 0x14e   : > { %1386 = vst.msk [vmem:[#allocation2 + $0x8] sm:$0xff] %vm257_vm1, %v1340_v12  ;;  %1351 = vrot.lane.b32.xlu1 %v2685_v30, %s2884_s15  ;;  %2792 = vmatmul.mubr.msk.f32.gmra.mrb[4].mxu0 %vm980_vm10, %v964_v62  ;;  %v3720_v62 = vld [vmem:[%s2921_s14 + $0x150] sm:$0xff] }
 0x14f   : > { %1293 = vst.msk [vmem:[#allocation2 + $0x20] sm:$0xff] %vm160_vm0, %v3431_v57  ;;  %1294 = vst.msk [vmem:[#allocation2 + $0x28] sm:$0xff] %vm160_vm0, %v3446_v61  ;;  %724 = vrot.lane.b32.xlu0 %v3177_v49, %s2889_s28  ;;  %v2518_v57 = vld [vmem:[%s2921_s14 + $0xc8] sm:$0xff]  ;;  %v3584_v61 = vld [vmem:[%s2921_s14 + $0x120] sm:$0xff] }
 0x150   : > { %v810_v5 = vpop.permute.xlu1 %809  ;;  %v715_v29 = vpop.permute.xlu0 %714 }
 0x151   : > { %852 = vst.msk [vmem:[#allocation2 + $0x30] sm:$0xff] %vm845_vm8, %v810_v5 }
 0x152   : > { %756 = vst.msk [vmem:[#allocation2 + $0x38] sm:$0xff] %vm748_vm7, %v715_v29  ;;  %1734 = vrot.lane.b32.xlu1 %v2701_v21, %s2888_s19 }
 0x153   : > { %1445 = vrot.lane.b32.xlu0 %v2700_v52, %s2885_s16 }
 0x154   : > { %v1533_v15 = vpop.permute.xlu1 %1532  ;;  %v1436_v63 = vpop.permute.xlu0 %1435 }
 0x155   : > { %1580 = vst.msk [vmem:[#allocation2] sm:$0xff] %vm454_vm4, %v1533_v15  ;;  %v2690_v15 = vld [vmem:[%s2921_s14 + $0x151] sm:$0xff] }
 0x156   : > { %1482 = vst.msk [vmem:[#allocation2 + $0x8] sm:$0xff] %vm354_vm2, %v1436_v63  ;;  %726 = vrot.lane.b32.xlu1 %v2518_v57, %s2889_s28  ;;  %v3734_v63 = vld [vmem:[%s2921_s14 + $0x158] sm:$0xff] }
 0x157   : > { %1831 = vrot.lane.b32.xlu0 %v3584_v61, %s2889_s28 }
 0x158   : > { %v907_v49 = vpop.permute.xlu1 %906  ;;  %v812_v0 = vpop.permute.xlu0 %811 }
 0x159   : > { %949 = vst.msk [vmem:[#allocation2 + $0x30] sm:$0xff] %vm942_vm9, %v907_v49 }
 0x15a   : > { %853 = vst.msk [vmem:[#allocation2 + $0x38] sm:$0xff] %vm845_vm8, %v812_v0  ;;  %1447 = vrot.lane.b32.xlu1 %v2701_v21, %s2885_s16 }
 0x15b   : > { %821 = vrot.lane.b32.xlu0 %v3219_v55, %s2890_s29 }
 0x15c   : > { %v1629_v28 = vpop.permute.xlu1 %1628  ;;  %v1535_v37 = vpop.permute.xlu0 %1534 }
 0x15d   : > { %1676 = vst.msk [vmem:[#allocation2] sm:$0xff] %vm551_vm5, %v1629_v28 }
 0x15e   : > { %1581 = vst.msk [vmem:[#allocation2 + $0x8] sm:$0xff] %vm454_vm4, %v1535_v37  ;;  %1833 = vrot.lane.b32.xlu1 %v3597_v4, %s2889_s28 }
 0x15f   : > { %1544 = vrot.lane.b32.xlu0 %v3584_v61, %s2886_s17 }
 0x160   : > { %v1342_v45 = vpop.permute.xlu1 %1341  ;;  %v909_v36 = vpop.permute.xlu0 %908  ;;  %v965_v6 = vld [vmem:[#allocation2 + $0x30] sm:$0xff] }
 0x161   : > { %1387 = vst.msk [vmem:[#allocation2 + $0x10] sm:$0xff] %vm257_vm1, %v1342_v45  ;;  %2794 = vmatprep.mubr.msk.f32.mxu0 %vm980_vm10, %v965_v6  ;;  %v2691_v45 = vld [vmem:[%s2921_s14 + $0x159] sm:$0xff] }
 0x162   : > { %950 = vst.msk [vmem:[#allocation2 + $0x38] sm:$0xff] %vm942_vm9, %v909_v36  ;;  %823 = vrot.lane.b32.xlu1 %v3216_v54, %s2890_s29  ;;  %v2702_v54 = vld [vmem:[%s2921_s14 + $0x122] sm:$0xff] }
 0x163   : > { %1295 = vst.msk [vmem:[#allocation2 + $0x30] sm:$0xff] %vm160_vm0, %v3501_v10  ;;  %1927 = vrot.lane.b32.xlu0 %v2686_v14, %s2890_s29 }
 0x164   : > { %v1725_v55 = vpop.permute.xlu1 %1724  ;;  %v1631_v44 = vpop.permute.xlu0 %1630 }
 0x165   : > { %1772 = vst.msk [vmem:[#allocation2] sm:$0xff] %vm648_vm6, %v1725_v55 }
 0x166   : > { %1677 = vst.msk [vmem:[#allocation2 + $0x8] sm:$0xff] %vm551_vm5, %v1631_v44  ;;  %1546 = vrot.lane.b32.xlu1 %v3597_v4, %s2886_s17 }
 0x167   : > { %918 = vrot.lane.b32.xlu0 %v3273_v33, %s2891_s4 }
 0x168   : > { %v1344_v38 = vpop.permute.xlu1 %1343  ;;  %v717_v39 = vpop.permute.xlu0 %716 }
 0x169   : > { %v966_v16 = vld [vmem:[#allocation2 + $0x38] sm:$0xff]  ;;  %1388 = vst.msk [vmem:[#allocation2 + $0x18] sm:$0xff] %vm257_vm1, %v1344_v38 }
 0x16a   : > { %757 = vst.msk [vmem:[#allocation2 + $0x40] sm:$0xff] %vm748_vm7, %v717_v39  ;;  %2795 = vmatmul.mubr.msk.f32.gmra.mrb[6].mxu0 %vm980_vm10, %v966_v16  ;;  %1929 = vrot.lane.b32.xlu1 %v2687_v7, %s2890_s29  ;;  %v2707_v39 = vld [vmem:[%s2921_s14 + $0x15a] sm:$0xff] }
 0x16b   : > { %1296 = vst.msk [vmem:[#allocation2 + $0x38] sm:$0xff] %vm160_vm0, %v3515_v2  ;;  %1640 = vrot.lane.b32.xlu0 %v2686_v14, %s2887_s18 }
 0x16c   : > { %v1727_v33 = vpop.permute.xlu1 %1726  ;;  %v1438_v17 = vpop.permute.xlu0 %1437 }
 0x16d   : > { %1773 = vst.msk [vmem:[#allocation2 + $0x8] sm:$0xff] %vm648_vm6, %v1727_v33 }
 0x16e   : > { %1483 = vst.msk [vmem:[#allocation2 + $0x10] sm:$0xff] %vm354_vm2, %v1438_v17  ;;  %920 = vrot.lane.b32.xlu1 %v3270_v32, %s2891_s4 }
 0x16f   : > { %2023 = vrot.lane.b32.xlu0 %v2702_v54, %s2891_s4 }
 0x170   : > { %v719_v9 = vpop.permute.xlu1 %718  ;;  %v1824_v10 = vpop.permute.xlu0 %1823 }
 0x171   : > { %758 = vst.msk [vmem:[#allocation2 + $0x48] sm:$0xff] %vm748_vm7, %v719_v9  ;;  %1871 = vst.msk [vmem:[#allocation2] sm:$0xff] %vm748_vm7, %v1824_v10  ;;  %v3774_v10 = vld [vmem:[%s2921_s14 + $0x168] sm:$0xff] }
 0x172   : > { %1642 = vrot.lane.b32.xlu1 %v2687_v7, %s2887_s18 }
 0x173   : > { %1353 = vrot.lane.b32.xlu0 %v2686_v14, %s2884_s15  ;;  %v2706_v14 = vld [vmem:[%s2921_s14 + $0x152] sm:$0xff] }
 0x174   : > { %v1440_v41 = vpop.permute.xlu1 %1439  ;;  %v814_v23 = vpop.permute.xlu0 %813 }
 0x175   : > { %1484 = vst.msk [vmem:[#allocation2 + $0x18] sm:$0xff] %vm354_vm2, %v1440_v41 }
 0x176   : > { %854 = vst.msk [vmem:[#allocation2 + $0x40] sm:$0xff] %vm845_vm8, %v814_v23  ;;  %2025 = vrot.lane.b32.xlu1 %v2703_v40, %s2891_s4 }
 0x177   : > { %1736 = vrot.lane.b32.xlu0 %v2702_v54, %s2888_s19 }
 0x178   : > { %v1826_v32 = vpop.permute.xlu1 %1825  ;;  %v1537_v1 = vpop.permute.xlu0 %1536 }
 0x179   : > { %1872 = vst.msk [vmem:[#allocation2 + $0x8] sm:$0xff] %vm748_vm7, %v1826_v32 }
 0x17a   : > { %1582 = vst.msk [vmem:[#allocation2 + $0x10] sm:$0xff] %vm454_vm4, %v1537_v1  ;;  %1355 = vrot.lane.b32.xlu1 %v2687_v7, %s2884_s15  ;;  %v2692_v1 = vld [vmem:[%s2921_s14 + $0x169] sm:$0xff] }
 0x17b   : > { %728 = vrot.lane.b32.xlu0 %v3371_v19, %s2889_s28 }
 0x17c   : > { %v816_v2 = vpop.permute.xlu1 %815  ;;  %v1920_v26 = vpop.permute.xlu0 %1919 }
 0x17d   : > { %855 = vst.msk [vmem:[#allocation2 + $0x48] sm:$0xff] %vm845_vm8, %v816_v2  ;;  %1967 = vst.msk [vmem:[#allocation2] sm:$0xff] %vm845_vm8, %v1920_v26  ;;  %v3788_v2 = vld [vmem:[%s2921_s14 + $0x170] sm:$0xff] }
 0x17e   : > { %1738 = vrot.lane.b32.xlu1 %v2703_v40, %s2888_s19 }
 0x17f   : > { %1449 = vrot.lane.b32.xlu0 %v2702_v54, %s2885_s16 }
 0x180   : > { %v1539_v3 = vpop.permute.xlu1 %1538  ;;  %v911_v11 = vpop.permute.xlu0 %910 }
 0x181   : > { %1583 = vst.msk [vmem:[#allocation2 + $0x18] sm:$0xff] %vm454_vm4, %v1539_v3 }
 0x182   : > { %951 = vst.msk [vmem:[#allocation2 + $0x40] sm:$0xff] %vm942_vm9, %v911_v11  ;;  %730 = vrot.lane.b32.xlu1 %v3389_v8, %s2889_s28 }
 0x183   : > { %1835 = vrot.lane.b32.xlu0 %v3653_v22, %s2889_s28 }
 0x184   : > { %v1922_v19 = vpop.permute.xlu1 %1921  ;;  %v1633_v24 = vpop.permute.xlu0 %1632 }
 0x185   : > { %1968 = vst.msk [vmem:[#allocation2 + $0x8] sm:$0xff] %vm845_vm8, %v1922_v19  ;;  %v2708_v19 = vld [vmem:[%s2921_s14 + $0x16a] sm:$0xff] }
 0x186   : > { %1678 = vst.msk [vmem:[#allocation2 + $0x10] sm:$0xff] %vm551_vm5, %v1633_v24  ;;  %1451 = vrot.lane.b32.xlu1 %v2703_v40, %s2885_s16  ;;  %v2693_v24 = vld [vmem:[%s2921_s14 + $0x171] sm:$0xff] }
 0x187   : > { %825 = vrot.lane.b32.xlu0 %v3386_v18, %s2890_s29  ;;  %v2688_v18 = vld [vmem:[%s2921_s14 + $0x139] sm:$0xff] }
 0x188   : > { %v913_v31 = vpop.permute.xlu1 %912  ;;  %v2016_v27 = vpop.permute.xlu0 %2015 }
 0x189   : > { %v967_v8 = vld [vmem:[#allocation2 + $0x40] sm:$0xff]  ;;  %952 = vst.msk [vmem:[#allocation2 + $0x48] sm:$0xff] %vm942_vm9, %v913_v31  ;;  %2063 = vst.msk [vmem:[#allocation2] sm:$0xff] %vm942_vm9, %v2016_v27 }
 0x18a   : > { %2797 = vmatprep.mubr.msk.f32.mxu0 %vm980_vm10, %v967_v8  ;;  %1297 = vst.msk [vmem:[#allocation2 + $0x40] sm:$0xff] %vm160_vm0, %v3584_v61  ;;  %1837 = vrot.lane.b32.xlu1 %v3667_v43, %s2889_s28 }
 0x18b   : > { %1548 = vrot.lane.b32.xlu0 %v3653_v22, %s2886_s17 }
 0x18c   : > { %v1635_v35 = vpop.permute.xlu1 %1634  ;;  %v1346_v30 = vpop.permute.xlu0 %1345 }
 0x18d   : > { %1679 = vst.msk [vmem:[#allocation2 + $0x18] sm:$0xff] %vm551_vm5, %v1635_v35 }
 0x18e   : > { %1389 = vst.msk [vmem:[#allocation2 + $0x20] sm:$0xff] %vm257_vm1, %v1346_v30  ;;  %827 = vrot.lane.b32.xlu1 %v3407_v34, %s2890_s29  ;;  %v2689_v34 = vld [vmem:[%s2921_s14 + $0x141] sm:$0xff] }
 0x18f   : > { %1931 = vrot.lane.b32.xlu0 %v2688_v18, %s2890_s29 }
 0x190   : > { %v2018_v50 = vpop.permute.xlu1 %2017  ;;  %v1729_v51 = vpop.permute.xlu0 %1728  ;;  %v968_v52 = vld [vmem:[#allocation2 + $0x48] sm:$0xff]  ;;  %v2079_v53 = vld [vmem:[#allocation2] sm:$0xff] }
 0x191   : > { %2064 = vst.msk [vmem:[#allocation2 + $0x8] sm:$0xff] %vm942_vm9, %v2018_v50  ;;  %2798 = vmatmul.mubr.msk.f32.gmra.mrb[8].mxu0 %vm980_vm10, %v968_v52  ;;  %2819 = vmatprep.mubr.msk.f32.mxu1 %vm980_vm10, %v2079_v53  ;;  %v2678_v53 = vld [vmem:[%s2921_s14 + $0x180] sm:$0xff] }
 0x192   : > { %1774 = vst.msk [vmem:[#allocation2 + $0x10] sm:$0xff] %vm648_vm6, %v1729_v51  ;;  %1550 = vrot.lane.b32.xlu1 %v3667_v43, %s2886_s17 }
 0x193   : > { %1298 = vst.msk [vmem:[#allocation2 + $0x48] sm:$0xff] %vm160_vm0, %v3597_v4  ;;  %922 = vrot.lane.b32.xlu0 %v3404_v25, %s2891_s4 }
 0x194   : > { %v1348_v48 = vpop.permute.xlu1 %1347  ;;  %v721_v56 = vpop.permute.xlu0 %720 }
 0x195   : > { %1390 = vst.msk [vmem:[#allocation2 + $0x28] sm:$0xff] %vm257_vm1, %v1348_v48 }
 0x196   : > { %759 = vst.msk [vmem:[#allocation2 + $0x50] sm:$0xff] %vm748_vm7, %v721_v56  ;;  %1933 = vrot.lane.b32.xlu1 %v2689_v34, %s2890_s29 }
 0x197   : > { %1644 = vrot.lane.b32.xlu0 %v2688_v18, %s2887_s18 }
 0x198   : > { %v1731_v47 = vpop.permute.xlu1 %1730  ;;  %v1442_v59 = vpop.permute.xlu0 %1441  ;;  %v2080_v21 = vld [vmem:[#allocation2 + $0x8] sm:$0xff] }
 0x199   : > { %1775 = vst.msk [vmem:[#allocation2 + $0x18] sm:$0xff] %vm648_vm6, %v1731_v47  ;;  %2820 = vmatmul.mubr.msk.f32.vlgmr.msra.gmra.mrb[0].mxu1 %vm980_vm10, %v2080_v21  ;;  %v2679_v21 = vld [vmem:[%s2921_s14 + $0x188] sm:$0xff] }
 0x19a   : > { %1485 = vst.msk [vmem:[#allocation2 + $0x20] sm:$0xff] %vm354_vm2, %v1442_v59  ;;  %924 = vrot.lane.b32.xlu1 %v3422_v42, %s2891_s4 }
 0x19b   : > { %2027 = vrot.lane.b32.xlu0 %v2704_v58, %s2891_s4 }
 0x19c   : > { %v723_v25 = vpop.permute.xlu1 %722  ;;  %v1828_v60 = vpop.permute.xlu0 %1827 }
 0x19d   : > { %760 = vst.msk [vmem:[#allocation2 + $0x58] sm:$0xff] %vm748_vm7, %v723_v25  ;;  %1873 = vst.msk [vmem:[#allocation2 + $0x10] sm:$0xff] %vm748_vm7, %v1828_v60  ;;  %v2694_v25 = vld [vmem:[%s2921_s14 + $0x181] sm:$0xff] }
 0x19e   : > { %1646 = vrot.lane.b32.xlu1 %v2689_v34, %s2887_s18 }
 0x19f   : > { %1357 = vrot.lane.b32.xlu0 %v2688_v18, %s2884_s15  ;;  %v2709_v18 = vld [vmem:[%s2921_s14 + $0x172] sm:$0xff] }
 0x1a0   : > { %v1444_v46 = vpop.permute.xlu1 %1443  ;;  %v818_v12 = vpop.permute.xlu0 %817 }
 0x1a1   : > { %1486 = vst.msk [vmem:[#allocation2 + $0x28] sm:$0xff] %vm354_vm2, %v1444_v46 }
 0x1a2   : > { %856 = vst.msk [vmem:[#allocation2 + $0x50] sm:$0xff] %vm845_vm8, %v818_v12  ;;  %2029 = vrot.lane.b32.xlu1 %v2705_v20, %s2891_s4 }
 0x1a3   : > { %1740 = vrot.lane.b32.xlu0 %v2704_v58, %s2888_s19 }
 0x1a4   : > { %v1830_v42 = vpop.permute.xlu1 %1829  ;;  %v1541_v13 = vpop.permute.xlu0 %1540 }
 0x1a5   : > { %1874 = vst.msk [vmem:[#allocation2 + $0x18] sm:$0xff] %vm748_vm7, %v1830_v42 }
 0x1a6   : > { %1584 = vst.msk [vmem:[#allocation2 + $0x20] sm:$0xff] %vm454_vm4, %v1541_v13  ;;  %1453 = vrot.lane.b32.xlu1 %v2704_v58, %s2885_s16  ;;  %v2695_v13 = vld [vmem:[%s2921_s14 + $0x189] sm:$0xff] }
 0x1a7   : > { %1359 = vrot.lane.b32.xlu0 %v2689_v34, %s2884_s15 }
 0x1a8   : > { %v820_v5 = vpop.permute.xlu1 %819  ;;  %v1924_v29 = vpop.permute.xlu0 %1923 }
 0x1a9   : > { %857 = vst.msk [vmem:[#allocation2 + $0x58] sm:$0xff] %vm845_vm8, %v820_v5  ;;  %1969 = vst.msk [vmem:[#allocation2 + $0x10] sm:$0xff] %vm845_vm8, %v1924_v29 }
 0x1aa   : > { %1839 = vrot.lane.b32.xlu1 %v3720_v62, %s2889_s28 }
 0x1ab   : > { %1742 = vrot.lane.b32.xlu0 %v2705_v20, %s2888_s19 }
 0x1ac   : > { %v1543_v57 = vpop.permute.xlu1 %1542 }
 0x1ad   : > { %v915_v61 = vpop.permute.xlu0 %914  ;;  %1585 = vst.msk [vmem:[#allocation2 + $0x28] sm:$0xff] %vm454_vm4, %v1543_v57 }
 0x1ae   : > { %953 = vst.msk [vmem:[#allocation2 + $0x50] sm:$0xff] %vm942_vm9, %v915_v61  ;;  %1552 = vrot.lane.b32.xlu1 %v3720_v62, %s2886_s17 }
 0x1af   : > { %1455 = vrot.lane.b32.xlu0 %v2705_v20, %s2885_s16 }
 0x1b0   : > { %v1926_v49 = vpop.permute.xlu1 %1925 }
 0x1b1   : > { %v1637_v0 = vpop.permute.xlu0 %1636  ;;  %1970 = vst.msk [vmem:[#allocation2 + $0x18] sm:$0xff] %vm845_vm8, %v1926_v49 }
 0x1b2   : > { %1680 = vst.msk [vmem:[#allocation2 + $0x20] sm:$0xff] %vm551_vm5, %v1637_v0  ;;  %1935 = vrot.lane.b32.xlu1 %v2690_v15, %s2890_s29  ;;  %v2680_v0 = vld [vmem:[%s2921_s14 + $0x198] sm:$0xff] }
 0x1b3   : > { %1841 = vrot.lane.b32.xlu0 %v3734_v63, %s2889_s28 }
 0x1b4   : > { %v917_v4 = vpop.permute.xlu1 %916 }
 0x1b5   : > { %v2020_v28 = vpop.permute.xlu0 %2019  ;;  %v969_v37 = vld [vmem:[#allocation2 + $0x50] sm:$0xff]  ;;  %954 = vst.msk [vmem:[#allocation2 + $0x58] sm:$0xff] %vm942_vm9, %v917_v4  ;;  %v2681_v4 = vld [vmem:[%s2921_s14 + $0x1a0] sm:$0xff] }
 0x1b6   : > { %2065 = vst.msk [vmem:[#allocation2 + $0x10] sm:$0xff] %vm942_vm9, %v2020_v28  ;;  %2800 = vmatprep.mubr.msk.f32.mxu0 %vm980_vm10, %v969_v37  ;;  %1648 = vrot.lane.b32.xlu1 %v2690_v15, %s2887_s18 }
 0x1b7   : > { %1299 = vst.msk [vmem:[#allocation2 + $0x50] sm:$0xff] %vm160_vm0, %v3653_v22  ;;  %1554 = vrot.lane.b32.xlu0 %v3734_v63, %s2886_s17 }
 0x1b8   : > { %v1639_v36 = vpop.permute.xlu1 %1638 }
 0x1b9   : > { %v1350_v6 = vpop.permute.xlu0 %1349  ;;  %1681 = vst.msk [vmem:[#allocation2 + $0x28] sm:$0xff] %vm551_vm5, %v1639_v36 }
 0x1ba   : > { %1391 = vst.msk [vmem:[#allocation2 + $0x30] sm:$0xff] %vm257_vm1, %v1350_v6  ;;  %2031 = vrot.lane.b32.xlu1 %v2706_v14, %s2891_s4 }
 0x1bb   : > { %1937 = vrot.lane.b32.xlu0 %v2691_v45, %s2890_s29 }
 0x1bc   : > { %v2022_v55 = vpop.permute.xlu1 %2021  ;;  %v970_v7 = vld [vmem:[#allocation2 + $0x58] sm:$0xff] }
 0x1bd   : > { %v1733_v44 = vpop.permute.xlu0 %1732  ;;  %v2081_v38 = vld [vmem:[#allocation2 + $0x10] sm:$0xff]  ;;  %2066 = vst.msk [vmem:[#allocation2 + $0x18] sm:$0xff] %vm942_vm9, %v2022_v55  ;;  %2801 = vmatmul.mubr.msk.f32.gmra.mrb[10].mxu0 %vm980_vm10, %v970_v7  ;;  %v2712_v55 = vld [vmem:[%s2921_s14 + $0x19a] sm:$0xff] }
 0x1be   : > { %1776 = vst.msk [vmem:[#allocation2 + $0x20] sm:$0xff] %vm648_vm6, %v1733_v44  ;;  %2822 = vmatprep.mubr.msk.f32.mxu1 %vm980_vm10, %v2081_v38  ;;  %1650 = vrot.lane.b32.xlu1 %v2691_v45, %s2887_s18  ;;  %v2713_v44 = vld [vmem:[%s2921_s14 + $0x1a2] sm:$0xff] }
 0x1bf   : > { %1300 = vst.msk [vmem:[#allocation2 + $0x58] sm:$0xff] %vm160_vm0, %v3667_v43  ;;  %1361 = vrot.lane.b32.xlu0 %v2690_v15, %s2884_s15  ;;  %v2711_v15 = vld [vmem:[%s2921_s14 + $0x18a] sm:$0xff] }
 0x1c0   : > { %v1352_v16 = vpop.permute.xlu1 %1351 }
 0x1c1   : > { %v725_v54 = vpop.permute.xlu0 %724  ;;  %1392 = vst.msk [vmem:[#allocation2 + $0x38] sm:$0xff] %vm257_vm1, %v1352_v16 }
 0x1c2   : > { %761 = vst.msk [vmem:[#allocation2 + $0x60] sm:$0xff] %vm748_vm7, %v725_v54  ;;  %2033 = vrot.lane.b32.xlu1 %v2707_v39, %s2891_s4 }
 0x1c3   : > { %1744 = vrot.lane.b32.xlu0 %v2706_v14, %s2888_s19 }
 0x1c4   : > { %v1735_v33 = vpop.permute.xlu1 %1734  ;;  %v2082_v9 = vld [vmem:[#allocation2 + $0x18] sm:$0xff] }
 0x1c5   : > { %v1446_v17 = vpop.permute.xlu0 %1445  ;;  %1777 = vst.msk [vmem:[#allocation2 + $0x28] sm:$0xff] %vm648_vm6, %v1735_v33  ;;  %2823 = vmatmul.mubr.msk.f32.gmra.mrb[2].mxu1 %vm980_vm10, %v2082_v9 }
 0x1c6   : > { %1487 = vst.msk [vmem:[#allocation2 + $0x30] sm:$0xff] %vm354_vm2, %v1446_v17  ;;  %1457 = vrot.lane.b32.xlu1 %v2706_v14, %s2885_s16  ;;  %v2696_v14 = vld [vmem:[%s2921_s14 + $0x199] sm:$0xff] }
 0x1c7   : > { %1363 = vrot.lane.b32.xlu0 %v2691_v45, %s2884_s15  ;;  %v2697_v45 = vld [vmem:[%s2921_s14 + $0x1a1] sm:$0xff] }
 0x1c8   : > { %v727_v40 = vpop.permute.xlu1 %726 }
 0x1c9   : > { %v1832_v41 = vpop.permute.xlu0 %1831  ;;  %762 = vst.msk [vmem:[#allocation2 + $0x68] sm:$0xff] %vm748_vm7, %v727_v40 }
 0x1ca   : > { %1875 = vst.msk [vmem:[#allocation2 + $0x20] sm:$0xff] %vm748_vm7, %v1832_v41  ;;  %1843 = vrot.lane.b32.xlu1 %v3774_v10, %s2889_s28 }
 0x1cb   : > { %1746 = vrot.lane.b32.xlu0 %v2707_v39, %s2888_s19 }
 0x1cc   : > { %v1448_v23 = vpop.permute.xlu1 %1447 }
 0x1cd   : > { %v822_v32 = vpop.permute.xlu0 %821  ;;  %1488 = vst.msk [vmem:[#allocation2 + $0x38] sm:$0xff] %vm354_vm2, %v1448_v23 }
 0x1ce   : > { %858 = vst.msk [vmem:[#allocation2 + $0x60] sm:$0xff] %vm845_vm8, %v822_v32  ;;  %1556 = vrot.lane.b32.xlu1 %v3774_v10, %s2886_s17 }
 0x1cf   : > { %1459 = vrot.lane.b32.xlu0 %v2707_v39, %s2885_s16 }
 0x1d0   : > { %v1834_v26 = vpop.permute.xlu1 %1833 }
 0x1d1   : > { %v1545_v22 = vpop.permute.xlu0 %1544  ;;  %1876 = vst.msk [vmem:[#allocation2 + $0x28] sm:$0xff] %vm748_vm7, %v1834_v26 }
 0x1d2   : > { %1586 = vst.msk [vmem:[#allocation2 + $0x30] sm:$0xff] %vm454_vm4, %v1545_v22  ;;  %1939 = vrot.lane.b32.xlu1 %v2692_v1, %s2890_s29 }
 0x1d3   : > { %1845 = vrot.lane.b32.xlu0 %v3788_v2, %s2889_s28 }
 0x1d4   : > { %v824_v3 = vpop.permute.xlu1 %823 }
 0x1d5   : > { %v1928_v11 = vpop.permute.xlu0 %1927  ;;  %859 = vst.msk [vmem:[#allocation2 + $0x68] sm:$0xff] %vm845_vm8, %v824_v3 }
 0x1d6   : > { %1971 = vst.msk [vmem:[#allocation2 + $0x20] sm:$0xff] %vm845_vm8, %v1928_v11  ;;  %1652 = vrot.lane.b32.xlu1 %v2692_v1, %s2887_s18 }
 0x1d7   : > { %1558 = vrot.lane.b32.xlu0 %v3788_v2, %s2886_s17 }
 0x1d8   : > { %v1547_v43 = vpop.permute.xlu1 %1546 }
 0x1d9   : > { %v919_v31 = vpop.permute.xlu0 %918  ;;  %1587 = vst.msk [vmem:[#allocation2 + $0x38] sm:$0xff] %vm454_vm4, %v1547_v43 }
 0x1da   : > { %955 = vst.msk [vmem:[#allocation2 + $0x60] sm:$0xff] %vm942_vm9, %v919_v31  ;;  %2035 = vrot.lane.b32.xlu1 %v2708_v19, %s2891_s4 }
 0x1db   : > { %1941 = vrot.lane.b32.xlu0 %v2693_v24, %s2890_s29 }
 0x1dc   : > { %v1930_v27 = vpop.permute.xlu1 %1929 }
 0x1dd   : > { %v1641_v8 = vpop.permute.xlu0 %1640  ;;  %1972 = vst.msk [vmem:[#allocation2 + $0x28] sm:$0xff] %vm845_vm8, %v1930_v27 }
 0x1de   : > { %1682 = vst.msk [vmem:[#allocation2 + $0x30] sm:$0xff] %vm551_vm5, %v1641_v8  ;;  %1654 = vrot.lane.b32.xlu1 %v2693_v24, %s2887_s18 }
 0x1df   : > { %1365 = vrot.lane.b32.xlu0 %v2692_v1, %s2884_s15 }
 0x1e0   : > { %v921_v35 = vpop.permute.xlu1 %920 }
 0x1e1   : > { %v2024_v30 = vpop.permute.xlu0 %2023  ;;  %v971_v50 = vld [vmem:[#allocation2 + $0x60] sm:$0xff]  ;;  %956 = vst.msk [vmem:[#allocation2 + $0x68] sm:$0xff] %vm942_vm9, %v921_v35 }
 0x1e2   : > { %2067 = vst.msk [vmem:[#allocation2 + $0x20] sm:$0xff] %vm942_vm9, %v2024_v30  ;;  %2803 = vmatprep.mubr.msk.f32.mxu0 %vm980_vm10, %v971_v50  ;;  %2037 = vrot.lane.b32.xlu1 %v2709_v18, %s2891_s4 }
 0x1e3   : > { %1301 = vst.msk [vmem:[#allocation2 + $0x60] sm:$0xff] %vm160_vm0, %v3720_v62  ;;  %1748 = vrot.lane.b32.xlu0 %v2708_v19, %s2888_s19  ;;  %v2710_v62 = vld [vmem:[%s2921_s14 + $0x182] sm:$0xff] }
 0x1e4   : > { %v1643_v51 = vpop.permute.xlu1 %1642 }
 0x1e5   : > { %v1354_v52 = vpop.permute.xlu0 %1353  ;;  %1683 = vst.msk [vmem:[#allocation2 + $0x38] sm:$0xff] %vm551_vm5, %v1643_v51 }
 0x1e6   : > { %1393 = vst.msk [vmem:[#allocation2 + $0x40] sm:$0xff] %vm257_vm1, %v1354_v52  ;;  %1461 = vrot.lane.b32.xlu1 %v2708_v19, %s2885_s16 }
 0x1e7   : > { %1367 = vrot.lane.b32.xlu0 %v2693_v24, %s2884_s15 }
 0x1e8   : > { %v2026_v34 = vpop.permute.xlu1 %2025  ;;  %v972_v56 = vld [vmem:[#allocation2 + $0x68] sm:$0xff] }
 0x1e9   : > { %v1737_v48 = vpop.permute.xlu0 %1736  ;;  %v2083_v58 = vld [vmem:[#allocation2 + $0x20] sm:$0xff]  ;;  %2068 = vst.msk [vmem:[#allocation2 + $0x28] sm:$0xff] %vm942_vm9, %v2026_v34  ;;  %2804 = vmatmul.mubr.msk.f32.gmra.mrb[12].mxu0 %vm980_vm10, %v972_v56 }
 0x1ea   : > { %1778 = vst.msk [vmem:[#allocation2 + $0x30] sm:$0xff] %vm648_vm6, %v1737_v48  ;;  %2825 = vmatprep.mubr.msk.f32.mxu1 %vm980_vm10, %v2083_v58  ;;  %1847 = vrot.lane.b32.xlu1 %v2678_v53, %s2889_s28 }
 0x1eb   : > { %1302 = vst.msk [vmem:[#allocation2 + $0x68] sm:$0xff] %vm160_vm0, %v3734_v63  ;;  %1750 = vrot.lane.b32.xlu0 %v2709_v18, %s2888_s19 }
 0x1ec   : > { %v1356_v47 = vpop.permute.xlu1 %1355 }
 0x1ed   : > { %v729_v59 = vpop.permute.xlu0 %728  ;;  %1394 = vst.msk [vmem:[#allocation2 + $0x48] sm:$0xff] %vm257_vm1, %v1356_v47 }
 0x1ee   : > { %763 = vst.msk [vmem:[#allocation2 + $0x70] sm:$0xff] %vm748_vm7, %v729_v59  ;;  %1560 = vrot.lane.b32.xlu1 %v2678_v53, %s2886_s17 }
 0x1ef   : > { %1463 = vrot.lane.b32.xlu0 %v2709_v18, %s2885_s16 }
 0x1f0   : > { %v1739_v60 = vpop.permute.xlu1 %1738  ;;  %v2084_v46 = vld [vmem:[#allocation2 + $0x28] sm:$0xff] }
 0x1f1   : > { %v1450_v20 = vpop.permute.xlu0 %1449  ;;  %1779 = vst.msk [vmem:[#allocation2 + $0x38] sm:$0xff] %vm648_vm6, %v1739_v60  ;;  %2826 = vmatmul.mubr.msk.f32.gmra.mrb[4].mxu1 %vm980_vm10, %v2084_v46 }
 0x1f2   : > { %1489 = vst.msk [vmem:[#allocation2 + $0x40] sm:$0xff] %vm354_vm2, %v1450_v20  ;;  %1943 = vrot.lane.b32.xlu1 %v2694_v25, %s2890_s29 }
 0x1f3   : > { %1849 = vrot.lane.b32.xlu0 %v2679_v21, %s2889_s28 }
 0x1f4   : > { %v731_v12 = vpop.permute.xlu1 %730 }
 0x1f5   : > { %v1836_v42 = vpop.permute.xlu0 %1835  ;;  %764 = vst.msk [vmem:[#allocation2 + $0x78] sm:$0xff] %vm748_vm7, %v731_v12 }
 0x1f6   : > { %1877 = vst.msk [vmem:[#allocation2 + $0x30] sm:$0xff] %vm748_vm7, %v1836_v42  ;;  %1656 = vrot.lane.b32.xlu1 %v2694_v25, %s2887_s18 }
 0x1f7   : > { %1562 = vrot.lane.b32.xlu0 %v2679_v21, %s2886_s17 }
 0x1f8   : > { %v1452_v5 = vpop.permute.xlu1 %1451 }
 0x1f9   : > { %v826_v29 = vpop.permute.xlu0 %825  ;;  %1490 = vst.msk [vmem:[#allocation2 + $0x48] sm:$0xff] %vm354_vm2, %v1452_v5 }
 0x1fa   : > { %860 = vst.msk [vmem:[#allocation2 + $0x70] sm:$0xff] %vm845_vm8, %v826_v29  ;;  %2039 = vrot.lane.b32.xlu1 %v2710_v62, %s2891_s4 }
 0x1fb   : > { %1945 = vrot.lane.b32.xlu0 %v2695_v13, %s2890_s29 }
 0x1fc   : > { %v1838_v57 = vpop.permute.xlu1 %1837 }
 0x1fd   : > { %v1549_v61 = vpop.permute.xlu0 %1548  ;;  %1878 = vst.msk [vmem:[#allocation2 + $0x38] sm:$0xff] %vm748_vm7, %v1838_v57 }
 0x1fe   : > { %1588 = vst.msk [vmem:[#allocation2 + $0x40] sm:$0xff] %vm454_vm4, %v1549_v61  ;;  %1752 = vrot.lane.b32.xlu1 %v2710_v62, %s2888_s19 }
 0x1ff   : > { %1658 = vrot.lane.b32.xlu0 %v2695_v13, %s2887_s18 }
 0x200   : > { %v828_v63 = vpop.permute.xlu1 %827 }
 0x201   : > { %v1932_v49 = vpop.permute.xlu0 %1931  ;;  %861 = vst.msk [vmem:[#allocation2 + $0x78] sm:$0xff] %vm845_vm8, %v828_v63 }
 0x202   : > { %1973 = vst.msk [vmem:[#allocation2 + $0x30] sm:$0xff] %vm845_vm8, %v1932_v49  ;;  %1754 = vrot.lane.b32.xlu1 %v2711_v15, %s2888_s19 }
 0x203   : > { %2041 = vrot.lane.b32.xlu0 %v2711_v15, %s2891_s4 }
 0x204   : > { %v1551_v28 = vpop.permute.xlu1 %1550 }
 0x205   : > { %v923_v37 = vpop.permute.xlu0 %922  ;;  %1589 = vst.msk [vmem:[#allocation2 + $0x48] sm:$0xff] %vm454_vm4, %v1551_v28 }
 0x206   : > { %957 = vst.msk [vmem:[#allocation2 + $0x70] sm:$0xff] %vm942_vm9, %v923_v37  ;;  %1853 = vrot.lane.b32.xlu1 %v2681_v4, %s2889_s28 }
 0x207   : > { %1851 = vrot.lane.b32.xlu0 %v2680_v0, %s2889_s28 }
 0x208   : > { %v1934_v36 = vpop.permute.xlu1 %1933 }
 0x209   : > { %v1645_v6 = vpop.permute.xlu0 %1644  ;;  %1974 = vst.msk [vmem:[#allocation2 + $0x38] sm:$0xff] %vm845_vm8, %v1934_v36 }
 0x20a   : > { %1684 = vst.msk [vmem:[#allocation2 + $0x40] sm:$0xff] %vm551_vm5, %v1645_v6  ;;  %1949 = vrot.lane.b32.xlu1 %v2697_v45, %s2890_s29 }
 0x20b   : > { %1947 = vrot.lane.b32.xlu0 %v2696_v14, %s2890_s29 }
 0x20c   : > { %v925_v7 = vpop.permute.xlu1 %924 }
 0x20d   : > { %v2028_v38 = vpop.permute.xlu0 %2027  ;;  %v973_v39 = vld [vmem:[#allocation2 + $0x70] sm:$0xff]  ;;  %958 = vst.msk [vmem:[#allocation2 + $0x78] sm:$0xff] %vm942_vm9, %v925_v7  ;;  %v2787_v16 = vpop.f32.mrb[0].mxu0 }
 0x20e   : > { %2069 = vst.msk [vmem:[#allocation2 + $0x30] sm:$0xff] %vm942_vm9, %v2028_v38  ;;  %2806 = vmatprep.mubr.msk.f32.mxu0 %vm980_vm10, %v973_v39  ;;  %v1180_v54 = vsel %vm1178_vm11, %v2787_v16, 0.0  ;;  %v1218_v33 = vmul.f32 %v2787_v16, %v2787_v16  ;;  %v1099_v17 = vpop.f32.mrb[1].mxu0  ;;  %2045 = vrot.lane.b32.xlu1 %v2713_v44, %s2891_s4 }
 0x20f   : > { %1303 = vst.msk [vmem:[#allocation2 + $0x70] sm:$0xff] %vm160_vm0, %v3774_v10  ;;  %2043 = vrot.lane.b32.xlu0 %v2712_v55, %s2891_s4  ;;  %v1179_v9 = vsel %vm1178_vm11, %v1099_v17, 0.0  ;;  %v1217_v40 = vmul.f32 %v1099_v17, %v1099_v17 }
 0x210   : > { %v1234_v41 = vsel %vm1178_vm11, %v1218_v33, 0.0  ;;  %v1181_v23 = vadd.f32 %v1180_v54, %v1179_v9  ;;  %v1647_v32 = vpop.permute.xlu1 %1646 }
 0x211   : > { %v1358_v1 = vpop.permute.xlu0 %1357  ;;  %v1233_v26 = vsel %vm1178_vm11, %v1217_v40, 0.0  ;;  %1685 = vst.msk [vmem:[#allocation2 + $0x48] sm:$0xff] %vm551_vm5, %v1647_v32 }
 0x212   : > { %1395 = vst.msk [vmem:[#allocation2 + $0x50] sm:$0xff] %vm257_vm1, %v1358_v1  ;;  %v1235_v10 = vadd.f32 %v1234_v41, %v1233_v26 }
 0x214   : > { %v2030_v22 = vpop.permute.xlu1 %2029  ;;  %v974_v11 = vld [vmem:[#allocation2 + $0x78] sm:$0xff] }
 0x215   : > { %v1741_v3 = vpop.permute.xlu0 %1740  ;;  %v2085_v19 = vld [vmem:[#allocation2 + $0x30] sm:$0xff]  ;;  %2070 = vst.msk [vmem:[#allocation2 + $0x38] sm:$0xff] %vm942_vm9, %v2030_v22  ;;  %2807 = vmatmul.mubr.msk.f32.gmra.mrb[14].mxu0 %vm980_vm10, %v974_v11  ;;  %v2790_v24 = vpop.f32.mrb[2].mxu0 }
 0x216   : > { %1780 = vst.msk [vmem:[#allocation2 + $0x40] sm:$0xff] %vm648_vm6, %v1741_v3  ;;  %2828 = vmatprep.mubr.msk.f32.mxu1 %vm980_vm10, %v2085_v19  ;;  %v1109_v43 = vpop.f32.mrb[3].mxu0  ;;  %v1220_v31 = vmul.f32 %v2790_v24, %v2790_v24  ;;  %v1184_v50 = vsel %vm1178_vm11, %v2790_v24, 0.0 }
 0x217   : > { %1304 = vst.msk [vmem:[#allocation2 + $0x78] sm:$0xff] %vm160_vm0, %v3788_v2  ;;  %v1182_v27 = vsel %vm1178_vm11, %v1109_v43, 0.0  ;;  %v1219_v8 = vmul.f32 %v1109_v43, %v1109_v43 }
 0x218   : > { %v1454_v18 = vpop.permute.xlu1 %1453  ;;  %v1183_v30 = vadd.f32 %v1182_v27, %v1181_v23  ;;  %v1238_v2 = vsel %vm1178_vm11, %v1220_v31, 0.0 }
 0x219   : > { %v1360_v35 = vpop.permute.xlu0 %1359  ;;  %1491 = vst.msk [vmem:[#allocation2 + $0x50] sm:$0xff] %vm354_vm2, %v1454_v18  ;;  %v1236_v51 = vsel %vm1178_vm11, %v1219_v8, 0.0 }
 0x21a   : > { %1396 = vst.msk [vmem:[#allocation2 + $0x58] sm:$0xff] %vm257_vm1, %v1360_v35  ;;  %v1237_v52 = vadd.f32 %v1236_v51, %v1235_v10  ;;  %v1185_v53 = vadd.f32 %v1184_v50, %v1183_v30 }
 0x21c   : > { %v1840_v34 = vpop.permute.xlu1 %1839  ;;  %v2086_v56 = vld [vmem:[#allocation2 + $0x38] sm:$0xff]  ;;  %v1239_v58 = vadd.f32 %v1238_v2, %v1237_v52 }
 0x21d   : > { %v1743_v48 = vpop.permute.xlu0 %1742  ;;  %1879 = vst.msk [vmem:[#allocation2 + $0x40] sm:$0xff] %vm748_vm7, %v1840_v34  ;;  %2829 = vmatmul.mubr.msk.f32.gmra.mrb[6].mxu1 %vm980_vm10, %v2086_v56 }
 0x21e   : > { %1781 = vst.msk [vmem:[#allocation2 + $0x48] sm:$0xff] %vm648_vm6, %v1743_v48 }
 0x220   : > { %v1553_v47 = vpop.permute.xlu1 %1552 }
 0x221   : > { %v1456_v59 = vpop.permute.xlu0 %1455  ;;  %1590 = vst.msk [vmem:[#allocation2 + $0x50] sm:$0xff] %vm454_vm4, %v1553_v47  ;;  %v2793_v21 = vpop.f32.mrb[4].mxu0 }
 0x222   : > { %1492 = vst.msk [vmem:[#allocation2 + $0x58] sm:$0xff] %vm354_vm2, %v1456_v59  ;;  %v1119_v25 = vpop.f32.mrb[5].mxu0  ;;  %v1222_v60 = vmul.f32 %v2793_v21, %v2793_v21  ;;  %v1188_v62 = vsel %vm1178_vm11, %v2793_v21, 0.0 }
 0x223   : > { %v1186_v20 = vsel %vm1178_vm11, %v1119_v25, 0.0  ;;  %v1221_v46 = vmul.f32 %v1119_v25, %v1119_v25 }
 0x224   : > { %v1936_v12 = vpop.permute.xlu1 %1935  ;;  %v1187_v13 = vadd.f32 %v1186_v20, %v1185_v53  ;;  %v1242_v61 = vsel %vm1178_vm11, %v1222_v60, 0.0 }
 0x225   : > { %v1842_v42 = vpop.permute.xlu0 %1841  ;;  %1975 = vst.msk [vmem:[#allocation2 + $0x40] sm:$0xff] %vm845_vm8, %v1936_v12  ;;  %v1240_v5 = vsel %vm1178_vm11, %v1221_v46, 0.0 }
 0x226   : > { %1880 = vst.msk [vmem:[#allocation2 + $0x48] sm:$0xff] %vm748_vm7, %v1842_v42  ;;  %v1241_v29 = vadd.f32 %v1240_v5, %v1239_v58  ;;  %v1189_v57 = vadd.f32 %v1188_v62, %v1187_v13 }
 0x228   : > { %v1649_v15 = vpop.permute.xlu1 %1648  ;;  %v1243_v49 = vadd.f32 %v1242_v61, %v1241_v29 }
 0x229   : > { %v1555_v63 = vpop.permute.xlu0 %1554  ;;  %1686 = vst.msk [vmem:[#allocation2 + $0x50] sm:$0xff] %vm551_vm5, %v1649_v15 }
 0x22a   : > { %1591 = vst.msk [vmem:[#allocation2 + $0x58] sm:$0xff] %vm454_vm4, %v1555_v63 }
 0x22c   : > { %v2032_v0 = vpop.permute.xlu1 %2031 }
 0x22d   : > { %v1938_v4 = vpop.permute.xlu0 %1937  ;;  %2071 = vst.msk [vmem:[#allocation2 + $0x40] sm:$0xff] %vm942_vm9, %v2032_v0 }
 0x22e   : > { %1976 = vst.msk [vmem:[#allocation2 + $0x48] sm:$0xff] %vm845_vm8, %v1938_v4 }
 0x230   : > { %v1651_v28 = vpop.permute.xlu1 %1650 }
 0x231   : > { %v1362_v37 = vpop.permute.xlu0 %1361  ;;  %1687 = vst.msk [vmem:[#allocation2 + $0x58] sm:$0xff] %vm551_vm5, %v1651_v28 }
 0x232   : > { %1397 = vst.msk [vmem:[#allocation2 + $0x60] sm:$0xff] %vm257_vm1, %v1362_v37 }
 0x234   : > { %v2034_v14 = vpop.permute.xlu1 %2033  ;;  %v2087_v36 = vld [vmem:[#allocation2 + $0x40] sm:$0xff] }
 0x235   : > { %v1745_v45 = vpop.permute.xlu0 %1744  ;;  %2072 = vst.msk [vmem:[#allocation2 + $0x48] sm:$0xff] %vm942_vm9, %v2034_v14  ;;  %2831 = vmatprep.mubr.msk.f32.mxu1 %vm980_vm10, %v2087_v36 }
 0x236   : > { %1782 = vst.msk [vmem:[#allocation2 + $0x50] sm:$0xff] %vm648_vm6, %v1745_v45 }
 0x238   : > { %v1458_v6 = vpop.permute.xlu1 %1457 }
 0x239   : > { %v1364_v55 = vpop.permute.xlu0 %1363  ;;  %1493 = vst.msk [vmem:[#allocation2 + $0x60] sm:$0xff] %vm354_vm2, %v1458_v6 }
 0x23a   : > { %1398 = vst.msk [vmem:[#allocation2 + $0x68] sm:$0xff] %vm257_vm1, %v1364_v55 }
 0x23c   : > { %v1844_v44 = vpop.permute.xlu1 %1843  ;;  %v2088_v38 = vld [vmem:[#allocation2 + $0x48] sm:$0xff] }
 0x23d   : > { %v1747_v7 = vpop.permute.xlu0 %1746  ;;  %1881 = vst.msk [vmem:[#allocation2 + $0x50] sm:$0xff] %vm748_vm7, %v1844_v44  ;;  %v2796_v39 = vpop.f32.mrb[6].mxu0  ;;  %2832 = vmatmul.mubr.msk.f32.gmra.mrb[8].mxu1 %vm980_vm10, %v2088_v38 }
 0x23e   : > { %1783 = vst.msk [vmem:[#allocation2 + $0x58] sm:$0xff] %vm648_vm6, %v1747_v7  ;;  %v1129_v16 = vpop.f32.mrb[7].mxu0  ;;  %v1224_v54 = vmul.f32 %v2796_v39, %v2796_v39  ;;  %v1192_v23 = vsel %vm1178_vm11, %v2796_v39, 0.0 }
 0x23f   : > { %v1190_v33 = vsel %vm1178_vm11, %v1129_v16, 0.0  ;;  %v1223_v17 = vmul.f32 %v1129_v16, %v1129_v16 }
 0x240   : > { %v1191_v9 = vadd.f32 %v1190_v33, %v1189_v57  ;;  %v1557_v40 = vpop.permute.xlu1 %1556  ;;  %v1246_v10 = vsel %vm1178_vm11, %v1224_v54, 0.0 }
 0x241   : > { %v1460_v41 = vpop.permute.xlu0 %1459  ;;  %v1244_v32 = vsel %vm1178_vm11, %v1223_v17, 0.0  ;;  %1592 = vst.msk [vmem:[#allocation2 + $0x60] sm:$0xff] %vm454_vm4, %v1557_v40 }
 0x242   : > { %1494 = vst.msk [vmem:[#allocation2 + $0x68] sm:$0xff] %vm354_vm2, %v1460_v41  ;;  %v1245_v1 = vadd.f32 %v1244_v32, %v1243_v49  ;;  %v1193_v26 = vadd.f32 %v1192_v23, %v1191_v9 }
 0x244   : > { %v1940_v22 = vpop.permute.xlu1 %1939  ;;  %v1247_v11 = vadd.f32 %v1246_v10, %v1245_v1 }
 0x245   : > { %v1846_v3 = vpop.permute.xlu0 %1845  ;;  %1977 = vst.msk [vmem:[#allocation2 + $0x50] sm:$0xff] %vm845_vm8, %v1940_v22 }
 0x246   : > { %1882 = vst.msk [vmem:[#allocation2 + $0x58] sm:$0xff] %vm748_vm7, %v1846_v3 }
 0x248   : > { %v1653_v19 = vpop.permute.xlu1 %1652 }
 0x249   : > { %v1559_v24 = vpop.permute.xlu0 %1558  ;;  %1688 = vst.msk [vmem:[#allocation2 + $0x60] sm:$0xff] %vm551_vm5, %v1653_v19 }
 0x24a   : > { %1593 = vst.msk [vmem:[#allocation2 + $0x68] sm:$0xff] %vm454_vm4, %v1559_v24 }
 0x24c   : > { %v2036_v43 = vpop.permute.xlu1 %2035 }
 0x24d   : > { %v1942_v31 = vpop.permute.xlu0 %1941  ;;  %2073 = vst.msk [vmem:[#allocation2 + $0x50] sm:$0xff] %vm942_vm9, %v2036_v43 }
 0x24e   : > { %1978 = vst.msk [vmem:[#allocation2 + $0x58] sm:$0xff] %vm845_vm8, %v1942_v31 }
 0x250   : > { %v1655_v27 = vpop.permute.xlu1 %1654 }
 0x251   : > { %v1366_v8 = vpop.permute.xlu0 %1365  ;;  %1689 = vst.msk [vmem:[#allocation2 + $0x68] sm:$0xff] %vm551_vm5, %v1655_v27 }
 0x252   : > { %1399 = vst.msk [vmem:[#allocation2 + $0x70] sm:$0xff] %vm257_vm1, %v1366_v8 }
 0x254   : > { %v2038_v18 = vpop.permute.xlu1 %2037  ;;  %v2089_v30 = vld [vmem:[#allocation2 + $0x50] sm:$0xff] }
 0x255   : > { %v1749_v35 = vpop.permute.xlu0 %1748  ;;  %2074 = vst.msk [vmem:[#allocation2 + $0x58] sm:$0xff] %vm942_vm9, %v2038_v18  ;;  %2834 = vmatprep.mubr.msk.f32.mxu1 %vm980_vm10, %v2089_v30 }
 0x256   : > { %1784 = vst.msk [vmem:[#allocation2 + $0x60] sm:$0xff] %vm648_vm6, %v1749_v35 }
 0x258   : > { %v1462_v51 = vpop.permute.xlu1 %1461 }
 0x259   : > { %v1368_v50 = vpop.permute.xlu0 %1367  ;;  %1495 = vst.msk [vmem:[#allocation2 + $0x70] sm:$0xff] %vm354_vm2, %v1462_v51 }
 0x25a   : > { %1400 = vst.msk [vmem:[#allocation2 + $0x78] sm:$0xff] %vm257_vm1, %v1368_v50 }
 0x25c   : > { %v1848_v53 = vpop.permute.xlu1 %1847  ;;  %v2090_v2 = vld [vmem:[#allocation2 + $0x58] sm:$0xff] }
 0x25d   : > { %v1751_v52 = vpop.permute.xlu0 %1750  ;;  %1883 = vst.msk [vmem:[#allocation2 + $0x60] sm:$0xff] %vm748_vm7, %v1848_v53  ;;  %2835 = vmatmul.mubr.msk.f32.gmra.mrb[10].mxu1 %vm980_vm10, %v2090_v2 }
 0x25e   : > { %1785 = vst.msk [vmem:[#allocation2 + $0x68] sm:$0xff] %vm648_vm6, %v1751_v52 }
 0x260   : > { %v1561_v48 = vpop.permute.xlu1 %1560 }
 0x261   : > { %v1464_v34 = vpop.permute.xlu0 %1463  ;;  %1594 = vst.msk [vmem:[#allocation2 + $0x70] sm:$0xff] %vm454_vm4, %v1561_v48 }
 0x262   : > { %1496 = vst.msk [vmem:[#allocation2 + $0x78] sm:$0xff] %vm354_vm2, %v1464_v34 }
 0x264   : > { %v2799_v58 = vpop.f32.mrb[8].mxu0  ;;  %v1944_v47 = vpop.permute.xlu1 %1943 }
 0x265   : > { %v1850_v56 = vpop.permute.xlu0 %1849  ;;  %v1139_v59 = vpop.f32.mrb[9].mxu0  ;;  %v1226_v21 = vmul.f32 %v2799_v58, %v2799_v58  ;;  %1979 = vst.msk [vmem:[#allocation2 + $0x60] sm:$0xff] %vm845_vm8, %v1944_v47  ;;  %v1196_v46 = vsel %vm1178_vm11, %v2799_v58, 0.0 }
 0x266   : > { %1884 = vst.msk [vmem:[#allocation2 + $0x68] sm:$0xff] %vm748_vm7, %v1850_v56  ;;  %v1194_v25 = vsel %vm1178_vm11, %v1139_v59, 0.0  ;;  %v1225_v60 = vmul.f32 %v1139_v59, %v1139_v59 }
 0x267   : > { %v1195_v20 = vadd.f32 %v1194_v25, %v1193_v26  ;;  %v1250_v29 = vsel %vm1178_vm11, %v1226_v21, 0.0 }
 0x268   : > { %v1248_v12 = vsel %vm1178_vm11, %v1225_v60, 0.0  ;;  %v1657_v62 = vpop.permute.xlu1 %1656 }
 0x269   : > { %v1563_v42 = vpop.permute.xlu0 %1562  ;;  %v1249_v13 = vadd.f32 %v1248_v12, %v1247_v11  ;;  %v1197_v5 = vadd.f32 %v1196_v46, %v1195_v20  ;;  %1690 = vst.msk [vmem:[#allocation2 + $0x70] sm:$0xff] %vm551_vm5, %v1657_v62 }
 0x26a   : > { %1595 = vst.msk [vmem:[#allocation2 + $0x78] sm:$0xff] %vm454_vm4, %v1563_v42 }
 0x26b   : > { %v1251_v57 = vadd.f32 %v1250_v29, %v1249_v13 }
 0x26c   : > { %v2821_v15 = vpop.f32.mrb[0].mxu1  ;;  %v2040_v0 = vpop.permute.xlu1 %2039 }
 0x26d   : > { %v1946_v61 = vpop.permute.xlu0 %1945  ;;  %v2297_v63 = vsel %vm1178_vm11, %v2821_v15, 0.0  ;;  %v2335_v49 = vmul.f32 %v2821_v15, %v2821_v15  ;;  %v2217_v4 = vpop.f32.mrb[1].mxu1  ;;  %2075 = vst.msk [vmem:[#allocation2 + $0x60] sm:$0xff] %vm942_vm9, %v2040_v0 }
 0x26e   : > { %1980 = vst.msk [vmem:[#allocation2 + $0x68] sm:$0xff] %vm845_vm8, %v1946_v61  ;;  %v2296_v28 = vsel %vm1178_vm11, %v2217_v4, 0.0  ;;  %v2334_v37 = vmul.f32 %v2217_v4, %v2217_v4 }
 0x26f   : > { %v2351_v14 = vsel %vm1178_vm11, %v2335_v49, 0.0  ;;  %v2298_v45 = vadd.f32 %v2297_v63, %v2296_v28 }
 0x270   : > { %v2350_v36 = vsel %vm1178_vm11, %v2334_v37, 0.0  ;;  %v1753_v44 = vpop.permute.xlu1 %1752 }
 0x271   : > { %v1659_v6 = vpop.permute.xlu0 %1658  ;;  %v2352_v55 = vadd.f32 %v2351_v14, %v2350_v36  ;;  %1786 = vst.msk [vmem:[#allocation2 + $0x70] sm:$0xff] %vm648_vm6, %v1753_v44 }
 0x272   : > { %1691 = vst.msk [vmem:[#allocation2 + $0x78] sm:$0xff] %vm551_vm5, %v1659_v6 }
 0x274   : > { %v1755_v38 = vpop.permute.xlu1 %1754  ;;  %v2091_v39 = vld [vmem:[#allocation2 + $0x60] sm:$0xff] }
 0x275   : > { %v2042_v7 = vpop.permute.xlu0 %2041  ;;  %1787 = vst.msk [vmem:[#allocation2 + $0x78] sm:$0xff] %vm648_vm6, %v1755_v38  ;;  %2837 = vmatprep.mubr.msk.f32.mxu1 %vm980_vm10, %v2091_v39 }
 0x276   : > { %2076 = vst.msk [vmem:[#allocation2 + $0x68] sm:$0xff] %vm942_vm9, %v2042_v7 }
 0x278   : > { %v1854_v54 = vpop.permute.xlu1 %1853 }
 0x279   : > { %v1852_v16 = vpop.permute.xlu0 %1851  ;;  %1886 = vst.msk [vmem:[#allocation2 + $0x78] sm:$0xff] %vm748_vm7, %v1854_v54 }
 0x27a   : > { %1885 = vst.msk [vmem:[#allocation2 + $0x70] sm:$0xff] %vm748_vm7, %v1852_v16 }
 0x27c   : > { %v1950_v9 = vpop.permute.xlu1 %1949 }
 0x27d   : > { %v1948_v33 = vpop.permute.xlu0 %1947  ;;  %v2092_v17 = vld [vmem:[#allocation2 + $0x68] sm:$0xff]  ;;  %1982 = vst.msk [vmem:[#allocation2 + $0x78] sm:$0xff] %vm845_vm8, %v1950_v9 }
 0x27e   : > { %1981 = vst.msk [vmem:[#allocation2 + $0x70] sm:$0xff] %vm845_vm8, %v1948_v33  ;;  %2838 = vmatmul.mubr.msk.f32.gmra.mrb[12].mxu1 %vm980_vm10, %v2092_v17 }
 0x280   : > { %v2046_v41 = vpop.permute.xlu1 %2045 }
 0x281   : > { %v2044_v40 = vpop.permute.xlu0 %2043  ;;  %2078 = vst.msk [vmem:[#allocation2 + $0x78] sm:$0xff] %vm942_vm9, %v2046_v41 }
 0x282   : > { %2077 = vst.msk [vmem:[#allocation2 + $0x70] sm:$0xff] %vm942_vm9, %v2044_v40 }
 0x288   : > { %v2094_v32 = vld [vmem:[#allocation2 + $0x78] sm:$0xff] }
 0x289   : > { %v2093_v23 = vld [vmem:[#allocation2 + $0x70] sm:$0xff] }
 0x28a   : > { %2840 = vmatprep.mubr.msk.f32.mxu1 %vm980_vm10, %v2093_v23 }
 0x28b   : > { %2841 = vmatmul.mubr.msk.f32.gmra.mrb[14].mxu1 %vm980_vm10, %v2094_v32 }
 0x290   : > { %v2802_v1 = vpop.f32.mrb[10].mxu0 }
 0x291   : > { %v1149_v26 = vpop.f32.mrb[11].mxu0  ;;  %v1228_v10 = vmul.f32 %v2802_v1, %v2802_v1  ;;  %v1200_v19 = vsel %vm1178_vm11, %v2802_v1, 0.0 }
 0x292   : > { %v1198_v22 = vsel %vm1178_vm11, %v1149_v26, 0.0  ;;  %v1227_v3 = vmul.f32 %v1149_v26, %v1149_v26 }
 0x293   : > { %v1199_v11 = vadd.f32 %v1198_v22, %v1197_v5  ;;  %v1254_v27 = vsel %vm1178_vm11, %v1228_v10, 0.0 }
 0x294   : > { %v1252_v24 = vsel %vm1178_vm11, %v1227_v3, 0.0 }
 0x295   : > { %v1253_v43 = vadd.f32 %v1252_v24, %v1251_v57  ;;  %v1201_v31 = vadd.f32 %v1200_v19, %v1199_v11 }
 0x297   : > { %v1255_v8 = vadd.f32 %v1254_v27, %v1253_v43 }
 0x298   : > { %v2824_v18 = vpop.f32.mrb[2].mxu1 }
 0x299   : > { %v2227_v35 = vpop.f32.mrb[3].mxu1  ;;  %v2337_v30 = vmul.f32 %v2824_v18, %v2824_v18  ;;  %v2301_v53 = vsel %vm1178_vm11, %v2824_v18, 0.0 }
 0x29a   : > { %v2299_v50 = vsel %vm1178_vm11, %v2227_v35, 0.0  ;;  %v2336_v51 = vmul.f32 %v2227_v35, %v2227_v35 }
 0x29b   : > { %v2300_v52 = vadd.f32 %v2299_v50, %v2298_v45  ;;  %v2355_v56 = vsel %vm1178_vm11, %v2337_v30, 0.0 }
 0x29c   : > { %v2353_v2 = vsel %vm1178_vm11, %v2336_v51, 0.0 }
 0x29d   : > { %v2354_v34 = vadd.f32 %v2353_v2, %v2352_v55  ;;  %v2302_v48 = vadd.f32 %v2301_v53, %v2300_v52 }
 0x29f   : > { %v2356_v58 = vadd.f32 %v2355_v56, %v2354_v34 }
 0x2bc   : > { %v2805_v47 = vpop.f32.mrb[12].mxu0 }
 0x2bd   : > { %v1159_v59 = vpop.f32.mrb[13].mxu0  ;;  %v1230_v21 = vmul.f32 %v2805_v47, %v2805_v47  ;;  %v1204_v46 = vsel %vm1178_vm11, %v2805_v47, 0.0 }
 0x2be   : > { %v1202_v25 = vsel %vm1178_vm11, %v1159_v59, 0.0  ;;  %v1229_v60 = vmul.f32 %v1159_v59, %v1159_v59 }
 0x2bf   : > { %v1203_v20 = vadd.f32 %v1202_v25, %v1201_v31  ;;  %v1258_v62 = vsel %vm1178_vm11, %v1230_v21, 0.0 }
 0x2c0   : > { %v1256_v12 = vsel %vm1178_vm11, %v1229_v60, 0.0 }
 0x2c1   : > { %v1257_v42 = vadd.f32 %v1256_v12, %v1255_v8  ;;  %v1205_v13 = vadd.f32 %v1204_v46, %v1203_v20 }
 0x2c3   : > { %v1259_v5 = vadd.f32 %v1258_v62, %v1257_v42 }
 0x2c4   : > { %v2827_v29 = vpop.f32.mrb[4].mxu1 }
 0x2c5   : > { %v2237_v57 = vpop.f32.mrb[5].mxu1  ;;  %v2339_v61 = vmul.f32 %v2827_v29, %v2827_v29  ;;  %v2305_v0 = vsel %vm1178_vm11, %v2827_v29, 0.0 }
 0x2c6   : > { %v2303_v15 = vsel %vm1178_vm11, %v2237_v57, 0.0  ;;  %v2338_v63 = vmul.f32 %v2237_v57, %v2237_v57 }
 0x2c7   : > { %v2304_v49 = vadd.f32 %v2303_v15, %v2302_v48  ;;  %v2359_v14 = vsel %vm1178_vm11, %v2339_v61, 0.0 }
 0x2c8   : > { %v2357_v4 = vsel %vm1178_vm11, %v2338_v63, 0.0 }
 0x2c9   : > { %v2358_v28 = vadd.f32 %v2357_v4, %v2356_v58  ;;  %v2306_v37 = vadd.f32 %v2305_v0, %v2304_v49 }
 0x2cb   : > { %v2360_v45 = vadd.f32 %v2359_v14, %v2358_v28 }
 0x2e8   : > { %v2808_v36 = vpop.f32.mrb[14].mxu0 }
 0x2e9   : > { %v1169_v6 = vpop.f32.mrb[15].mxu0  ;;  %v1232_v55 = vmul.f32 %v2808_v36, %v2808_v36  ;;  %v1208_v39 = vsel %vm1178_vm11, %v2808_v36, 0.0 }
 0x2ea   : > { %v1206_v44 = vsel %vm1178_vm11, %v1169_v6, 0.0  ;;  %v1231_v7 = vmul.f32 %v1169_v6, %v1169_v6 }
 0x2eb   : > { %v1207_v38 = vadd.f32 %v1206_v44, %v1205_v13  ;;  %v1262_v17 = vsel %vm1178_vm11, %v1232_v55, 0.0 }
 0x2ec   : > { %v1260_v16 = vsel %vm1178_vm11, %v1231_v7, 0.0 }
 0x2ed   : > { %v1209_v54 = vadd.f32 %v1208_v39, %v1207_v38  ;;  %v1261_v33 = vadd.f32 %v1260_v16, %v1259_v5 }
 0x2ef   : > { %v1263_v9 = vadd.f32 %v1262_v17, %v1261_v33  ;;  %v1210_v28 = vrot.slane %v1209_v54, 4 }
 0x2f0   : > { %v2830_v40 = vpop.f32.mrb[6].mxu1 }
 0x2f1   : > { %v2247_v41 = vpop.f32.mrb[7].mxu1  ;;  %v2341_v23 = vmul.f32 %v2830_v40, %v2830_v40  ;;  %v2309_v10 = vsel %vm1178_vm11, %v2830_v40, 0.0 }
 0x2f2   : > { %v2307_v32 = vsel %vm1178_vm11, %v2247_v41, 0.0  ;;  %v2340_v1 = vmul.f32 %v2247_v41, %v2247_v41 }
 0x2f3   : > { %v2308_v26 = vadd.f32 %v2307_v32, %v2306_v37  ;;  %v2363_v19 = vsel %vm1178_vm11, %v2341_v23, 0.0  ;;  %v1264_v37 = vrot.slane %v1263_v9, 4 }
 0x2f4   : > { %v2361_v22 = vsel %vm1178_vm11, %v2340_v1, 0.0 }
 0x2f5   : > { %v2362_v3 = vadd.f32 %v2361_v22, %v2360_v45  ;;  %v2310_v11 = vadd.f32 %v2309_v10, %v2308_v26  ;;  %v1211_v45 = vadd.f32 %v1210_v28, %v1209_v54  ;;  %v1265_v7 = vadd.f32 %v1264_v37, %v1263_v9 }
 0x2f7   : > { %v2364_v24 = vadd.f32 %v2363_v19, %v2362_v3  ;;  %v1212_v33 = vrot.slane %v1211_v45, 2  ;;  %v1266_v23 = vrot.slane %v1265_v7, 2 }
 0x2f9   : > { %v1213_v54 = vadd.f32 %v1212_v33, %v1211_v45  ;;  %v1267_v22 = vadd.f32 %v1266_v23, %v1265_v7 }
 0x310   : > { %v2833_v43 = vpop.f32.mrb[8].mxu1 }
 0x311   : > { %v2257_v31 = vpop.f32.mrb[9].mxu1  ;;  %v2343_v27 = vmul.f32 %v2833_v43, %v2833_v43  ;;  %v2313_v30 = vsel %vm1178_vm11, %v2833_v43, 0.0  ;;  %v1268_v43 = vrot.slane %v1267_v22, 1 }
 0x312   : > { %v2311_v8 = vsel %vm1178_vm11, %v2257_v31, 0.0  ;;  %v2342_v18 = vmul.f32 %v2257_v31, %v2257_v31 }
 0x313   : > { %v2312_v35 = vadd.f32 %v2311_v8, %v2310_v11  ;;  %v2367_v53 = vsel %vm1178_vm11, %v2343_v27, 0.0  ;;  %v1214_v11 = vrot.slane %v1213_v54, 1 }
 0x314   : > { %v2365_v50 = vsel %vm1178_vm11, %v2342_v18, 0.0 }
 0x315   : > { %v2366_v51 = vadd.f32 %v2365_v50, %v2364_v24  ;;  %v2314_v52 = vadd.f32 %v2313_v30, %v2312_v35  ;;  %v1215_v8 = vadd.f32 %v1214_v11, %v1213_v54  ;;  %v1269_v30 = vadd.f32 %v1268_v43, %v1267_v22 }
 0x317   : > { %v2368_v2 = vadd.f32 %v2367_v53, %v2366_v51 }
 0x330   : > { %v2836_v34 = vpop.f32.mrb[10].mxu1 }
 0x331   : > { %v2267_v48 = vpop.f32.mrb[11].mxu1  ;;  %v2345_v56 = vmul.f32 %v2836_v34, %v2836_v34  ;;  %v2317_v21 = vsel %vm1178_vm11, %v2836_v34, 0.0 }
 0x332   : > { %v2315_v58 = vsel %vm1178_vm11, %v2267_v48, 0.0  ;;  %v2344_v47 = vmul.f32 %v2267_v48, %v2267_v48 }
 0x333   : > { %v2316_v59 = vadd.f32 %v2315_v58, %v2314_v52  ;;  %v2371_v46 = vsel %vm1178_vm11, %v2345_v56, 0.0 }
 0x334   : > { %v2369_v25 = vsel %vm1178_vm11, %v2344_v47, 0.0 }
 0x335   : > { %v2370_v60 = vadd.f32 %v2369_v25, %v2368_v2  ;;  %v2318_v20 = vadd.f32 %v2317_v21, %v2316_v59 }
 0x337   : > { %v2372_v12 = vadd.f32 %v2371_v46, %v2370_v60 }
 0x351   : > { %v2839_v42 = vpop.f32.mrb[12].mxu1 }
 0x352   : > { %v2277_v13 = vpop.f32.mrb[13].mxu1  ;;  %v2347_v62 = vmul.f32 %v2839_v42, %v2839_v42  ;;  %v2321_v61 = vsel %vm1178_vm11, %v2839_v42, 0.0 }
 0x353   : > { %v2319_v5 = vsel %vm1178_vm11, %v2277_v13, 0.0  ;;  %v2346_v29 = vmul.f32 %v2277_v13, %v2277_v13 }
 0x354   : > { %v2320_v57 = vadd.f32 %v2319_v5, %v2318_v20  ;;  %v2375_v0 = vsel %vm1178_vm11, %v2347_v62, 0.0 }
 0x355   : > { %v2373_v15 = vsel %vm1178_vm11, %v2346_v29, 0.0 }
 0x356   : > { %v2374_v63 = vadd.f32 %v2373_v15, %v2372_v12  ;;  %v2322_v49 = vadd.f32 %v2321_v61, %v2320_v57 }
 0x358   : > { %v2376_v4 = vadd.f32 %v2375_v0, %v2374_v63 }
 0x35e   : > { %v2842_v14 = vpop.f32.mrb[14].mxu1 }
 0x35f   : > { %v2287_v36 = vpop.f32.mrb[15].mxu1  ;;  %v2349_v6 = vmul.f32 %v2842_v14, %v2842_v14  ;;  %v2325_v39 = vsel %vm1178_vm11, %v2842_v14, 0.0 }
 0x360   : > { %v2323_v55 = vsel %vm1178_vm11, %v2287_v36, 0.0  ;;  %v2348_v44 = vmul.f32 %v2287_v36, %v2287_v36 }
 0x361   : > { %v2324_v38 = vadd.f32 %v2323_v55, %v2322_v49  ;;  %v2379_v41 = vsel %vm1178_vm11, %v2349_v6, 0.0 }
 0x362   : > { %v2377_v16 = vsel %vm1178_vm11, %v2348_v44, 0.0 }
 0x363   : > { %v2326_v17 = vadd.f32 %v2325_v39, %v2324_v38  ;;  %v2378_v40 = vadd.f32 %v2377_v16, %v2376_v4 }
 0x365   : > { %v2327_v32 = vrot.slane %v2326_v17, 4  ;;  %v2380_v1 = vadd.f32 %v2379_v41, %v2378_v40 }
 0x367   : > { %v2328_v26 = vadd.f32 %v2327_v32, %v2326_v17  ;;  %v2381_v10 = vrot.slane %v2380_v1, 4 }
 0x369   : > { %v2329_v3 = vrot.slane %v2328_v26, 2  ;;  %v2382_v9 = vadd.f32 %v2381_v10, %v2380_v1 }
 0x36b   : > { %v2330_v19 = vadd.f32 %v2329_v3, %v2328_v26  ;;  %v2383_v24 = vrot.slane %v2382_v9, 2 }
 0x36d   : > { %v2331_v31 = vrot.slane %v2330_v19, 1  ;;  %v2384_v27 = vadd.f32 %v2383_v24, %v2382_v9 }
 0x36f   : > { %v2332_v18 = vadd.f32 %v2331_v31, %v2330_v19  ;;  %v2385_v35 = vrot.slane %v2384_v27, 1 }
 0x371   : > { %v2333_v50 = vadd.f32 %v2332_v18, %v1215_v8  ;;  %v2386_v51 = vadd.f32 %v2385_v35, %v2384_v27 }
 0x373   : > { %v2387_v52 = vadd.f32 %v2386_v51, %v1269_v30 }
 0x375   : > { %v2389_v53 = vsel %vm2388_vm12, %v2333_v50, %v2387_v52 }
 0x376   : > { %2391 = vst.msk [vmem:[%s141_s12] sm:$0x3] %vm2390_vm13, %v2389_v53 }
 0x377 PF: > { %s12_s9 = sadd.s32 1, %s2882_s9  }
 0x378   : > { %p9_p4 = scmp.ge.s32.totalorder %s12_s9, 4  }
 0x37a   :  { %11 = sbr.rel (!%p9_p4) target bundleno = 1 (0x1), region = 64 }

// kernel: _duc_impl.3
= control target key start
LH: loop header
LB: loop body
LE: loop exit
PB: predicated region body
PF: predicated region fallthrough
CT: control target
= control target key end

     0   :  { %s2970_s15 = smov 0   ;;  %s4159_s0 = inlined_call_operand.vmem [shape: f32[2,18,18,4], index: 0, kind: input, shape index: {}]   ;;  %s4160_s1 = inlined_call_operand.vmem [shape: f32[36,12], index: 1, kind: input, shape index: {}]   ;;  %s4161_s2 = inlined_call_operand.vmem [shape: f32[1,12], index: 2, kind: input, shape index: {}]   ;;  %s4162_s3 = inlined_call_operand.vmem [shape: f32[1,12], index: 3, kind: input, shape index: {}]   ;;  %s4163_s4 = inlined_call_operand.vmem [shape: f32[2,16,16,12], index: 4, kind: output, shape index: {}]  }
   0x1 LB: > { %s2481_s16 = sadd.s32 4294967295, %s2935_s15   ;;  %p2485_p0 = scmp.ge.s32.totalorder %s2935_s15, 1  ;;  %s2935_s15 = sphi %s2970_s15, %s14_s15  }
   0x2   : > { %p162_p1 = scmp.lt.s32.totalorder %s2935_s15, 3 }
   0x4   : > { %p163_p2 = pnand %p2485_p0, %p162_p1 }
   0x5   : > { %p188_p3 = scmp.lt.s32.totalorder (!%p163_p2), %s2481_s16, 1  ;;  %s2937_s21 = smov (!%p163_p2), 4   ;;  %vm216_vm0 = vcmask (!%p163_p2), 31744   ;;  %vm313_vm1 = vcmask (!%p163_p2), 64544   ;;  %vm410_vm2 = vcmask (!%p163_p2), 97344   ;;  %vm510_vm3 = vcmask (!%p163_p2), 130144  }
   0x6   : > { %166 = sbr.rel (%p163_p2) target bundleno = 871 (0x367), region = 36  ;;  %s2938_s22 = smov (!%p163_p2), 8   ;;  %vm1085_vm4 = vcmask (!%p163_p2), 1043456   ;;  %vm607_vm5 = vcmask (!%p163_p2), 162944   ;;  %vm704_vm6 = vcmask (!%p163_p2), 195744   ;;  %vm804_vm7 = vcmask (!%p163_p2), 228544  }
   0x7   : > { %s2939_s23 = smov (!%p163_p2), 12   ;;  %s2940_s24 = smov (!%p163_p2), 16   ;;  %vm901_vm8 = vcmask (!%p163_p2), 261344   ;;  %vm998_vm9 = vcmask (!%p163_p2), 294144   ;;  %vm1036_vm10 = vcmask (!%p163_p2), 293888   ;;  %vm1298_vm11 = vcmask (!%p163_p2), 97280  }
   0x8   : > { %s2941_s25 = smov (!%p163_p2), 20   ;;  %s2942_s26 = smov (!%p163_p2), 24  }
   0x9   : > { %s2943_s9 = smov (!%p163_p2), 28   ;;  %s2944_s12 = smov (!%p163_p2), 32  }
   0xd   : > { %s4165_s16 = smov (!%p188_p3, %s2481_s16), 1 }
   0xe   : > { %s2912_s17 = smul.u32 432, %s4165_s16 }
  0x10   : > { %s2984_s20 = scalar_lea.vmem %s4159_s0, %s2912_s17 }
  0x11   : > { %v2987_v0 = vld [vmem:[%s2984_s20 + $0x19] sm:$0xff]  ;;  %v233_v1 = vld [vmem:[%s2984_s20 + $0x1] sm:$0xff]  ;;  %v234_v3 = vld [vmem:[%s2984_s20 + $0x9] sm:$0xff] }
  0x12   : > { %269 = vrot.lane.b32.xlu1 %v2987_v0, %s2937_s21  ;;  %265 = vrot.lane.b32.xlu0 %v233_v1, %s2937_s21  ;;  %v2994_v2 = vld [vmem:[%s2984_s20 + $0x21] sm:$0xff]  ;;  %v3001_v4 = vld [vmem:[%s2984_s20 + $0x39] sm:$0xff] }
  0x13   : > { %v3004_v5 = vld [vmem:[%s2984_s20 + $0x31] sm:$0xff]  ;;  %v3014_v7 = vld [vmem:[%s2984_s20 + $0x49] sm:$0xff]  ;;  %v3017_v8 = vld [vmem:[%s2984_s20 + $0x20] sm:$0xff] }
  0x14   : > { %v3011_v6 = vld [vmem:[%s2984_s20 + $0x51] sm:$0xff]  ;;  %v3020_v9 = vld [vmem:[%s2984_s20 + $0x69] sm:$0xff]  ;;  %v3023_v10 = vld [vmem:[%s2984_s20 + $0x61] sm:$0xff]  ;;  %220 = vst.msk [vmem:[#allocation2 + $0x18] sm:$0xff] %vm216_vm0, %v3017_v8 }
  0x15   : > { %v3026_v11 = vld [vmem:[%s2984_s20 + $0x18] sm:$0xff]  ;;  %v3032_v13 = vld [vmem:[%s2984_s20 + $0x30] sm:$0xff]  ;;  %v3044_v15 = vld [vmem:[%s2984_s20 + $0x48] sm:$0xff] }
  0x16   : > { %271 = vrot.lane.b32.xlu1 %v2994_v2, %s2937_s21  ;;  %267 = vrot.lane.b32.xlu0 %v234_v3, %s2937_s21  ;;  %v3029_v12 = vld [vmem:[%s2984_s20 + $0x38] sm:$0xff]  ;;  %v3041_v14 = vld [vmem:[%s2984_s20 + $0x50] sm:$0xff]  ;;  %219 = vst.msk [vmem:[#allocation2 + $0x10] sm:$0xff] %vm216_vm0, %v3026_v11  ;;  %221 = vst.msk [vmem:[#allocation2 + $0x20] sm:$0xff] %vm216_vm0, %v3032_v13 }
  0x17   : > { %222 = vst.msk [vmem:[#allocation2 + $0x28] sm:$0xff] %vm216_vm0, %v3029_v12  ;;  %v3053_v16 = vld [vmem:[%s2984_s20 + $0x68] sm:$0xff]  ;;  %v3056_v17 = vld [vmem:[%s2984_s20 + $0x60] sm:$0xff]  ;;  %224 = vst.msk [vmem:[#allocation2 + $0x38] sm:$0xff] %vm216_vm0, %v3041_v14 }
  0x18   : > { %v3059_v18 = vld [vmem:[%s2984_s20 + $0x80] sm:$0xff]  ;;  %223 = vst.msk [vmem:[#allocation2 + $0x30] sm:$0xff] %vm216_vm0, %v3044_v15  ;;  %v3066_v19 = vld [vmem:[%s2984_s20 + $0x78] sm:$0xff]  ;;  %v3072_v21 = vld [vmem:[%s2984_s20 + $0x90] sm:$0xff] }
  0x19   : > { %v3069_v20 = vld [vmem:[%s2984_s20 + $0x98] sm:$0xff]  ;;  %226 = vst.msk [vmem:[#allocation2 + $0x48] sm:$0xff] %vm216_vm0, %v3053_v16  ;;  %225 = vst.msk [vmem:[#allocation2 + $0x40] sm:$0xff] %vm216_vm0, %v3056_v17  ;;  %v3081_v22 = vld [vmem:[%s2984_s20 + $0xb0] sm:$0xff] }
  0x1a   : > { %275 = vrot.lane.b32.xlu1 %v3001_v4, %s2937_s21  ;;  %273 = vrot.lane.b32.xlu0 %v3004_v5, %s2937_s21  ;;  %228 = vst.msk [vmem:[#allocation2 + $0x58] sm:$0xff] %vm216_vm0, %v3059_v18  ;;  %v3084_v23 = vld [vmem:[%s2984_s20 + $0xa8] sm:$0xff]  ;;  %227 = vst.msk [vmem:[#allocation2 + $0x50] sm:$0xff] %vm216_vm0, %v3066_v19  ;;  %v200_v24 = vld [vmem:[%s2984_s20] sm:$0xff] }
  0x1b   : > { %230 = vst.msk [vmem:[#allocation2 + $0x68] sm:$0xff] %vm216_vm0, %v3069_v20  ;;  %229 = vst.msk [vmem:[#allocation2 + $0x60] sm:$0xff] %vm216_vm0, %v3072_v21  ;;  %v3102_v25 = vld [vmem:[%s2984_s20 + $0x81] sm:$0xff]  ;;  %v3105_v26 = vld [vmem:[%s2984_s20 + $0x79] sm:$0xff] }
  0x1c   : > { %232 = vst.msk [vmem:[#allocation2 + $0x78] sm:$0xff] %vm216_vm0, %v3081_v22  ;;  %231 = vst.msk [vmem:[#allocation2 + $0x70] sm:$0xff] %vm216_vm0, %v3084_v23  ;;  %v201_v27 = vld [vmem:[%s2984_s20 + $0x8] sm:$0xff]  ;;  %v3115_v28 = vld [vmem:[%s2984_s20 + $0x99] sm:$0xff] }
  0x1d   : > { %217 = vst.msk [vmem:[#allocation2] sm:$0xff] %vm216_vm0, %v200_v24  ;;  %218 = vst.msk [vmem:[#allocation2 + $0x8] sm:$0xff] %vm216_vm0, %v201_v27  ;;  %v3118_v29 = vld [vmem:[%s2984_s20 + $0x91] sm:$0xff]  ;;  %v3128_v31 = vld [vmem:[%s2984_s20 + $0xa9] sm:$0xff] }
  0x1e   : > { %279 = vrot.lane.b32.xlu1 %v3011_v6, %s2937_s21  ;;  %277 = vrot.lane.b32.xlu0 %v3014_v7, %s2937_s21  ;;  %v3125_v30 = vld [vmem:[%s2984_s20 + $0xb1] sm:$0xff]  ;;  %v330_v33 = vld [vmem:[%s2984_s20 + $0x2] sm:$0xff] }
  0x1f   : > { %v331_v32 = vld [vmem:[%s2984_s20 + $0xa] sm:$0xff]  ;;  %v3139_v34 = vld [vmem:[%s2984_s20 + $0x22] sm:$0xff]  ;;  %v3142_v35 = vld [vmem:[%s2984_s20 + $0x1a] sm:$0xff] }
  0x20   : > { %v3149_v36 = vld [vmem:[%s2984_s20 + $0x3a] sm:$0xff]  ;;  %v3152_v37 = vld [vmem:[%s2984_s20 + $0x32] sm:$0xff]  ;;  %v3162_v39 = vld [vmem:[%s2984_s20 + $0x4a] sm:$0xff] }
  0x21   : > { %v3159_v38 = vld [vmem:[%s2984_s20 + $0x52] sm:$0xff]  ;;  %v3169_v40 = vld [vmem:[%s2984_s20 + $0x6a] sm:$0xff]  ;;  %v3172_v41 = vld [vmem:[%s2984_s20 + $0x62] sm:$0xff] }
  0x22   : > { %283 = vrot.lane.b32.xlu1 %v3020_v9, %s2937_s21  ;;  %281 = vrot.lane.b32.xlu0 %v3023_v10, %s2937_s21  ;;  %v3179_v42 = vld [vmem:[%s2984_s20 + $0x82] sm:$0xff]  ;;  %v3182_v43 = vld [vmem:[%s2984_s20 + $0x7a] sm:$0xff] }
  0x23   : > { %v3189_v44 = vld [vmem:[%s2984_s20 + $0x9a] sm:$0xff]  ;;  %v3192_v45 = vld [vmem:[%s2984_s20 + $0x92] sm:$0xff]  ;;  %v3202_v47 = vld [vmem:[%s2984_s20 + $0xaa] sm:$0xff] }
  0x24   : > { %v3199_v46 = vld [vmem:[%s2984_s20 + $0xb2] sm:$0xff]  ;;  %v2504_v48 = vld [vmem:[%s2984_s20 + $0xc8] sm:$0xff]  ;;  %v3238_v49 = vld [vmem:[%s2984_s20 + $0xc0] sm:$0xff] }
  0x25   : > { %v3276_v54 = vld [vmem:[%s2984_s20 + $0xc9] sm:$0xff]  ;;  %v3279_v55 = vld [vmem:[%s2984_s20 + $0xc1] sm:$0xff] }
  0x26   : > { %287 = vrot.lane.b32.xlu1 %v3102_v25, %s2937_s21  ;;  %285 = vrot.lane.b32.xlu0 %v3105_v26, %s2937_s21 }
  0x2a   : > { %291 = vrot.lane.b32.xlu1 %v3115_v28, %s2937_s21  ;;  %289 = vrot.lane.b32.xlu0 %v3118_v29, %s2937_s21 }
  0x2e   : > { %295 = vrot.lane.b32.xlu1 %v3125_v30, %s2937_s21  ;;  %293 = vrot.lane.b32.xlu0 %v3128_v31, %s2937_s21 }
  0x32   : > { %364 = vrot.lane.b32.xlu1 %v331_v32, %s2938_s22  ;;  %362 = vrot.lane.b32.xlu0 %v330_v33, %s2938_s22  ;;  %v3330_v32 = vld [vmem:[%s2984_s20 + $0xca] sm:$0xff]  ;;  %v3333_v33 = vld [vmem:[%s2984_s20 + $0xc2] sm:$0xff] }
  0x36   : > { %368 = vrot.lane.b32.xlu1 %v3139_v34, %s2938_s22  ;;  %366 = vrot.lane.b32.xlu0 %v3142_v35, %s2938_s22 }
  0x3a   : > { %372 = vrot.lane.b32.xlu1 %v3149_v36, %s2938_s22  ;;  %370 = vrot.lane.b32.xlu0 %v3152_v37, %s2938_s22 }
  0x3e   : > { %376 = vrot.lane.b32.xlu1 %v3159_v38, %s2938_s22  ;;  %374 = vrot.lane.b32.xlu0 %v3162_v39, %s2938_s22 }
  0x42   : > { %380 = vrot.lane.b32.xlu1 %v3169_v40, %s2938_s22  ;;  %378 = vrot.lane.b32.xlu0 %v3172_v41, %s2938_s22 }
  0x46   : > { %384 = vrot.lane.b32.xlu1 %v3179_v42, %s2938_s22  ;;  %382 = vrot.lane.b32.xlu0 %v3182_v43, %s2938_s22 }
  0x4a   : > { %388 = vrot.lane.b32.xlu1 %v3189_v44, %s2938_s22  ;;  %386 = vrot.lane.b32.xlu0 %v3192_v45, %s2938_s22 }
  0x4e   : > { %392 = vrot.lane.b32.xlu1 %v3199_v46, %s2938_s22  ;;  %390 = vrot.lane.b32.xlu0 %v3202_v47, %s2938_s22 }
  0x52   : > { %464 = vrot.lane.b32.xlu1 %v3017_v8, %s2939_s23  ;;  %462 = vrot.lane.b32.xlu0 %v3026_v11, %s2939_s23 }
  0x56   : > { %468 = vrot.lane.b32.xlu1 %v3029_v12, %s2939_s23  ;;  %466 = vrot.lane.b32.xlu0 %v3032_v13, %s2939_s23 }
  0x5a   : > { %472 = vrot.lane.b32.xlu1 %v3041_v14, %s2939_s23  ;;  %470 = vrot.lane.b32.xlu0 %v3044_v15, %s2939_s23 }
  0x5e   : > { %476 = vrot.lane.b32.xlu1 %v3053_v16, %s2939_s23  ;;  %474 = vrot.lane.b32.xlu0 %v3056_v17, %s2939_s23 }
  0x62   : > { %480 = vrot.lane.b32.xlu1 %v3059_v18, %s2939_s23  ;;  %478 = vrot.lane.b32.xlu0 %v3066_v19, %s2939_s23 }
  0x66   : > { %484 = vrot.lane.b32.xlu1 %v3069_v20, %s2939_s23  ;;  %482 = vrot.lane.b32.xlu0 %v3072_v21, %s2939_s23 }
  0x6a   : > { %488 = vrot.lane.b32.xlu1 %v3081_v22, %s2939_s23  ;;  %486 = vrot.lane.b32.xlu0 %v3084_v23, %s2939_s23 }
  0x6e   : > { %492 = vrot.lane.b32.xlu1 %v2504_v48, %s2939_s23  ;;  %490 = vrot.lane.b32.xlu0 %v3238_v49, %s2939_s23 }
  0x72   : > { %561 = vrot.lane.b32.xlu1 %v2994_v2, %s2940_s24  ;;  %559 = vrot.lane.b32.xlu0 %v2987_v0, %s2940_s24 }
  0x76   : > { %565 = vrot.lane.b32.xlu1 %v3001_v4, %s2940_s24  ;;  %563 = vrot.lane.b32.xlu0 %v3004_v5, %s2940_s24 }
  0x7a   : > { %569 = vrot.lane.b32.xlu1 %v3011_v6, %s2940_s24  ;;  %567 = vrot.lane.b32.xlu0 %v3014_v7, %s2940_s24 }
  0x7e   : > { %573 = vrot.lane.b32.xlu1 %v3020_v9, %s2940_s24  ;;  %571 = vrot.lane.b32.xlu0 %v3023_v10, %s2940_s24 }
  0x82   : > { %577 = vrot.lane.b32.xlu1 %v3102_v25, %s2940_s24  ;;  %575 = vrot.lane.b32.xlu0 %v3105_v26, %s2940_s24 }
  0x84   : > { %v270_v50 = vpop.permute.xlu1 %269  ;;  %v266_v51 = vpop.permute.xlu0 %265 }
  0x85   : > { %316 = vst.msk [vmem:[#allocation2 + $0x10] sm:$0xff] %vm313_vm1, %v270_v50  ;;  %314 = vst.msk [vmem:[#allocation2] sm:$0xff] %vm313_vm1, %v266_v51 }
  0x86   : > { %581 = vrot.lane.b32.xlu1 %v3115_v28, %s2940_s24  ;;  %579 = vrot.lane.b32.xlu0 %v3118_v29, %s2940_s24 }
  0x88   : > { %v272_v52 = vpop.permute.xlu1 %271  ;;  %v268_v53 = vpop.permute.xlu0 %267 }
  0x89   : > { %317 = vst.msk [vmem:[#allocation2 + $0x18] sm:$0xff] %vm313_vm1, %v272_v52  ;;  %315 = vst.msk [vmem:[#allocation2 + $0x8] sm:$0xff] %vm313_vm1, %v268_v53 }
  0x8a   : > { %585 = vrot.lane.b32.xlu1 %v3125_v30, %s2940_s24  ;;  %583 = vrot.lane.b32.xlu0 %v3128_v31, %s2940_s24 }
  0x8c   : > { %v276_v56 = vpop.permute.xlu1 %275  ;;  %v274_v57 = vpop.permute.xlu0 %273 }
  0x8d   : > { %319 = vst.msk [vmem:[#allocation2 + $0x28] sm:$0xff] %vm313_vm1, %v276_v56  ;;  %318 = vst.msk [vmem:[#allocation2 + $0x20] sm:$0xff] %vm313_vm1, %v274_v57 }
  0x8e   : > { %589 = vrot.lane.b32.xlu1 %v3276_v54, %s2940_s24  ;;  %587 = vrot.lane.b32.xlu0 %v3279_v55, %s2940_s24 }
  0x90   : > { %v280_v58 = vpop.permute.xlu1 %279  ;;  %v278_v59 = vpop.permute.xlu0 %277 }
  0x91   : > { %321 = vst.msk [vmem:[#allocation2 + $0x38] sm:$0xff] %vm313_vm1, %v280_v58  ;;  %320 = vst.msk [vmem:[#allocation2 + $0x30] sm:$0xff] %vm313_vm1, %v278_v59  ;;  %v1033_v58 = vld [vmem:[%s4160_s1 + $0x10] sm:$0xff]  ;;  %v1034_v59 = vld [vmem:[%s4160_s1 + $0x18] sm:$0xff] }
  0x92   : > { %658 = vrot.lane.b32.xlu1 %v3139_v34, %s2941_s25  ;;  %656 = vrot.lane.b32.xlu0 %v3142_v35, %s2941_s25 }
  0x94   : > { %v284_v60 = vpop.permute.xlu1 %283  ;;  %v282_v61 = vpop.permute.xlu0 %281 }
  0x95   : > { %323 = vst.msk [vmem:[#allocation2 + $0x48] sm:$0xff] %vm313_vm1, %v284_v60  ;;  %322 = vst.msk [vmem:[#allocation2 + $0x40] sm:$0xff] %vm313_vm1, %v282_v61 }
  0x96   : > { %662 = vrot.lane.b32.xlu1 %v3149_v36, %s2941_s25  ;;  %660 = vrot.lane.b32.xlu0 %v3152_v37, %s2941_s25 }
  0x98   : > { %v288_v62 = vpop.permute.xlu1 %287  ;;  %v286_v63 = vpop.permute.xlu0 %285 }
  0x99   : > { %325 = vst.msk [vmem:[#allocation2 + $0x58] sm:$0xff] %vm313_vm1, %v288_v62  ;;  %324 = vst.msk [vmem:[#allocation2 + $0x50] sm:$0xff] %vm313_vm1, %v286_v63 }
  0x9a   : > { %666 = vrot.lane.b32.xlu1 %v3159_v38, %s2941_s25  ;;  %664 = vrot.lane.b32.xlu0 %v3162_v39, %s2941_s25 }
  0x9c   : > { %v292_v0 = vpop.permute.xlu1 %291  ;;  %v290_v1 = vpop.permute.xlu0 %289 }
  0x9d   : > { %327 = vst.msk [vmem:[#allocation2 + $0x68] sm:$0xff] %vm313_vm1, %v292_v0  ;;  %326 = vst.msk [vmem:[#allocation2 + $0x60] sm:$0xff] %vm313_vm1, %v290_v1 }
  0x9e   : > { %670 = vrot.lane.b32.xlu1 %v3169_v40, %s2941_s25  ;;  %668 = vrot.lane.b32.xlu0 %v3172_v41, %s2941_s25 }
  0xa0   : > { %v296_v2 = vpop.permute.xlu1 %295  ;;  %v294_v3 = vpop.permute.xlu0 %293 }
  0xa1   : > { %329 = vst.msk [vmem:[#allocation2 + $0x78] sm:$0xff] %vm313_vm1, %v296_v2  ;;  %328 = vst.msk [vmem:[#allocation2 + $0x70] sm:$0xff] %vm313_vm1, %v294_v3  ;;  %v3452_v2 = vld [vmem:[%s2984_s20 + $0xe0] sm:$0xff] }
  0xa2   : > { %674 = vrot.lane.b32.xlu1 %v3179_v42, %s2941_s25  ;;  %672 = vrot.lane.b32.xlu0 %v3182_v43, %s2941_s25 }
  0xa4   : > { %v365_v8 = vpop.permute.xlu1 %364  ;;  %v363_v11 = vpop.permute.xlu0 %362 }
  0xa5   : > { %412 = vst.msk [vmem:[#allocation2 + $0x8] sm:$0xff] %vm410_vm2, %v365_v8  ;;  %411 = vst.msk [vmem:[#allocation2] sm:$0xff] %vm410_vm2, %v363_v11 }
  0xa6   : > { %678 = vrot.lane.b32.xlu1 %v3189_v44, %s2941_s25  ;;  %676 = vrot.lane.b32.xlu0 %v3192_v45, %s2941_s25 }
  0xa8   : > { %v369_v24 = vpop.permute.xlu1 %368  ;;  %v367_v27 = vpop.permute.xlu0 %366 }
  0xa9   : > { %414 = vst.msk [vmem:[#allocation2 + $0x18] sm:$0xff] %vm410_vm2, %v369_v24  ;;  %413 = vst.msk [vmem:[#allocation2 + $0x10] sm:$0xff] %vm410_vm2, %v367_v27  ;;  %v3470_v24 = vld [vmem:[%s2984_s20 + $0xe1] sm:$0xff] }
  0xaa   : > { %682 = vrot.lane.b32.xlu1 %v3199_v46, %s2941_s25  ;;  %680 = vrot.lane.b32.xlu0 %v3202_v47, %s2941_s25 }
  0xac   : > { %v373_v34 = vpop.permute.xlu1 %372  ;;  %v371_v35 = vpop.permute.xlu0 %370 }
  0xad   : > { %416 = vst.msk [vmem:[#allocation2 + $0x28] sm:$0xff] %vm410_vm2, %v373_v34  ;;  %415 = vst.msk [vmem:[#allocation2 + $0x20] sm:$0xff] %vm410_vm2, %v371_v35 }
  0xae   : > { %686 = vrot.lane.b32.xlu1 %v3330_v32, %s2941_s25  ;;  %684 = vrot.lane.b32.xlu0 %v3333_v33, %s2941_s25 }
  0xb0   : > { %v377_v48 = vpop.permute.xlu1 %376  ;;  %v375_v50 = vpop.permute.xlu0 %374 }
  0xb1   : > { %418 = vst.msk [vmem:[#allocation2 + $0x38] sm:$0xff] %vm410_vm2, %v377_v48  ;;  %417 = vst.msk [vmem:[#allocation2 + $0x30] sm:$0xff] %vm410_vm2, %v375_v50  ;;  %v3488_v48 = vld [vmem:[%s2984_s20 + $0xe2] sm:$0xff] }
  0xb2   : > { %758 = vrot.lane.b32.xlu1 %v3029_v12, %s2942_s26  ;;  %756 = vrot.lane.b32.xlu0 %v3032_v13, %s2942_s26 }
  0xb4   : > { %v381_v51 = vpop.permute.xlu1 %380  ;;  %v379_v52 = vpop.permute.xlu0 %378 }
  0xb5   : > { %420 = vst.msk [vmem:[#allocation2 + $0x48] sm:$0xff] %vm410_vm2, %v381_v51  ;;  %419 = vst.msk [vmem:[#allocation2 + $0x40] sm:$0xff] %vm410_vm2, %v379_v52  ;;  %v3497_v52 = vld [vmem:[%s2984_s20 + $0xf0] sm:$0xff] }
  0xb6   : > { %762 = vrot.lane.b32.xlu1 %v3041_v14, %s2942_s26  ;;  %760 = vrot.lane.b32.xlu0 %v3044_v15, %s2942_s26  ;;  %v1031_v14 = vld [vmem:[%s4160_s1] sm:$0xff]  ;;  %v1032_v15 = vld [vmem:[%s4160_s1 + $0x8] sm:$0xff] }
  0xb7   : > { %v2896_v57 = vpack.c.bf16 %v1032_v15, %v1031_v14  ;;  %v2716_v14 = vld [vmem:[%s2984_s20 + $0xf1] sm:$0xff] }
  0xb8   : > { %v385_v53 = vpop.permute.xlu1 %384  ;;  %v383_v56 = vpop.permute.xlu0 %382  ;;  %v3513_v15 = vld [vmem:[%s2984_s20 + $0xf8] sm:$0xff] }
  0xb9   : > { %422 = vst.msk [vmem:[#allocation2 + $0x58] sm:$0xff] %vm410_vm2, %v385_v53  ;;  %421 = vst.msk [vmem:[#allocation2 + $0x50] sm:$0xff] %vm410_vm2, %v383_v56  ;;  %2897 = vmatprep.subr.bf16.mxu0 %v2896_v57  ;;  %2905 = vmatprep.subr.bf16.mxu1 %v2896_v57 }
  0xba   : > { %766 = vrot.lane.b32.xlu1 %v3053_v16, %s2942_s26  ;;  %764 = vrot.lane.b32.xlu0 %v3056_v17, %s2942_s26 }
  0xbb   : > { %2899 = vmatpush3.bf16.msra.mxu0 %v2896_v57  ;;  %2907 = vmatpush3.bf16.msra.mxu1 %v2896_v57 }
  0xbc   : > { %v389_v12 = vpop.permute.xlu1 %388  ;;  %v387_v13 = vpop.permute.xlu0 %386 }
  0xbd   : > { %424 = vst.msk [vmem:[#allocation2 + $0x68] sm:$0xff] %vm410_vm2, %v389_v12  ;;  %423 = vst.msk [vmem:[#allocation2 + $0x60] sm:$0xff] %vm410_vm2, %v387_v13 }
  0xbe   : > { %770 = vrot.lane.b32.xlu1 %v3059_v18, %s2942_s26  ;;  %768 = vrot.lane.b32.xlu0 %v3066_v19, %s2942_s26  ;;  %v2900_v18 = vpack.c.bf16 %v1034_v59, %v1033_v58 }
  0xc0   : > { %v393_v16 = vpop.permute.xlu1 %392  ;;  %v391_v17 = vpop.permute.xlu0 %390  ;;  %2901 = vmatprep.subr.bf16.mxu0 %v2900_v18  ;;  %2909 = vmatprep.subr.bf16.mxu1 %v2900_v18 }
  0xc1   : > { %426 = vst.msk [vmem:[#allocation2 + $0x78] sm:$0xff] %vm410_vm2, %v393_v16  ;;  %425 = vst.msk [vmem:[#allocation2 + $0x70] sm:$0xff] %vm410_vm2, %v391_v17  ;;  %2903 = vmatpush3.bf16.msra.mxu0 %v2900_v18  ;;  %2911 = vmatpush3.bf16.msra.mxu1 %v2900_v18  ;;  %v2732_v18 = vld [vmem:[%s2984_s20 + $0xf2] sm:$0xff] }
  0xc2   : > { %774 = vrot.lane.b32.xlu1 %v3069_v20, %s2942_s26  ;;  %772 = vrot.lane.b32.xlu0 %v3072_v21, %s2942_s26  ;;  %v1035_v20 = vld [vmem:[%s4160_s1 + $0x20] sm:$0xf] }
  0xc3   : > { %2836 = vmatprep.subr.msk.mxu0 %vm1085_vm4, %v1035_v20 }
  0xc4   : > { %v465_v19 = vpop.permute.xlu1 %464  ;;  %v463_v60 = vpop.permute.xlu0 %462 }
  0xc5   : > { %512 = vst.msk [vmem:[#allocation2 + $0x8] sm:$0xff] %vm510_vm3, %v465_v19  ;;  %511 = vst.msk [vmem:[#allocation2] sm:$0xff] %vm510_vm3, %v463_v60  ;;  %2837 = vmatpush3.msk.msra.mxu0 %vm1085_vm4, %v1035_v20  ;;  %v2717_v19 = vld [vmem:[%s2984_s20 + $0xf9] sm:$0xff] }
  0xc6   : > { %853 = vrot.lane.b32.xlu1 %v3004_v5, %s2943_s9  ;;  %776 = vrot.lane.b32.xlu0 %v3084_v23, %s2942_s26 }
  0xc8   : > { %v469_v21 = vpop.permute.xlu1 %468  ;;  %v467_v61 = vpop.permute.xlu0 %466 }
  0xc9   : > { %514 = vst.msk [vmem:[#allocation2 + $0x18] sm:$0xff] %vm510_vm3, %v469_v21  ;;  %513 = vst.msk [vmem:[#allocation2 + $0x10] sm:$0xff] %vm510_vm3, %v467_v61  ;;  %v2143_v21 = vld [vmem:[%s4160_s1 + $0x20] sm:$0xf] }
  0xca   : > { %950 = vrot.lane.b32.xlu1 %v3152_v37, %s2944_s12  ;;  %855 = vrot.lane.b32.xlu0 %v3001_v4, %s2943_s9 }
  0xcb   : > { %2870 = vmatprep.subr.msk.mxu1 %vm1085_vm4, %v2143_v21 }
  0xcc   : > { %v473_v5 = vpop.permute.xlu1 %472  ;;  %v471_v23 = vpop.permute.xlu0 %470  ;;  %2871 = vmatpush3.msk.msra.mxu1 %vm1085_vm4, %v2143_v21 }
  0xcd   : > { %516 = vst.msk [vmem:[#allocation2 + $0x28] sm:$0xff] %vm510_vm3, %v473_v5  ;;  %515 = vst.msk [vmem:[#allocation2 + $0x20] sm:$0xff] %vm510_vm3, %v471_v23 }
  0xce   : > { %857 = vrot.lane.b32.xlu1 %v3014_v7, %s2943_s9  ;;  %952 = vrot.lane.b32.xlu0 %v3149_v36, %s2944_s12 }
  0xd0   : > { %v477_v62 = vpop.permute.xlu1 %476  ;;  %v475_v63 = vpop.permute.xlu0 %474 }
  0xd1   : > { %518 = vst.msk [vmem:[#allocation2 + $0x38] sm:$0xff] %vm510_vm3, %v477_v62  ;;  %517 = vst.msk [vmem:[#allocation2 + $0x30] sm:$0xff] %vm510_vm3, %v475_v63 }
  0xd2   : > { %954 = vrot.lane.b32.xlu1 %v3162_v39, %s2944_s12  ;;  %859 = vrot.lane.b32.xlu0 %v3011_v6, %s2943_s9 }
  0xd4   : > { %v481_v4 = vpop.permute.xlu1 %480  ;;  %v479_v37 = vpop.permute.xlu0 %478 }
  0xd5   : > { %520 = vst.msk [vmem:[#allocation2 + $0x48] sm:$0xff] %vm510_vm3, %v481_v4  ;;  %519 = vst.msk [vmem:[#allocation2 + $0x40] sm:$0xff] %vm510_vm3, %v479_v37  ;;  %v3561_v37 = vld [vmem:[%s2984_s20 + $0x108] sm:$0xff] }
  0xd6   : > { %861 = vrot.lane.b32.xlu1 %v3023_v10, %s2943_s9  ;;  %956 = vrot.lane.b32.xlu0 %v3159_v38, %s2944_s12 }
  0xd8   : > { %v485_v7 = vpop.permute.xlu1 %484  ;;  %v483_v36 = vpop.permute.xlu0 %482 }
  0xd9   : > { %522 = vst.msk [vmem:[#allocation2 + $0x58] sm:$0xff] %vm510_vm3, %v485_v7  ;;  %521 = vst.msk [vmem:[#allocation2 + $0x50] sm:$0xff] %vm510_vm3, %v483_v36 }
  0xda   : > { %958 = vrot.lane.b32.xlu1 %v3172_v41, %s2944_s12  ;;  %863 = vrot.lane.b32.xlu0 %v3020_v9, %s2943_s9 }
  0xdc   : > { %v489_v6 = vpop.permute.xlu1 %488  ;;  %v487_v39 = vpop.permute.xlu0 %486 }
  0xdd   : > { %524 = vst.msk [vmem:[#allocation2 + $0x68] sm:$0xff] %vm510_vm3, %v489_v6  ;;  %523 = vst.msk [vmem:[#allocation2 + $0x60] sm:$0xff] %vm510_vm3, %v487_v39 }
  0xde   : > { %1381 = vrot.lane.b32.xlu1 %v3279_v55, %s2937_s21  ;;  %960 = vrot.lane.b32.xlu0 %v3169_v40, %s2944_s12  ;;  %v3443_v40 = vld [vmem:[%s2984_s20 + $0xd8] sm:$0xff] }
  0xe0   : > { %v493_v10 = vpop.permute.xlu1 %492  ;;  %v491_v38 = vpop.permute.xlu0 %490 }
  0xe1   : > { %526 = vst.msk [vmem:[#allocation2 + $0x78] sm:$0xff] %vm510_vm3, %v493_v10  ;;  %525 = vst.msk [vmem:[#allocation2 + $0x70] sm:$0xff] %vm510_vm3, %v491_v38  ;;  %v3575_v10 = vld [vmem:[%s2984_s20 + $0x110] sm:$0xff] }
  0xe2   : > { %1477 = vrot.lane.b32.xlu1 %v3333_v33, %s2938_s22  ;;  %1383 = vrot.lane.b32.xlu0 %v3276_v54, %s2937_s21 }
  0xe4   : > { %v562_v9 = vpop.permute.xlu1 %561  ;;  %v560_v41 = vpop.permute.xlu0 %559 }
  0xe5   : > { %609 = vst.msk [vmem:[#allocation2 + $0x8] sm:$0xff] %vm607_vm5, %v562_v9  ;;  %608 = vst.msk [vmem:[#allocation2] sm:$0xff] %vm607_vm5, %v560_v41 }
  0xe6   : > { %1479 = vrot.lane.b32.xlu1 %v3330_v32, %s2938_s22  ;;  %865 = vrot.lane.b32.xlu0 %v3105_v26, %s2943_s9 }
  0xe8   : > { %v566_v0 = vpop.permute.xlu1 %565  ;;  %v564_v1 = vpop.permute.xlu0 %563 }
  0xe9   : > { %611 = vst.msk [vmem:[#allocation2 + $0x18] sm:$0xff] %vm607_vm5, %v566_v0  ;;  %610 = vst.msk [vmem:[#allocation2 + $0x10] sm:$0xff] %vm607_vm5, %v564_v1 }
  0xea   : > { %867 = vrot.lane.b32.xlu1 %v3102_v25, %s2943_s9  ;;  %1576 = vrot.lane.b32.xlu0 %v3443_v40, %s2939_s23  ;;  %v3461_v25 = vld [vmem:[%s2984_s20 + $0xd9] sm:$0xff] }
  0xec   : > { %v570_v3 = vpop.permute.xlu1 %569  ;;  %v568_v8 = vpop.permute.xlu0 %567 }
  0xed   : > { %613 = vst.msk [vmem:[#allocation2 + $0x28] sm:$0xff] %vm607_vm5, %v570_v3  ;;  %612 = vst.msk [vmem:[#allocation2 + $0x20] sm:$0xff] %vm607_vm5, %v568_v8  ;;  %v2719_v3 = vld [vmem:[%s2984_s20 + $0x111] sm:$0xff] }
  0xee   : > { %1578 = vrot.lane.b32.xlu1 %v3452_v2, %s2939_s23  ;;  %962 = vrot.lane.b32.xlu0 %v3182_v43, %s2944_s12 }
  0xf0   : > { %v574_v26 = vpop.permute.xlu1 %573  ;;  %v572_v11 = vpop.permute.xlu0 %571 }
  0xf1   : > { %615 = vst.msk [vmem:[#allocation2 + $0x38] sm:$0xff] %vm607_vm5, %v574_v26  ;;  %614 = vst.msk [vmem:[#allocation2 + $0x30] sm:$0xff] %vm607_vm5, %v572_v11  ;;  %v2734_v26 = vld [vmem:[%s2984_s20 + $0x10a] sm:$0xff] }
  0xf2   : > { %964 = vrot.lane.b32.xlu1 %v3179_v42, %s2944_s12  ;;  %1672 = vrot.lane.b32.xlu0 %v3461_v25, %s2940_s24  ;;  %v3479_v42 = vld [vmem:[%s2984_s20 + $0xda] sm:$0xff] }
  0xf4   : > { %v578_v27 = vpop.permute.xlu1 %577  ;;  %v576_v34 = vpop.permute.xlu0 %575 }
  0xf5   : > { %617 = vst.msk [vmem:[#allocation2 + $0x48] sm:$0xff] %vm607_vm5, %v578_v27  ;;  %616 = vst.msk [vmem:[#allocation2 + $0x40] sm:$0xff] %vm607_vm5, %v576_v34 }
  0xf6   : > { %1674 = vrot.lane.b32.xlu1 %v3470_v24, %s2940_s24  ;;  %1385 = vrot.lane.b32.xlu0 %v3461_v25, %s2937_s21 }
  0xf8   : > { %v582_v43 = vpop.permute.xlu1 %581  ;;  %v580_v35 = vpop.permute.xlu0 %579 }
  0xf9   : > { %619 = vst.msk [vmem:[#allocation2 + $0x58] sm:$0xff] %vm607_vm5, %v582_v43  ;;  %618 = vst.msk [vmem:[#allocation2 + $0x50] sm:$0xff] %vm607_vm5, %v580_v35  ;;  %v2735_v35 = vld [vmem:[%s2984_s20 + $0x112] sm:$0xff] }
  0xfa   : > { %1387 = vrot.lane.b32.xlu1 %v3470_v24, %s2937_s21  ;;  %1768 = vrot.lane.b32.xlu0 %v3479_v42, %s2941_s25 }
  0xfc   : > { %v586_v50 = vpop.permute.xlu1 %585  ;;  %v584_v51 = vpop.permute.xlu0 %583 }
  0xfd   : > { %621 = vst.msk [vmem:[#allocation2 + $0x68] sm:$0xff] %vm607_vm5, %v586_v50  ;;  %620 = vst.msk [vmem:[#allocation2 + $0x60] sm:$0xff] %vm607_vm5, %v584_v51 }
  0xfe   : > { %1770 = vrot.lane.b32.xlu1 %v3488_v48, %s2941_s25  ;;  %1481 = vrot.lane.b32.xlu0 %v3479_v42, %s2938_s22 }
 0x100   : > { %v590_v53 = vpop.permute.xlu1 %589  ;;  %v588_v56 = vpop.permute.xlu0 %587 }
 0x101   : > { %623 = vst.msk [vmem:[#allocation2 + $0x78] sm:$0xff] %vm607_vm5, %v590_v53  ;;  %622 = vst.msk [vmem:[#allocation2 + $0x70] sm:$0xff] %vm607_vm5, %v588_v56 }
 0x102   : > { %869 = vrot.lane.b32.xlu1 %v3118_v29, %s2943_s9  ;;  %1867 = vrot.lane.b32.xlu0 %v3497_v52, %s2942_s26 }
 0x104   : > { %v659_v12 = vpop.permute.xlu1 %658  ;;  %v657_v13 = vpop.permute.xlu0 %656 }
 0x105   : > { %706 = vst.msk [vmem:[#allocation2 + $0x8] sm:$0xff] %vm704_vm6, %v659_v12  ;;  %705 = vst.msk [vmem:[#allocation2] sm:$0xff] %vm704_vm6, %v657_v13 }
 0x106   : > { %1580 = vrot.lane.b32.xlu1 %v3497_v52, %s2939_s23  ;;  %1483 = vrot.lane.b32.xlu0 %v3488_v48, %s2938_s22 }
 0x108   : > { %v663_v29 = vpop.permute.xlu1 %662  ;;  %v661_v57 = vpop.permute.xlu0 %660 }
 0x109   : > { %708 = vst.msk [vmem:[#allocation2 + $0x18] sm:$0xff] %vm704_vm6, %v663_v29  ;;  %707 = vst.msk [vmem:[#allocation2 + $0x10] sm:$0xff] %vm704_vm6, %v661_v57 }
 0x10a   : > { %1963 = vrot.lane.b32.xlu1 %v2716_v14, %s2943_s9  ;;  %1869 = vrot.lane.b32.xlu0 %v3513_v15, %s2942_s26 }
 0x10c   : > { %v667_v16 = vpop.permute.xlu1 %666  ;;  %v665_v17 = vpop.permute.xlu0 %664 }
 0x10d   : > { %710 = vst.msk [vmem:[#allocation2 + $0x28] sm:$0xff] %vm704_vm6, %v667_v16  ;;  %709 = vst.msk [vmem:[#allocation2 + $0x20] sm:$0xff] %vm704_vm6, %v665_v17  ;;  %v3637_v16 = vld [vmem:[%s2984_s20 + $0x120] sm:$0xff] }
 0x10e   : > { %966 = vrot.lane.b32.xlu1 %v3192_v45, %s2944_s12  ;;  %871 = vrot.lane.b32.xlu0 %v3115_v28, %s2943_s9 }
 0x110   : > { %v671_v58 = vpop.permute.xlu1 %670  ;;  %v669_v59 = vpop.permute.xlu0 %668 }
 0x111   : > { %712 = vst.msk [vmem:[#allocation2 + $0x38] sm:$0xff] %vm704_vm6, %v671_v58  ;;  %711 = vst.msk [vmem:[#allocation2 + $0x30] sm:$0xff] %vm704_vm6, %v669_v59 }
 0x112   : > { %1676 = vrot.lane.b32.xlu1 %v2716_v14, %s2940_s24  ;;  %1582 = vrot.lane.b32.xlu0 %v3513_v15, %s2939_s23 }
 0x114   : > { %v675_v60 = vpop.permute.xlu1 %674  ;;  %v673_v20 = vpop.permute.xlu0 %672 }
 0x115   : > { %714 = vst.msk [vmem:[#allocation2 + $0x48] sm:$0xff] %vm704_vm6, %v675_v60  ;;  %713 = vst.msk [vmem:[#allocation2 + $0x40] sm:$0xff] %vm704_vm6, %v673_v20 }
 0x116   : > { %2059 = vrot.lane.b32.xlu1 %v2732_v18, %s2944_s12  ;;  %1965 = vrot.lane.b32.xlu0 %v2717_v19, %s2943_s9 }
 0x118   : > { %v679_v28 = vpop.permute.xlu1 %678  ;;  %v677_v45 = vpop.permute.xlu0 %676 }
 0x119   : > { %716 = vst.msk [vmem:[#allocation2 + $0x58] sm:$0xff] %vm704_vm6, %v679_v28  ;;  %715 = vst.msk [vmem:[#allocation2 + $0x50] sm:$0xff] %vm704_vm6, %v677_v45 }
 0x11a   : > { %1389 = vrot.lane.b32.xlu1 %v2716_v14, %s2937_s21  ;;  %968 = vrot.lane.b32.xlu0 %v3189_v44, %s2944_s12  ;;  %v2733_v44 = vld [vmem:[%s2984_s20 + $0xfa] sm:$0xff] }
 0x11c   : > { %v683_v61 = vpop.permute.xlu1 %682  ;;  %v681_v5 = vpop.permute.xlu0 %680 }
 0x11d   : > { %718 = vst.msk [vmem:[#allocation2 + $0x68] sm:$0xff] %vm704_vm6, %v683_v61  ;;  %717 = vst.msk [vmem:[#allocation2 + $0x60] sm:$0xff] %vm704_vm6, %v681_v5  ;;  %v2721_v61 = vld [vmem:[%s2984_s20 + $0x129] sm:$0xff] }
 0x11e   : > { %1772 = vrot.lane.b32.xlu1 %v2732_v18, %s2941_s25  ;;  %1678 = vrot.lane.b32.xlu0 %v2717_v19, %s2940_s24 }
 0x120   : > { %v687_v23 = vpop.permute.xlu1 %686  ;;  %v685_v62 = vpop.permute.xlu0 %684 }
 0x121   : > { %720 = vst.msk [vmem:[#allocation2 + $0x78] sm:$0xff] %vm704_vm6, %v687_v23  ;;  %719 = vst.msk [vmem:[#allocation2 + $0x70] sm:$0xff] %vm704_vm6, %v685_v62 }
 0x122   : > { %1391 = vrot.lane.b32.xlu1 %v2717_v19, %s2937_s21  ;;  %2061 = vrot.lane.b32.xlu0 %v2733_v44, %s2944_s12 }
 0x124   : > { %v759_v63 = vpop.permute.xlu1 %758  ;;  %v757_v4 = vpop.permute.xlu0 %756 }
 0x125   : > { %806 = vst.msk [vmem:[#allocation2 + $0x8] sm:$0xff] %vm804_vm7, %v759_v63  ;;  %805 = vst.msk [vmem:[#allocation2] sm:$0xff] %vm804_vm7, %v757_v4 }
 0x126   : > { %1774 = vrot.lane.b32.xlu1 %v2733_v44, %s2941_s25  ;;  %1485 = vrot.lane.b32.xlu0 %v2732_v18, %s2938_s22 }
 0x128   : > { %v763_v7 = vpop.permute.xlu1 %762  ;;  %v761_v36 = vpop.permute.xlu0 %760 }
 0x129   : > { %808 = vst.msk [vmem:[#allocation2 + $0x18] sm:$0xff] %vm804_vm7, %v763_v7  ;;  %807 = vst.msk [vmem:[#allocation2 + $0x10] sm:$0xff] %vm804_vm7, %v761_v36  ;;  %v2737_v7 = vld [vmem:[%s2984_s20 + $0x12a] sm:$0xff] }
 0x12a   : > { %778 = vrot.lane.b32.xlu1 %v3081_v22, %s2942_s26  ;;  %1871 = vrot.lane.b32.xlu0 %v3561_v37, %s2942_s26  ;;  %v2718_v22 = vld [vmem:[%s2984_s20 + $0x109] sm:$0xff] }
 0x12c   : > { %v767_v6 = vpop.permute.xlu1 %766  ;;  %v765_v39 = vpop.permute.xlu0 %764 }
 0x12d   : > { %810 = vst.msk [vmem:[#allocation2 + $0x28] sm:$0xff] %vm804_vm7, %v767_v6  ;;  %809 = vst.msk [vmem:[#allocation2 + $0x20] sm:$0xff] %vm804_vm7, %v765_v39 }
 0x12e   : > { %1487 = vrot.lane.b32.xlu1 %v2733_v44, %s2938_s22  ;;  %873 = vrot.lane.b32.xlu0 %v3128_v31, %s2943_s9 }
 0x130   : > { %v771_v38 = vpop.permute.xlu1 %770  ;;  %v769_v9 = vpop.permute.xlu0 %768 }
 0x131   : > { %812 = vst.msk [vmem:[#allocation2 + $0x38] sm:$0xff] %vm804_vm7, %v771_v38  ;;  %811 = vst.msk [vmem:[#allocation2 + $0x30] sm:$0xff] %vm804_vm7, %v769_v9  ;;  %v3712_v9 = vld [vmem:[%s2984_s20 + $0x138] sm:$0xff] }
 0x132   : > { %1873 = vrot.lane.b32.xlu1 %v3575_v10, %s2942_s26  ;;  %1584 = vrot.lane.b32.xlu0 %v3561_v37, %s2939_s23 }
 0x134   : > { %v775_v41 = vpop.permute.xlu1 %774  ;;  %v773_v0 = vpop.permute.xlu0 %772 }
 0x135   : > { %814 = vst.msk [vmem:[#allocation2 + $0x48] sm:$0xff] %vm804_vm7, %v775_v41  ;;  %813 = vst.msk [vmem:[#allocation2 + $0x40] sm:$0xff] %vm804_vm7, %v773_v0 }
 0x136   : > { %875 = vrot.lane.b32.xlu1 %v3125_v30, %s2943_s9  ;;  %1967 = vrot.lane.b32.xlu0 %v2718_v22, %s2943_s9 }
 0x138   : > { %v854_v31 = vpop.permute.xlu1 %853  ;;  %v777_v1 = vpop.permute.xlu0 %776 }
 0x139   : > { %902 = vst.msk [vmem:[#allocation2] sm:$0xff] %vm901_vm8, %v854_v31  ;;  %v3726_v31 = vld [vmem:[%s2984_s20 + $0x140] sm:$0xff] }
 0x13a   : > { %815 = vst.msk [vmem:[#allocation2 + $0x50] sm:$0xff] %vm804_vm7, %v777_v1  ;;  %1586 = vrot.lane.b32.xlu1 %v3575_v10, %s2939_s23  ;;  %970 = vrot.lane.b32.xlu0 %v3202_v47, %s2944_s12 }
 0x13c   : > { %v951_v8 = vpop.permute.xlu1 %950  ;;  %v856_v30 = vpop.permute.xlu0 %855 }
 0x13d   : > { %999 = vst.msk [vmem:[#allocation2] sm:$0xff] %vm998_vm9, %v951_v8 }
 0x13e   : > { %903 = vst.msk [vmem:[#allocation2 + $0x8] sm:$0xff] %vm901_vm8, %v856_v30  ;;  %1969 = vrot.lane.b32.xlu1 %v2719_v3, %s2943_s9  ;;  %1680 = vrot.lane.b32.xlu0 %v2718_v22, %s2940_s24 }
 0x140   : > { %v858_v11 = vpop.permute.xlu1 %857  ;;  %v953_v27 = vpop.permute.xlu0 %952 }
 0x141   : > { %904 = vst.msk [vmem:[#allocation2 + $0x10] sm:$0xff] %vm901_vm8, %v858_v11 }
 0x142   : > { %1000 = vst.msk [vmem:[#allocation2 + $0x8] sm:$0xff] %vm998_vm9, %v953_v27  ;;  %972 = vrot.lane.b32.xlu1 %v3199_v46, %s2944_s12  ;;  %2063 = vrot.lane.b32.xlu0 %v2734_v26, %s2944_s12  ;;  %v2605_v46 = vld [vmem:[%s2984_s20 + $0xc8] sm:$0xff] }
 0x144   : > { %v955_v47 = vpop.permute.xlu1 %954  ;;  %v860_v34 = vpop.permute.xlu0 %859  ;;  %v1015_v43 = vld [vmem:[#allocation2] sm:$0xff] }
 0x145   : > { %1001 = vst.msk [vmem:[#allocation2 + $0x10] sm:$0xff] %vm998_vm9, %v955_v47  ;;  %2838 = vmatprep.mubr.msk.f32.mxu0 %vm1036_vm10, %v1015_v43  ;;  %v2723_v47 = vld [vmem:[%s2984_s20 + $0x141] sm:$0xff] }
 0x146   : > { %905 = vst.msk [vmem:[#allocation2 + $0x18] sm:$0xff] %vm901_vm8, %v860_v34  ;;  %1682 = vrot.lane.b32.xlu1 %v2719_v3, %s2940_s24  ;;  %1393 = vrot.lane.b32.xlu0 %v2718_v22, %s2937_s21 }
 0x147   : > { %1333 = vst.msk [vmem:[#allocation2] sm:$0xff] %vm216_vm0, %v3238_v49 }
 0x148   : > { %v862_v50 = vpop.permute.xlu1 %861  ;;  %v957_v51 = vpop.permute.xlu0 %956 }
 0x149   : > { %v1016_v53 = vld [vmem:[#allocation2 + $0x8] sm:$0xff]  ;;  %906 = vst.msk [vmem:[#allocation2 + $0x20] sm:$0xff] %vm901_vm8, %v862_v50 }
 0x14a   : > { %1002 = vst.msk [vmem:[#allocation2 + $0x18] sm:$0xff] %vm998_vm9, %v957_v51  ;;  %2839 = vmatmul.mubr.msk.f32.vlgmr.msra.gmra.mrb[0].mxu0 %vm1036_vm10, %v1016_v53  ;;  %2065 = vrot.lane.b32.xlu1 %v2735_v35, %s2944_s12 }
 0x14b   : > { %1334 = vst.msk [vmem:[#allocation2 + $0x8] sm:$0xff] %vm216_vm0, %v2605_v46  ;;  %1776 = vrot.lane.b32.xlu0 %v2734_v26, %s2941_s25 }
 0x14c   : > { %v959_v56 = vpop.permute.xlu1 %958  ;;  %v864_v12 = vpop.permute.xlu0 %863  ;;  %v1017_v13 = vld [vmem:[#allocation2 + $0x10] sm:$0xff] }
 0x14d   : > { %1003 = vst.msk [vmem:[#allocation2 + $0x20] sm:$0xff] %vm998_vm9, %v959_v56  ;;  %2841 = vmatprep.mubr.msk.f32.mxu0 %vm1036_vm10, %v1017_v13  ;;  %v2739_v56 = vld [vmem:[%s2984_s20 + $0x142] sm:$0xff] }
 0x14e   : > { %907 = vst.msk [vmem:[#allocation2 + $0x28] sm:$0xff] %vm901_vm8, %v864_v12  ;;  %1395 = vrot.lane.b32.xlu1 %v2719_v3, %s2937_s21 }
 0x14f   : > { %1335 = vst.msk [vmem:[#allocation2 + $0x10] sm:$0xff] %vm216_vm0, %v3443_v40  ;;  %780 = vrot.lane.b32.xlu0 %v3238_v49, %s2942_s26 }
 0x150   : > { %v1382_v14 = vpop.permute.xlu1 %1381  ;;  %v961_v29 = vpop.permute.xlu0 %960 }
 0x151   : > { %v1018_v57 = vld [vmem:[#allocation2 + $0x18] sm:$0xff]  ;;  %1429 = vst.msk [vmem:[#allocation2] sm:$0xff] %vm313_vm1, %v1382_v14 }
 0x152   : > { %1004 = vst.msk [vmem:[#allocation2 + $0x28] sm:$0xff] %vm998_vm9, %v961_v29  ;;  %2842 = vmatmul.mubr.msk.f32.gmra.mrb[2].mxu0 %vm1036_vm10, %v1018_v57  ;;  %1778 = vrot.lane.b32.xlu1 %v2735_v35, %s2941_s25  ;;  %v3779_v29 = vld [vmem:[%s2984_s20 + $0x150] sm:$0xff] }
 0x153   : > { %1336 = vst.msk [vmem:[#allocation2 + $0x18] sm:$0xff] %vm216_vm0, %v3452_v2  ;;  %1489 = vrot.lane.b32.xlu0 %v2734_v26, %s2938_s22 }
 0x154   : > { %v1478_v17 = vpop.permute.xlu1 %1477  ;;  %v1384_v49 = vpop.permute.xlu0 %1383  ;;  %v1019_v58 = vld [vmem:[#allocation2 + $0x20] sm:$0xff] }
 0x155   : > { %1525 = vst.msk [vmem:[#allocation2] sm:$0xff] %vm410_vm2, %v1478_v17  ;;  %2844 = vmatprep.mubr.msk.f32.mxu0 %vm1036_vm10, %v1019_v58  ;;  %v2724_v58 = vld [vmem:[%s2984_s20 + $0x151] sm:$0xff] }
 0x156   : > { %1430 = vst.msk [vmem:[#allocation2 + $0x8] sm:$0xff] %vm313_vm1, %v1384_v49  ;;  %782 = vrot.lane.b32.xlu1 %v2605_v46, %s2942_s26  ;;  %v2738_v46 = vld [vmem:[%s2984_s20 + $0x13a] sm:$0xff] }
 0x157   : > { %1337 = vst.msk [vmem:[#allocation2 + $0x20] sm:$0xff] %vm216_vm0, %v3497_v52  ;;  %1875 = vrot.lane.b32.xlu0 %v3637_v16, %s2942_s26  ;;  %v3656_v52 = vld [vmem:[%s2984_s20 + $0x128] sm:$0xff] }
 0x158   : > { %v1480_v59 = vpop.permute.xlu1 %1479  ;;  %v866_v18 = vpop.permute.xlu0 %865 }
 0x159   : > { %v1020_v19 = vld [vmem:[#allocation2 + $0x28] sm:$0xff]  ;;  %1526 = vst.msk [vmem:[#allocation2 + $0x8] sm:$0xff] %vm410_vm2, %v1480_v59  ;;  %v3793_v59 = vld [vmem:[%s2984_s20 + $0x158] sm:$0xff] }
 0x15a   : > { %908 = vst.msk [vmem:[#allocation2 + $0x30] sm:$0xff] %vm901_vm8, %v866_v18  ;;  %2845 = vmatmul.mubr.msk.f32.gmra.mrb[4].mxu0 %vm1036_vm10, %v1020_v19  ;;  %1491 = vrot.lane.b32.xlu1 %v2735_v35, %s2938_s22 }
 0x15b   : > { %1338 = vst.msk [vmem:[#allocation2 + $0x28] sm:$0xff] %vm216_vm0, %v3513_v15  ;;  %877 = vrot.lane.b32.xlu0 %v3279_v55, %s2943_s9  ;;  %v2720_v15 = vld [vmem:[%s2984_s20 + $0x121] sm:$0xff] }
 0x15c   : > { %v868_v60 = vpop.permute.xlu1 %867  ;;  %v1577_v20 = vpop.permute.xlu0 %1576 }
 0x15d   : > { %909 = vst.msk [vmem:[#allocation2 + $0x38] sm:$0xff] %vm901_vm8, %v868_v60 }
 0x15e   : > { %1624 = vst.msk [vmem:[#allocation2] sm:$0xff] %vm510_vm3, %v1577_v20  ;;  %1877 = vrot.lane.b32.xlu1 %v3656_v52, %s2942_s26 }
 0x15f   : > { %1588 = vrot.lane.b32.xlu0 %v3637_v16, %s2939_s23 }
 0x160   : > { %v1579_v28 = vpop.permute.xlu1 %1578  ;;  %v963_v45 = vpop.permute.xlu0 %962 }
 0x161   : > { %1625 = vst.msk [vmem:[#allocation2 + $0x8] sm:$0xff] %vm510_vm3, %v1579_v28  ;;  %v2725_v28 = vld [vmem:[%s2984_s20 + $0x159] sm:$0xff] }
 0x162   : > { %1005 = vst.msk [vmem:[#allocation2 + $0x30] sm:$0xff] %vm998_vm9, %v963_v45  ;;  %879 = vrot.lane.b32.xlu1 %v3276_v54, %s2943_s9  ;;  %v2736_v54 = vld [vmem:[%s2984_s20 + $0x122] sm:$0xff] }
 0x163   : > { %1971 = vrot.lane.b32.xlu0 %v2720_v15, %s2943_s9 }
 0x164   : > { %v965_v55 = vpop.permute.xlu1 %964  ;;  %v1673_v21 = vpop.permute.xlu0 %1672 }
 0x165   : > { %1006 = vst.msk [vmem:[#allocation2 + $0x38] sm:$0xff] %vm998_vm9, %v965_v55 }
 0x166   : > { %1720 = vst.msk [vmem:[#allocation2] sm:$0xff] %vm607_vm5, %v1673_v21  ;;  %1590 = vrot.lane.b32.xlu1 %v3656_v52, %s2939_s23 }
 0x167   : > { %974 = vrot.lane.b32.xlu0 %v3333_v33, %s2944_s12 }
 0x168   : > { %v1675_v5 = vpop.permute.xlu1 %1674  ;;  %v1386_v44 = vpop.permute.xlu0 %1385 }
 0x169   : > { %v1021_v23 = vld [vmem:[#allocation2 + $0x30] sm:$0xff]  ;;  %1721 = vst.msk [vmem:[#allocation2 + $0x8] sm:$0xff] %vm607_vm5, %v1675_v5 }
 0x16a   : > { %1431 = vst.msk [vmem:[#allocation2 + $0x10] sm:$0xff] %vm313_vm1, %v1386_v44  ;;  %2847 = vmatprep.mubr.msk.f32.mxu0 %vm1036_vm10, %v1021_v23  ;;  %1973 = vrot.lane.b32.xlu1 %v2721_v61, %s2943_s9  ;;  %v2741_v23 = vld [vmem:[%s2984_s20 + $0x15a] sm:$0xff] }
 0x16b   : > { %1339 = vst.msk [vmem:[#allocation2 + $0x30] sm:$0xff] %vm216_vm0, %v3561_v37  ;;  %1684 = vrot.lane.b32.xlu0 %v2720_v15, %s2940_s24 }
 0x16c   : > { %v1388_v33 = vpop.permute.xlu1 %1387  ;;  %v1769_v62 = vpop.permute.xlu0 %1768  ;;  %v1022_v63 = vld [vmem:[#allocation2 + $0x38] sm:$0xff] }
 0x16d   : > { %1432 = vst.msk [vmem:[#allocation2 + $0x18] sm:$0xff] %vm313_vm1, %v1388_v33  ;;  %2848 = vmatmul.mubr.msk.f32.gmra.mrb[6].mxu0 %vm1036_vm10, %v1022_v63 }
 0x16e   : > { %1816 = vst.msk [vmem:[#allocation2] sm:$0xff] %vm704_vm6, %v1769_v62  ;;  %976 = vrot.lane.b32.xlu1 %v3330_v32, %s2944_s12 }
 0x16f   : > { %1340 = vst.msk [vmem:[#allocation2 + $0x38] sm:$0xff] %vm216_vm0, %v3575_v10  ;;  %2067 = vrot.lane.b32.xlu0 %v2736_v54, %s2944_s12 }
 0x170   : > { %v1771_v4 = vpop.permute.xlu1 %1770  ;;  %v1482_v37 = vpop.permute.xlu0 %1481 }
 0x171   : > { %1817 = vst.msk [vmem:[#allocation2 + $0x8] sm:$0xff] %vm704_vm6, %v1771_v4 }
 0x172   : > { %1527 = vst.msk [vmem:[#allocation2 + $0x10] sm:$0xff] %vm410_vm2, %v1482_v37  ;;  %1686 = vrot.lane.b32.xlu1 %v2721_v61, %s2940_s24  ;;  %v3833_v37 = vld [vmem:[%s2984_s20 + $0x168] sm:$0xff] }
 0x173   : > { %1397 = vrot.lane.b32.xlu0 %v2720_v15, %s2937_s21  ;;  %v2740_v15 = vld [vmem:[%s2984_s20 + $0x152] sm:$0xff] }
 0x174   : > { %v870_v36 = vpop.permute.xlu1 %869  ;;  %v1868_v6 = vpop.permute.xlu0 %1867 }
 0x175   : > { %910 = vst.msk [vmem:[#allocation2 + $0x40] sm:$0xff] %vm901_vm8, %v870_v36 }
 0x176   : > { %1915 = vst.msk [vmem:[#allocation2] sm:$0xff] %vm804_vm7, %v1868_v6  ;;  %2069 = vrot.lane.b32.xlu1 %v2737_v7, %s2944_s12 }
 0x177   : > { %1780 = vrot.lane.b32.xlu0 %v2736_v54, %s2941_s25 }
 0x178   : > { %v1581_v32 = vpop.permute.xlu1 %1580  ;;  %v1484_v39 = vpop.permute.xlu0 %1483 }
 0x179   : > { %1626 = vst.msk [vmem:[#allocation2 + $0x10] sm:$0xff] %vm510_vm3, %v1581_v32 }
 0x17a   : > { %1528 = vst.msk [vmem:[#allocation2 + $0x18] sm:$0xff] %vm410_vm2, %v1484_v39  ;;  %1399 = vrot.lane.b32.xlu1 %v2721_v61, %s2937_s21  ;;  %v2726_v39 = vld [vmem:[%s2984_s20 + $0x169] sm:$0xff] }
 0x17b   : > { %784 = vrot.lane.b32.xlu0 %v3443_v40, %s2942_s26 }
 0x17c   : > { %v1964_v10 = vpop.permute.xlu1 %1963  ;;  %v1870_v38 = vpop.permute.xlu0 %1869 }
 0x17d   : > { %2011 = vst.msk [vmem:[#allocation2] sm:$0xff] %vm901_vm8, %v1964_v10  ;;  %v3847_v10 = vld [vmem:[%s2984_s20 + $0x170] sm:$0xff] }
 0x17e   : > { %1916 = vst.msk [vmem:[#allocation2 + $0x8] sm:$0xff] %vm804_vm7, %v1870_v38  ;;  %1782 = vrot.lane.b32.xlu1 %v2737_v7, %s2941_s25 }
 0x17f   : > { %1493 = vrot.lane.b32.xlu0 %v2736_v54, %s2938_s22 }
 0x180   : > { %v967_v22 = vpop.permute.xlu1 %966  ;;  %v872_v41 = vpop.permute.xlu0 %871 }
 0x181   : > { %1007 = vst.msk [vmem:[#allocation2 + $0x40] sm:$0xff] %vm998_vm9, %v967_v22 }
 0x182   : > { %911 = vst.msk [vmem:[#allocation2 + $0x48] sm:$0xff] %vm901_vm8, %v872_v41  ;;  %786 = vrot.lane.b32.xlu1 %v3452_v2, %s2942_s26 }
 0x183   : > { %1879 = vrot.lane.b32.xlu0 %v3712_v9, %s2942_s26 }
 0x184   : > { %v1677_v40 = vpop.permute.xlu1 %1676  ;;  %v1583_v0 = vpop.permute.xlu0 %1582 }
 0x185   : > { %1722 = vst.msk [vmem:[#allocation2 + $0x10] sm:$0xff] %vm607_vm5, %v1677_v40  ;;  %v2742_v40 = vld [vmem:[%s2984_s20 + $0x16a] sm:$0xff] }
 0x186   : > { %1627 = vst.msk [vmem:[#allocation2 + $0x18] sm:$0xff] %vm510_vm3, %v1583_v0  ;;  %1495 = vrot.lane.b32.xlu1 %v2737_v7, %s2938_s22  ;;  %v2727_v0 = vld [vmem:[%s2984_s20 + $0x171] sm:$0xff] }
 0x187   : > { %881 = vrot.lane.b32.xlu0 %v3461_v25, %s2943_s9  ;;  %v2722_v25 = vld [vmem:[%s2984_s20 + $0x139] sm:$0xff] }
 0x188   : > { %v2060_v1 = vpop.permute.xlu1 %2059  ;;  %v1966_v3 = vpop.permute.xlu0 %1965  ;;  %v1023_v2 = vld [vmem:[#allocation2 + $0x40] sm:$0xff] }
 0x189   : > { %2107 = vst.msk [vmem:[#allocation2] sm:$0xff] %vm998_vm9, %v2060_v1  ;;  %2850 = vmatprep.mubr.msk.f32.mxu0 %vm1036_vm10, %v1023_v2 }
 0x18a   : > { %2012 = vst.msk [vmem:[#allocation2 + $0x8] sm:$0xff] %vm901_vm8, %v1966_v3  ;;  %1881 = vrot.lane.b32.xlu1 %v3726_v31, %s2942_s26 }
 0x18b   : > { %1341 = vst.msk [vmem:[#allocation2 + $0x40] sm:$0xff] %vm216_vm0, %v3637_v16  ;;  %1592 = vrot.lane.b32.xlu0 %v3712_v9, %s2939_s23 }
 0x18c   : > { %v1390_v8 = vpop.permute.xlu1 %1389  ;;  %v969_v30 = vpop.permute.xlu0 %968 }
 0x18d   : > { %1433 = vst.msk [vmem:[#allocation2 + $0x20] sm:$0xff] %vm313_vm1, %v1390_v8 }
 0x18e   : > { %1008 = vst.msk [vmem:[#allocation2 + $0x48] sm:$0xff] %vm998_vm9, %v969_v30  ;;  %883 = vrot.lane.b32.xlu1 %v3470_v24, %s2943_s9 }
 0x18f   : > { %1975 = vrot.lane.b32.xlu0 %v2722_v25, %s2943_s9 }
 0x190   : > { %v1773_v26 = vpop.permute.xlu1 %1772  ;;  %v1679_v11 = vpop.permute.xlu0 %1678  ;;  %v2123_v27 = vld [vmem:[#allocation2] sm:$0xff] }
 0x191   : > { %1818 = vst.msk [vmem:[#allocation2 + $0x10] sm:$0xff] %vm704_vm6, %v1773_v26  ;;  %2872 = vmatprep.mubr.msk.f32.mxu1 %vm1036_vm10, %v2123_v27 }
 0x192   : > { %1723 = vst.msk [vmem:[#allocation2 + $0x18] sm:$0xff] %vm607_vm5, %v1679_v11  ;;  %1594 = vrot.lane.b32.xlu1 %v3726_v31, %s2939_s23 }
 0x193   : > { %978 = vrot.lane.b32.xlu0 %v3479_v42, %s2944_s12 }
 0x194   : > { %v1392_v24 = vpop.permute.xlu1 %1391  ;;  %v2062_v34 = vpop.permute.xlu0 %2061 }
 0x195   : > { %v1024_v43 = vld [vmem:[#allocation2 + $0x48] sm:$0xff]  ;;  %1434 = vst.msk [vmem:[#allocation2 + $0x28] sm:$0xff] %vm313_vm1, %v1392_v24 }
 0x196   : > { %2108 = vst.msk [vmem:[#allocation2 + $0x8] sm:$0xff] %vm998_vm9, %v2062_v34  ;;  %2851 = vmatmul.mubr.msk.f32.gmra.mrb[8].mxu0 %vm1036_vm10, %v1024_v43  ;;  %1977 = vrot.lane.b32.xlu1 %v2723_v47, %s2943_s9 }
 0x197   : > { %1342 = vst.msk [vmem:[#allocation2 + $0x48] sm:$0xff] %vm216_vm0, %v3656_v52  ;;  %1688 = vrot.lane.b32.xlu0 %v2722_v25, %s2940_s24 }
 0x198   : > { %v1775_v42 = vpop.permute.xlu1 %1774  ;;  %v1486_v35 = vpop.permute.xlu0 %1485 }
 0x199   : > { %1819 = vst.msk [vmem:[#allocation2 + $0x18] sm:$0xff] %vm704_vm6, %v1775_v42 }
 0x19a   : > { %1529 = vst.msk [vmem:[#allocation2 + $0x20] sm:$0xff] %vm410_vm2, %v1486_v35  ;;  %980 = vrot.lane.b32.xlu1 %v3488_v48, %s2944_s12 }
 0x19b   : > { %2071 = vrot.lane.b32.xlu0 %v2738_v46, %s2944_s12 }
 0x19c   : > { %v779_v50 = vpop.permute.xlu1 %778  ;;  %v1872_v51 = vpop.permute.xlu0 %1871 }
 0x19d   : > { %v2124_v53 = vld [vmem:[#allocation2 + $0x8] sm:$0xff]  ;;  %816 = vst.msk [vmem:[#allocation2 + $0x58] sm:$0xff] %vm804_vm7, %v779_v50  ;;  %1917 = vst.msk [vmem:[#allocation2 + $0x10] sm:$0xff] %vm804_vm7, %v1872_v51 }
 0x19e   : > { %2873 = vmatmul.mubr.msk.f32.vlgmr.msra.gmra.mrb[0].mxu1 %vm1036_vm10, %v2124_v53  ;;  %1690 = vrot.lane.b32.xlu1 %v2723_v47, %s2940_s24  ;;  %v2713_v50 = vld [vmem:[%s2984_s20 + $0x188] sm:$0xff] }
 0x19f   : > { %1401 = vrot.lane.b32.xlu0 %v2722_v25, %s2937_s21  ;;  %v2743_v25 = vld [vmem:[%s2984_s20 + $0x172] sm:$0xff]  ;;  %v2728_v51 = vld [vmem:[%s2984_s20 + $0x181] sm:$0xff] }
 0x1a0   : > { %v1488_v12 = vpop.permute.xlu1 %1487  ;;  %v874_v13 = vpop.permute.xlu0 %873 }
 0x1a1   : > { %1530 = vst.msk [vmem:[#allocation2 + $0x28] sm:$0xff] %vm410_vm2, %v1488_v12 }
 0x1a2   : > { %912 = vst.msk [vmem:[#allocation2 + $0x50] sm:$0xff] %vm901_vm8, %v874_v13  ;;  %2073 = vrot.lane.b32.xlu1 %v2739_v56, %s2944_s12 }
 0x1a3   : > { %1784 = vrot.lane.b32.xlu0 %v2738_v46, %s2941_s25 }
 0x1a4   : > { %v1874_v48 = vpop.permute.xlu1 %1873  ;;  %v1585_v14 = vpop.permute.xlu0 %1584 }
 0x1a5   : > { %1918 = vst.msk [vmem:[#allocation2 + $0x18] sm:$0xff] %vm804_vm7, %v1874_v48 }
 0x1a6   : > { %1628 = vst.msk [vmem:[#allocation2 + $0x20] sm:$0xff] %vm510_vm3, %v1585_v14  ;;  %1497 = vrot.lane.b32.xlu1 %v2738_v46, %s2938_s22  ;;  %v2729_v14 = vld [vmem:[%s2984_s20 + $0x189] sm:$0xff] }
 0x1a7   : > { %1403 = vrot.lane.b32.xlu0 %v2723_v47, %s2937_s21  ;;  %v2712_v47 = vld [vmem:[%s2984_s20 + $0x180] sm:$0xff] }
 0x1a8   : > { %v876_v57 = vpop.permute.xlu1 %875  ;;  %v1968_v16 = vpop.permute.xlu0 %1967 }
 0x1a9   : > { %913 = vst.msk [vmem:[#allocation2 + $0x58] sm:$0xff] %vm901_vm8, %v876_v57  ;;  %2013 = vst.msk [vmem:[#allocation2 + $0x10] sm:$0xff] %vm901_vm8, %v1968_v16 }
 0x1aa   : > { %1883 = vrot.lane.b32.xlu1 %v3779_v29, %s2942_s26 }
 0x1ab   : > { %1786 = vrot.lane.b32.xlu0 %v2739_v56, %s2941_s25 }
 0x1ac   : > { %v1587_v17 = vpop.permute.xlu1 %1586  ;;  %v971_v49 = vpop.permute.xlu0 %970 }
 0x1ad   : > { %1629 = vst.msk [vmem:[#allocation2 + $0x28] sm:$0xff] %vm510_vm3, %v1587_v17 }
 0x1ae   : > { %1009 = vst.msk [vmem:[#allocation2 + $0x50] sm:$0xff] %vm998_vm9, %v971_v49  ;;  %1596 = vrot.lane.b32.xlu1 %v3779_v29, %s2939_s23 }
 0x1af   : > { %1499 = vrot.lane.b32.xlu0 %v2739_v56, %s2938_s22 }
 0x1b0   : > { %v1970_v18 = vpop.permute.xlu1 %1969  ;;  %v1681_v19 = vpop.permute.xlu0 %1680 }
 0x1b1   : > { %2014 = vst.msk [vmem:[#allocation2 + $0x18] sm:$0xff] %vm901_vm8, %v1970_v18 }
 0x1b2   : > { %1724 = vst.msk [vmem:[#allocation2 + $0x20] sm:$0xff] %vm607_vm5, %v1681_v19  ;;  %1979 = vrot.lane.b32.xlu1 %v2724_v58, %s2943_s9  ;;  %v2714_v19 = vld [vmem:[%s2984_s20 + $0x198] sm:$0xff] }
 0x1b3   : > { %1885 = vrot.lane.b32.xlu0 %v3793_v59, %s2942_s26 }
 0x1b4   : > { %v973_v52 = vpop.permute.xlu1 %972  ;;  %v2064_v60 = vpop.permute.xlu0 %2063 }
 0x1b5   : > { %v1025_v20 = vld [vmem:[#allocation2 + $0x50] sm:$0xff]  ;;  %1010 = vst.msk [vmem:[#allocation2 + $0x58] sm:$0xff] %vm998_vm9, %v973_v52  ;;  %2109 = vst.msk [vmem:[#allocation2 + $0x10] sm:$0xff] %vm998_vm9, %v2064_v60  ;;  %v2715_v52 = vld [vmem:[%s2984_s20 + $0x1a0] sm:$0xff] }
 0x1b6   : > { %2853 = vmatprep.mubr.msk.f32.mxu0 %vm1036_vm10, %v1025_v20  ;;  %1343 = vst.msk [vmem:[#allocation2 + $0x50] sm:$0xff] %vm216_vm0, %v3712_v9  ;;  %1692 = vrot.lane.b32.xlu1 %v2724_v58, %s2940_s24 }
 0x1b7   : > { %1598 = vrot.lane.b32.xlu0 %v3793_v59, %s2939_s23 }
 0x1b8   : > { %v1683_v45 = vpop.permute.xlu1 %1682  ;;  %v1394_v55 = vpop.permute.xlu0 %1393 }
 0x1b9   : > { %1725 = vst.msk [vmem:[#allocation2 + $0x28] sm:$0xff] %vm607_vm5, %v1683_v45 }
 0x1ba   : > { %1435 = vst.msk [vmem:[#allocation2 + $0x30] sm:$0xff] %vm313_vm1, %v1394_v55  ;;  %2075 = vrot.lane.b32.xlu1 %v2740_v15, %s2944_s12 }
 0x1bb   : > { %1981 = vrot.lane.b32.xlu0 %v2725_v28, %s2943_s9 }
 0x1bc   : > { %v2066_v21 = vpop.permute.xlu1 %2065  ;;  %v1026_v5 = vld [vmem:[#allocation2 + $0x58] sm:$0xff]  ;;  %v2125_v44 = vld [vmem:[#allocation2 + $0x10] sm:$0xff] }
 0x1bd   : > { %v1777_v61 = vpop.permute.xlu0 %1776  ;;  %2110 = vst.msk [vmem:[#allocation2 + $0x18] sm:$0xff] %vm998_vm9, %v2066_v21  ;;  %2854 = vmatmul.mubr.msk.f32.gmra.mrb[10].mxu0 %vm1036_vm10, %v1026_v5  ;;  %2875 = vmatprep.mubr.msk.f32.mxu1 %vm1036_vm10, %v2125_v44  ;;  %v2746_v21 = vld [vmem:[%s2984_s20 + $0x19a] sm:$0xff] }
 0x1be   : > { %1820 = vst.msk [vmem:[#allocation2 + $0x20] sm:$0xff] %vm704_vm6, %v1777_v61  ;;  %1694 = vrot.lane.b32.xlu1 %v2725_v28, %s2940_s24  ;;  %v2747_v61 = vld [vmem:[%s2984_s20 + $0x1a2] sm:$0xff] }
 0x1bf   : > { %1344 = vst.msk [vmem:[#allocation2 + $0x58] sm:$0xff] %vm216_vm0, %v3726_v31  ;;  %1405 = vrot.lane.b32.xlu0 %v2724_v58, %s2937_s21  ;;  %v2745_v58 = vld [vmem:[%s2984_s20 + $0x18a] sm:$0xff] }
 0x1c0   : > { %v1396_v54 = vpop.permute.xlu1 %1395 }
 0x1c1   : > { %v781_v33 = vpop.permute.xlu0 %780  ;;  %1436 = vst.msk [vmem:[#allocation2 + $0x38] sm:$0xff] %vm313_vm1, %v1396_v54 }
 0x1c2   : > { %817 = vst.msk [vmem:[#allocation2 + $0x60] sm:$0xff] %vm804_vm7, %v781_v33  ;;  %2077 = vrot.lane.b32.xlu1 %v2741_v23, %s2944_s12 }
 0x1c3   : > { %1788 = vrot.lane.b32.xlu0 %v2740_v15, %s2941_s25 }
 0x1c4   : > { %v1779_v62 = vpop.permute.xlu1 %1778  ;;  %v2126_v4 = vld [vmem:[#allocation2 + $0x18] sm:$0xff] }
 0x1c5   : > { %v1490_v63 = vpop.permute.xlu0 %1489  ;;  %1821 = vst.msk [vmem:[#allocation2 + $0x28] sm:$0xff] %vm704_vm6, %v1779_v62  ;;  %2876 = vmatmul.mubr.msk.f32.gmra.mrb[2].mxu1 %vm1036_vm10, %v2126_v4 }
 0x1c6   : > { %1531 = vst.msk [vmem:[#allocation2 + $0x30] sm:$0xff] %vm410_vm2, %v1490_v63  ;;  %1501 = vrot.lane.b32.xlu1 %v2740_v15, %s2938_s22  ;;  %v2730_v15 = vld [vmem:[%s2984_s20 + $0x199] sm:$0xff] }
 0x1c7   : > { %1407 = vrot.lane.b32.xlu0 %v2725_v28, %s2937_s21  ;;  %v2731_v28 = vld [vmem:[%s2984_s20 + $0x1a1] sm:$0xff] }
 0x1c8   : > { %v783_v7 = vpop.permute.xlu1 %782 }
 0x1c9   : > { %v1876_v36 = vpop.permute.xlu0 %1875  ;;  %818 = vst.msk [vmem:[#allocation2 + $0x68] sm:$0xff] %vm804_vm7, %v783_v7 }
 0x1ca   : > { %1919 = vst.msk [vmem:[#allocation2 + $0x20] sm:$0xff] %vm804_vm7, %v1876_v36  ;;  %1887 = vrot.lane.b32.xlu1 %v3833_v37, %s2942_s26 }
 0x1cb   : > { %1790 = vrot.lane.b32.xlu0 %v2741_v23, %s2941_s25 }
 0x1cc   : > { %v1492_v6 = vpop.permute.xlu1 %1491 }
 0x1cd   : > { %v878_v32 = vpop.permute.xlu0 %877  ;;  %1532 = vst.msk [vmem:[#allocation2 + $0x38] sm:$0xff] %vm410_vm2, %v1492_v6  ;;  %v3954_v6 = vld [vmem:[%s4161_s2] ss:$0 sm:$0xff] }
 0x1ce   : > { %914 = vst.msk [vmem:[#allocation2 + $0x60] sm:$0xff] %vm901_vm8, %v878_v32  ;;  %1600 = vrot.lane.b32.xlu1 %v3833_v37, %s2939_s23 }
 0x1cf   : > { %1503 = vrot.lane.b32.xlu0 %v2741_v23, %s2938_s22 }
 0x1d0   : > { %v1878_v38 = vpop.permute.xlu1 %1877 }
 0x1d1   : > { %v1589_v9 = vpop.permute.xlu0 %1588  ;;  %1920 = vst.msk [vmem:[#allocation2 + $0x28] sm:$0xff] %vm804_vm7, %v1878_v38 }
 0x1d2   : > { %1630 = vst.msk [vmem:[#allocation2 + $0x30] sm:$0xff] %vm510_vm3, %v1589_v9  ;;  %1983 = vrot.lane.b32.xlu1 %v2726_v39, %s2943_s9 }
 0x1d3   : > { %1889 = vrot.lane.b32.xlu0 %v3847_v10, %s2942_s26 }
 0x1d4   : > { %v880_v22 = vpop.permute.xlu1 %879 }
 0x1d5   : > { %v1972_v41 = vpop.permute.xlu0 %1971  ;;  %915 = vst.msk [vmem:[#allocation2 + $0x68] sm:$0xff] %vm901_vm8, %v880_v22 }
 0x1d6   : > { %2015 = vst.msk [vmem:[#allocation2 + $0x20] sm:$0xff] %vm901_vm8, %v1972_v41  ;;  %1696 = vrot.lane.b32.xlu1 %v2726_v39, %s2940_s24 }
 0x1d7   : > { %1602 = vrot.lane.b32.xlu0 %v3847_v10, %s2939_s23 }
 0x1d8   : > { %v1591_v31 = vpop.permute.xlu1 %1590 }
 0x1d9   : > { %v975_v1 = vpop.permute.xlu0 %974  ;;  %1631 = vst.msk [vmem:[#allocation2 + $0x38] sm:$0xff] %vm510_vm3, %v1591_v31 }
 0x1da   : > { %1011 = vst.msk [vmem:[#allocation2 + $0x60] sm:$0xff] %vm998_vm9, %v975_v1  ;;  %2079 = vrot.lane.b32.xlu1 %v2742_v40, %s2944_s12 }
 0x1db   : > { %1985 = vrot.lane.b32.xlu0 %v2727_v0, %s2943_s9 }
 0x1dc   : > { %v1974_v3 = vpop.permute.xlu1 %1973 }
 0x1dd   : > { %v1685_v2 = vpop.permute.xlu0 %1684  ;;  %2016 = vst.msk [vmem:[#allocation2 + $0x28] sm:$0xff] %vm901_vm8, %v1974_v3 }
 0x1de   : > { %1726 = vst.msk [vmem:[#allocation2 + $0x30] sm:$0xff] %vm607_vm5, %v1685_v2  ;;  %1698 = vrot.lane.b32.xlu1 %v2727_v0, %s2940_s24 }
 0x1df   : > { %1409 = vrot.lane.b32.xlu0 %v2726_v39, %s2937_s21 }
 0x1e0   : > { %v977_v8 = vpop.permute.xlu1 %976 }
 0x1e1   : > { %v2068_v30 = vpop.permute.xlu0 %2067  ;;  %v1027_v26 = vld [vmem:[#allocation2 + $0x60] sm:$0xff]  ;;  %1012 = vst.msk [vmem:[#allocation2 + $0x68] sm:$0xff] %vm998_vm9, %v977_v8 }
 0x1e2   : > { %2111 = vst.msk [vmem:[#allocation2 + $0x20] sm:$0xff] %vm998_vm9, %v2068_v30  ;;  %2856 = vmatprep.mubr.msk.f32.mxu0 %vm1036_vm10, %v1027_v26  ;;  %2081 = vrot.lane.b32.xlu1 %v2743_v25, %s2944_s12 }
 0x1e3   : > { %1345 = vst.msk [vmem:[#allocation2 + $0x60] sm:$0xff] %vm216_vm0, %v3779_v29  ;;  %1792 = vrot.lane.b32.xlu0 %v2742_v40, %s2941_s25  ;;  %v2744_v29 = vld [vmem:[%s2984_s20 + $0x182] sm:$0xff] }
 0x1e4   : > { %v1687_v11 = vpop.permute.xlu1 %1686 }
 0x1e5   : > { %v1398_v27 = vpop.permute.xlu0 %1397  ;;  %1727 = vst.msk [vmem:[#allocation2 + $0x38] sm:$0xff] %vm607_vm5, %v1687_v11 }
 0x1e6   : > { %1437 = vst.msk [vmem:[#allocation2 + $0x40] sm:$0xff] %vm313_vm1, %v1398_v27  ;;  %1505 = vrot.lane.b32.xlu1 %v2742_v40, %s2938_s22 }
 0x1e7   : > { %1411 = vrot.lane.b32.xlu0 %v2727_v0, %s2937_s21  ;;  %s2785_s21 = sshll.u32 %s4165_s16, 8 }
 0x1e8   : > { %v2070_v24 = vpop.permute.xlu1 %2069  ;;  %v1028_v43 = vld [vmem:[#allocation2 + $0x68] sm:$0xff] }
 0x1e9   : > { %v1781_v34 = vpop.permute.xlu0 %1780  ;;  %v2127_v46 = vld [vmem:[#allocation2 + $0x20] sm:$0xff]  ;;  %2112 = vst.msk [vmem:[#allocation2 + $0x28] sm:$0xff] %vm998_vm9, %v2070_v24  ;;  %2857 = vmatmul.mubr.msk.f32.gmra.mrb[12].mxu0 %vm1036_vm10, %v1028_v43 }
 0x1ea   : > { %1822 = vst.msk [vmem:[#allocation2 + $0x30] sm:$0xff] %vm704_vm6, %v1781_v34  ;;  %2878 = vmatprep.mubr.msk.f32.mxu1 %vm1036_vm10, %v2127_v46  ;;  %1891 = vrot.lane.b32.xlu1 %v2712_v47, %s2942_s26 }
 0x1eb   : > { %1346 = vst.msk [vmem:[#allocation2 + $0x68] sm:$0xff] %vm216_vm0, %v3793_v59  ;;  %1794 = vrot.lane.b32.xlu0 %v2743_v25, %s2941_s25 }
 0x1ec   : > { %v1400_v42 = vpop.permute.xlu1 %1399 }
 0x1ed   : > { %v785_v35 = vpop.permute.xlu0 %784  ;;  %1438 = vst.msk [vmem:[#allocation2 + $0x48] sm:$0xff] %vm313_vm1, %v1400_v42 }
 0x1ee   : > { %819 = vst.msk [vmem:[#allocation2 + $0x70] sm:$0xff] %vm804_vm7, %v785_v35  ;;  %1604 = vrot.lane.b32.xlu1 %v2712_v47, %s2939_s23 }
 0x1ef   : > { %1507 = vrot.lane.b32.xlu0 %v2743_v25, %s2938_s22 }
 0x1f0   : > { %v1783_v53 = vpop.permute.xlu1 %1782  ;;  %v2128_v12 = vld [vmem:[#allocation2 + $0x28] sm:$0xff] }
 0x1f1   : > { %v1494_v56 = vpop.permute.xlu0 %1493  ;;  %1823 = vst.msk [vmem:[#allocation2 + $0x38] sm:$0xff] %vm704_vm6, %v1783_v53  ;;  %2879 = vmatmul.mubr.msk.f32.gmra.mrb[4].mxu1 %vm1036_vm10, %v2128_v12 }
 0x1f2   : > { %1533 = vst.msk [vmem:[#allocation2 + $0x40] sm:$0xff] %vm410_vm2, %v1494_v56  ;;  %1987 = vrot.lane.b32.xlu1 %v2728_v51, %s2943_s9 }
 0x1f3   : > { %1893 = vrot.lane.b32.xlu0 %v2713_v50, %s2942_s26 }
 0x1f4   : > { %v787_v13 = vpop.permute.xlu1 %786 }
 0x1f5   : > { %v1880_v48 = vpop.permute.xlu0 %1879  ;;  %820 = vst.msk [vmem:[#allocation2 + $0x78] sm:$0xff] %vm804_vm7, %v787_v13 }
 0x1f6   : > { %1921 = vst.msk [vmem:[#allocation2 + $0x30] sm:$0xff] %vm804_vm7, %v1880_v48  ;;  %1700 = vrot.lane.b32.xlu1 %v2728_v51, %s2940_s24 }
 0x1f7   : > { %1606 = vrot.lane.b32.xlu0 %v2713_v50, %s2939_s23 }
 0x1f8   : > { %v1496_v57 = vpop.permute.xlu1 %1495 }
 0x1f9   : > { %v882_v16 = vpop.permute.xlu0 %881  ;;  %1534 = vst.msk [vmem:[#allocation2 + $0x48] sm:$0xff] %vm410_vm2, %v1496_v57 }
 0x1fa   : > { %916 = vst.msk [vmem:[#allocation2 + $0x70] sm:$0xff] %vm901_vm8, %v882_v16  ;;  %2083 = vrot.lane.b32.xlu1 %v2744_v29, %s2944_s12 }
 0x1fb   : > { %1989 = vrot.lane.b32.xlu0 %v2729_v14, %s2943_s9 }
 0x1fc   : > { %v1882_v17 = vpop.permute.xlu1 %1881 }
 0x1fd   : > { %v1593_v49 = vpop.permute.xlu0 %1592  ;;  %1922 = vst.msk [vmem:[#allocation2 + $0x38] sm:$0xff] %vm804_vm7, %v1882_v17 }
 0x1fe   : > { %1632 = vst.msk [vmem:[#allocation2 + $0x40] sm:$0xff] %vm510_vm3, %v1593_v49  ;;  %1796 = vrot.lane.b32.xlu1 %v2744_v29, %s2941_s25 }
 0x1ff   : > { %1702 = vrot.lane.b32.xlu0 %v2729_v14, %s2940_s24  ;;  %s3971_s24 = scalar_lea.vmem %s4163_s4, %s2785_s21 }
 0x200   : > { %v884_v59 = vpop.permute.xlu1 %883 }
 0x201   : > { %v1976_v18 = vpop.permute.xlu0 %1975  ;;  %917 = vst.msk [vmem:[#allocation2 + $0x78] sm:$0xff] %vm901_vm8, %v884_v59 }
 0x202   : > { %2017 = vst.msk [vmem:[#allocation2 + $0x30] sm:$0xff] %vm901_vm8, %v1976_v18  ;;  %1798 = vrot.lane.b32.xlu1 %v2745_v58, %s2941_s25 }
 0x203   : > { %2085 = vrot.lane.b32.xlu0 %v2745_v58, %s2944_s12 }
 0x204   : > { %v1595_v60 = vpop.permute.xlu1 %1594 }
 0x205   : > { %v979_v20 = vpop.permute.xlu0 %978  ;;  %1633 = vst.msk [vmem:[#allocation2 + $0x48] sm:$0xff] %vm510_vm3, %v1595_v60 }
 0x206   : > { %1013 = vst.msk [vmem:[#allocation2 + $0x70] sm:$0xff] %vm998_vm9, %v979_v20  ;;  %1897 = vrot.lane.b32.xlu1 %v2715_v52, %s2942_s26 }
 0x207   : > { %1895 = vrot.lane.b32.xlu0 %v2714_v19, %s2942_s26 }
 0x208   : > { %v1978_v45 = vpop.permute.xlu1 %1977 }
 0x209   : > { %v1689_v55 = vpop.permute.xlu0 %1688  ;;  %2018 = vst.msk [vmem:[#allocation2 + $0x38] sm:$0xff] %vm901_vm8, %v1978_v45 }
 0x20a   : > { %1728 = vst.msk [vmem:[#allocation2 + $0x40] sm:$0xff] %vm607_vm5, %v1689_v55  ;;  %1993 = vrot.lane.b32.xlu1 %v2731_v28, %s2943_s9 }
 0x20b   : > { %1991 = vrot.lane.b32.xlu0 %v2730_v15, %s2943_s9 }
 0x20c   : > { %v981_v5 = vpop.permute.xlu1 %980 }
 0x20d   : > { %v2072_v44 = vpop.permute.xlu0 %2071  ;;  %v1029_v23 = vld [vmem:[#allocation2 + $0x70] sm:$0xff]  ;;  %1014 = vst.msk [vmem:[#allocation2 + $0x78] sm:$0xff] %vm998_vm9, %v981_v5 }
 0x20e   : > { %2113 = vst.msk [vmem:[#allocation2 + $0x30] sm:$0xff] %vm998_vm9, %v2072_v44  ;;  %2859 = vmatprep.mubr.msk.f32.mxu0 %vm1036_vm10, %v1029_v23  ;;  %2089 = vrot.lane.b32.xlu1 %v2747_v61, %s2944_s12 }
 0x20f   : > { %1347 = vst.msk [vmem:[#allocation2 + $0x70] sm:$0xff] %vm216_vm0, %v3833_v37  ;;  %2087 = vrot.lane.b32.xlu0 %v2746_v21, %s2944_s12 }
 0x210   : > { %v1691_v54 = vpop.permute.xlu1 %1690 }
 0x211   : > { %v1402_v33 = vpop.permute.xlu0 %1401  ;;  %1729 = vst.msk [vmem:[#allocation2 + $0x48] sm:$0xff] %vm607_vm5, %v1691_v54 }
 0x212   : > { %1439 = vst.msk [vmem:[#allocation2 + $0x50] sm:$0xff] %vm313_vm1, %v1402_v33 }
 0x214   : > { %v2074_v62 = vpop.permute.xlu1 %2073  ;;  %v1030_v4 = vld [vmem:[#allocation2 + $0x78] sm:$0xff] }
 0x215   : > { %v1785_v63 = vpop.permute.xlu0 %1784  ;;  %v2129_v7 = vld [vmem:[#allocation2 + $0x30] sm:$0xff]  ;;  %2114 = vst.msk [vmem:[#allocation2 + $0x38] sm:$0xff] %vm998_vm9, %v2074_v62  ;;  %2860 = vmatmul.mubr.msk.f32.gmra.mrb[14].mxu0 %vm1036_vm10, %v1030_v4 }
 0x216   : > { %1824 = vst.msk [vmem:[#allocation2 + $0x40] sm:$0xff] %vm704_vm6, %v1785_v63  ;;  %2881 = vmatprep.mubr.msk.f32.mxu1 %vm1036_vm10, %v2129_v7 }
 0x217   : > { %1348 = vst.msk [vmem:[#allocation2 + $0x78] sm:$0xff] %vm216_vm0, %v3847_v10  ;;  %v3961_v10 = vld [vmem:[%s4162_s3] ss:$0 sm:$0xff] }
 0x218   : > { %v1498_v37 = vpop.permute.xlu1 %1497 }
 0x219   : > { %v1404_v36 = vpop.permute.xlu0 %1403  ;;  %1535 = vst.msk [vmem:[#allocation2 + $0x50] sm:$0xff] %vm410_vm2, %v1498_v37 }
 0x21a   : > { %1440 = vst.msk [vmem:[#allocation2 + $0x58] sm:$0xff] %vm313_vm1, %v1404_v36 }
 0x21c   : > { %v1884_v32 = vpop.permute.xlu1 %1883  ;;  %v2130_v38 = vld [vmem:[#allocation2 + $0x38] sm:$0xff] }
 0x21d   : > { %v1787_v39 = vpop.permute.xlu0 %1786  ;;  %1923 = vst.msk [vmem:[#allocation2 + $0x40] sm:$0xff] %vm804_vm7, %v1884_v32  ;;  %v2840_v9 = vpop.f32.mrb[0].mxu0  ;;  %2882 = vmatmul.mubr.msk.f32.gmra.mrb[6].mxu1 %vm1036_vm10, %v2130_v38 }
 0x21e   : > { %1825 = vst.msk [vmem:[#allocation2 + $0x48] sm:$0xff] %vm704_vm6, %v1787_v39  ;;  %v1242_v22 = vmul.f32 %v2840_v9, %v3954_v6  ;;  %v1155_v41 = vpop.f32.mrb[1].mxu0 }
 0x21f   : > { %v1241_v40 = vmul.f32 %v3954_v6, %v1155_v41 }
 0x220   : > { %v1265_v0 = vadd.f32 %v3961_v10, %v1242_v22  ;;  %v1597_v31 = vpop.permute.xlu1 %1596 }
 0x221   : > { %v1500_v1 = vpop.permute.xlu0 %1499  ;;  %v1264_v3 = vadd.f32 %v3961_v10, %v1241_v40  ;;  %1634 = vst.msk [vmem:[#allocation2 + $0x50] sm:$0xff] %vm510_vm3, %v1597_v31 }
 0x222   : > { %1536 = vst.msk [vmem:[#allocation2 + $0x58] sm:$0xff] %vm410_vm2, %v1500_v1  ;;  %v1281_v2 = vmax.f32 %v1265_v0, 0.0 }
 0x223   : > { %v1280_v25 = vmax.f32 %v1264_v3, 0.0 }
 0x224   : > { %1300 = vst.msk [vmem:[%s3971_s24 + $0x8] sm:$0xff] %vm1298_vm11, %v1281_v2  ;;  %v1980_v8 = vpop.permute.xlu1 %1979 }
 0x225   : > { %v1886_v30 = vpop.permute.xlu0 %1885  ;;  %1299 = vst.msk [vmem:[%s3971_s24] sm:$0xff] %vm1298_vm11, %v1280_v25  ;;  %v2843_v26 = vpop.f32.mrb[2].mxu0 }
 0x226   : > { %2019 = vst.msk [vmem:[#allocation2 + $0x40] sm:$0xff] %vm901_vm8, %v1980_v8  ;;  %v1244_v11 = vmul.f32 %v2843_v26, %v3954_v6  ;;  %v1165_v27 = vpop.f32.mrb[3].mxu0 }
 0x227   : > { %1924 = vst.msk [vmem:[#allocation2 + $0x48] sm:$0xff] %vm804_vm7, %v1886_v30  ;;  %v1243_v47 = vmul.f32 %v3954_v6, %v1165_v27 }
 0x228   : > { %v1267_v24 = vadd.f32 %v3961_v10, %v1244_v11  ;;  %v1693_v34 = vpop.permute.xlu1 %1692 }
 0x229   : > { %v1599_v43 = vpop.permute.xlu0 %1598  ;;  %v1266_v46 = vadd.f32 %v3961_v10, %v1243_v47  ;;  %1730 = vst.msk [vmem:[#allocation2 + $0x50] sm:$0xff] %vm607_vm5, %v1693_v34 }
 0x22a   : > { %1635 = vst.msk [vmem:[#allocation2 + $0x58] sm:$0xff] %vm510_vm3, %v1599_v43  ;;  %v1283_v42 = vmax.f32 %v1267_v24, 0.0 }
 0x22b   : > { %v1282_v35 = vmax.f32 %v1266_v46, 0.0 }
 0x22c   : > { %1302 = vst.msk [vmem:[%s3971_s24 + $0x18] sm:$0xff] %vm1298_vm11, %v1283_v42  ;;  %v2076_v50 = vpop.permute.xlu1 %2075 }
 0x22d   : > { %v1982_v51 = vpop.permute.xlu0 %1981  ;;  %1301 = vst.msk [vmem:[%s3971_s24 + $0x10] sm:$0xff] %vm1298_vm11, %v1282_v35  ;;  %v2846_v53 = vpop.f32.mrb[4].mxu0 }
 0x22e   : > { %2115 = vst.msk [vmem:[#allocation2 + $0x40] sm:$0xff] %vm998_vm9, %v2076_v50  ;;  %v1246_v56 = vmul.f32 %v2846_v53, %v3954_v6  ;;  %v1175_v12 = vpop.f32.mrb[5].mxu0 }
 0x22f   : > { %2020 = vst.msk [vmem:[#allocation2 + $0x48] sm:$0xff] %vm901_vm8, %v1982_v51  ;;  %v1245_v13 = vmul.f32 %v3954_v6, %v1175_v12 }
 0x230   : > { %v1269_v48 = vadd.f32 %v3961_v10, %v1246_v56  ;;  %v1695_v14 = vpop.permute.xlu1 %1694 }
 0x231   : > { %v1406_v29 = vpop.permute.xlu0 %1405  ;;  %v1268_v57 = vadd.f32 %v3961_v10, %v1245_v13  ;;  %1731 = vst.msk [vmem:[#allocation2 + $0x58] sm:$0xff] %vm607_vm5, %v1695_v14 }
 0x232   : > { %1441 = vst.msk [vmem:[#allocation2 + $0x60] sm:$0xff] %vm313_vm1, %v1406_v29  ;;  %v1285_v16 = vmax.f32 %v1269_v48, 0.0 }
 0x233   : > { %v1284_v17 = vmax.f32 %v1268_v57, 0.0 }
 0x234   : > { %1304 = vst.msk [vmem:[%s3971_s24 + $0x28] sm:$0xff] %vm1298_vm11, %v1285_v16  ;;  %v2078_v49 = vpop.permute.xlu1 %2077 }
 0x235   : > { %v1789_v58 = vpop.permute.xlu0 %1788  ;;  %v2131_v59 = vld [vmem:[#allocation2 + $0x40] sm:$0xff]  ;;  %1303 = vst.msk [vmem:[%s3971_s24 + $0x20] sm:$0xff] %vm1298_vm11, %v1284_v17 }
 0x236   : > { %2116 = vst.msk [vmem:[#allocation2 + $0x48] sm:$0xff] %vm998_vm9, %v2078_v49  ;;  %2884 = vmatprep.mubr.msk.f32.mxu1 %vm1036_vm10, %v2131_v59 }
 0x237   : > { %1826 = vst.msk [vmem:[#allocation2 + $0x50] sm:$0xff] %vm704_vm6, %v1789_v58 }
 0x238   : > { %v1502_v18 = vpop.permute.xlu1 %1501 }
 0x239   : > { %v1408_v19 = vpop.permute.xlu0 %1407  ;;  %1537 = vst.msk [vmem:[#allocation2 + $0x60] sm:$0xff] %vm410_vm2, %v1502_v18 }
 0x23a   : > { %1442 = vst.msk [vmem:[#allocation2 + $0x68] sm:$0xff] %vm313_vm1, %v1408_v19 }
 0x23c   : > { %v1888_v52 = vpop.permute.xlu1 %1887 }
 0x23d   : > { %v1791_v60 = vpop.permute.xlu0 %1790  ;;  %v2132_v20 = vld [vmem:[#allocation2 + $0x48] sm:$0xff]  ;;  %1925 = vst.msk [vmem:[#allocation2 + $0x50] sm:$0xff] %vm804_vm7, %v1888_v52 }
 0x23e   : > { %1827 = vst.msk [vmem:[#allocation2 + $0x58] sm:$0xff] %vm704_vm6, %v1791_v60  ;;  %2885 = vmatmul.mubr.msk.f32.gmra.mrb[8].mxu1 %vm1036_vm10, %v2132_v20 }
 0x240   : > { %v1601_v15 = vpop.permute.xlu1 %1600  ;;  %v2849_v45 = vpop.f32.mrb[6].mxu0 }
 0x241   : > { %v1504_v28 = vpop.permute.xlu0 %1503  ;;  %1636 = vst.msk [vmem:[#allocation2 + $0x60] sm:$0xff] %vm510_vm3, %v1601_v15  ;;  %v1248_v55 = vmul.f32 %v2849_v45, %v3954_v6  ;;  %v1185_v21 = vpop.f32.mrb[7].mxu0 }
 0x242   : > { %1538 = vst.msk [vmem:[#allocation2 + $0x68] sm:$0xff] %vm410_vm2, %v1504_v28  ;;  %v1247_v61 = vmul.f32 %v3954_v6, %v1185_v21 }
 0x243   : > { %v1271_v5 = vadd.f32 %v3961_v10, %v1248_v55 }
 0x244   : > { %v1984_v44 = vpop.permute.xlu1 %1983  ;;  %v1270_v54 = vadd.f32 %v3961_v10, %v1247_v61 }
 0x245   : > { %v1890_v23 = vpop.permute.xlu0 %1889  ;;  %2021 = vst.msk [vmem:[#allocation2 + $0x50] sm:$0xff] %vm901_vm8, %v1984_v44  ;;  %v1287_v33 = vmax.f32 %v1271_v5, 0.0 }
 0x246   : > { %1926 = vst.msk [vmem:[#allocation2 + $0x58] sm:$0xff] %vm804_vm7, %v1890_v23  ;;  %v1286_v62 = vmax.f32 %v1270_v54, 0.0 }
 0x247   : > { %1306 = vst.msk [vmem:[%s3971_s24 + $0x38] sm:$0xff] %vm1298_vm11, %v1287_v33 }
 0x248   : > { %v1697_v63 = vpop.permute.xlu1 %1696  ;;  %1305 = vst.msk [vmem:[%s3971_s24 + $0x30] sm:$0xff] %vm1298_vm11, %v1286_v62 }
 0x249   : > { %v1603_v4 = vpop.permute.xlu0 %1602  ;;  %1732 = vst.msk [vmem:[#allocation2 + $0x60] sm:$0xff] %vm607_vm5, %v1697_v63 }
 0x24a   : > { %1637 = vst.msk [vmem:[#allocation2 + $0x68] sm:$0xff] %vm510_vm3, %v1603_v4 }
 0x24c   : > { %v2080_v7 = vpop.permute.xlu1 %2079 }
 0x24d   : > { %v1986_v37 = vpop.permute.xlu0 %1985  ;;  %2117 = vst.msk [vmem:[#allocation2 + $0x50] sm:$0xff] %vm998_vm9, %v2080_v7 }
 0x24e   : > { %2022 = vst.msk [vmem:[#allocation2 + $0x58] sm:$0xff] %vm901_vm8, %v1986_v37 }
 0x250   : > { %v1699_v36 = vpop.permute.xlu1 %1698 }
 0x251   : > { %v1410_v32 = vpop.permute.xlu0 %1409  ;;  %1733 = vst.msk [vmem:[#allocation2 + $0x68] sm:$0xff] %vm607_vm5, %v1699_v36 }
 0x252   : > { %1443 = vst.msk [vmem:[#allocation2 + $0x70] sm:$0xff] %vm313_vm1, %v1410_v32 }
 0x254   : > { %v2082_v39 = vpop.permute.xlu1 %2081  ;;  %v2133_v9 = vld [vmem:[#allocation2 + $0x50] sm:$0xff] }
 0x255   : > { %v1793_v38 = vpop.permute.xlu0 %1792  ;;  %2118 = vst.msk [vmem:[#allocation2 + $0x58] sm:$0xff] %vm998_vm9, %v2082_v39  ;;  %2887 = vmatprep.mubr.msk.f32.mxu1 %vm1036_vm10, %v2133_v9 }
 0x256   : > { %1828 = vst.msk [vmem:[#allocation2 + $0x60] sm:$0xff] %vm704_vm6, %v1793_v38 }
 0x258   : > { %v1506_v41 = vpop.permute.xlu1 %1505 }
 0x259   : > { %v1412_v22 = vpop.permute.xlu0 %1411  ;;  %1539 = vst.msk [vmem:[#allocation2 + $0x70] sm:$0xff] %vm410_vm2, %v1506_v41 }
 0x25a   : > { %1444 = vst.msk [vmem:[#allocation2 + $0x78] sm:$0xff] %vm313_vm1, %v1412_v22 }
 0x25c   : > { %v1892_v0 = vpop.permute.xlu1 %1891  ;;  %v2134_v31 = vld [vmem:[#allocation2 + $0x58] sm:$0xff] }
 0x25d   : > { %v1795_v40 = vpop.permute.xlu0 %1794  ;;  %1927 = vst.msk [vmem:[#allocation2 + $0x60] sm:$0xff] %vm804_vm7, %v1892_v0  ;;  %2888 = vmatmul.mubr.msk.f32.gmra.mrb[10].mxu1 %vm1036_vm10, %v2134_v31 }
 0x25e   : > { %1829 = vst.msk [vmem:[#allocation2 + $0x68] sm:$0xff] %vm704_vm6, %v1795_v40 }
 0x260   : > { %v1605_v3 = vpop.permute.xlu1 %1604 }
 0x261   : > { %v1508_v1 = vpop.permute.xlu0 %1507  ;;  %1638 = vst.msk [vmem:[#allocation2 + $0x70] sm:$0xff] %vm510_vm3, %v1605_v3 }
 0x262   : > { %1540 = vst.msk [vmem:[#allocation2 + $0x78] sm:$0xff] %vm410_vm2, %v1508_v1 }
 0x264   : > { %v1988_v25 = vpop.permute.xlu1 %1987 }
 0x265   : > { %v1894_v2 = vpop.permute.xlu0 %1893  ;;  %2023 = vst.msk [vmem:[#allocation2 + $0x60] sm:$0xff] %vm901_vm8, %v1988_v25 }
 0x266   : > { %1928 = vst.msk [vmem:[#allocation2 + $0x68] sm:$0xff] %vm804_vm7, %v1894_v2 }
 0x268   : > { %v1701_v11 = vpop.permute.xlu1 %1700 }
 0x269   : > { %v1607_v8 = vpop.permute.xlu0 %1606  ;;  %v2852_v30 = vpop.f32.mrb[8].mxu0  ;;  %1734 = vst.msk [vmem:[#allocation2 + $0x70] sm:$0xff] %vm607_vm5, %v1701_v11 }
 0x26a   : > { %1639 = vst.msk [vmem:[#allocation2 + $0x78] sm:$0xff] %vm510_vm3, %v1607_v8  ;;  %v1250_v26 = vmul.f32 %v2852_v30, %v3954_v6  ;;  %v1195_v27 = vpop.f32.mrb[9].mxu0 }
 0x26b   : > { %v1249_v47 = vmul.f32 %v3954_v6, %v1195_v27 }
 0x26c   : > { %v1273_v24 = vadd.f32 %v3961_v10, %v1250_v26  ;;  %v2084_v42 = vpop.permute.xlu1 %2083 }
 0x26d   : > { %v1272_v34 = vadd.f32 %v3961_v10, %v1249_v47  ;;  %v1990_v43 = vpop.permute.xlu0 %1989  ;;  %2119 = vst.msk [vmem:[#allocation2 + $0x60] sm:$0xff] %vm998_vm9, %v2084_v42 }
 0x26e   : > { %v1289_v46 = vmax.f32 %v1273_v24, 0.0  ;;  %2024 = vst.msk [vmem:[#allocation2 + $0x68] sm:$0xff] %vm901_vm8, %v1990_v43 }
 0x26f   : > { %v1288_v35 = vmax.f32 %v1272_v34, 0.0 }
 0x270   : > { %1308 = vst.msk [vmem:[%s3971_s24 + $0x48] sm:$0xff] %vm1298_vm11, %v1289_v46  ;;  %v1797_v56 = vpop.permute.xlu1 %1796 }
 0x271   : > { %1307 = vst.msk [vmem:[%s3971_s24 + $0x40] sm:$0xff] %vm1298_vm11, %v1288_v35  ;;  %v1703_v50 = vpop.permute.xlu0 %1702  ;;  %v2874_v51 = vpop.f32.mrb[0].mxu1 }
 0x272   : > { %1735 = vst.msk [vmem:[#allocation2 + $0x78] sm:$0xff] %vm607_vm5, %v1703_v50  ;;  %v2348_v53 = vmul.f32 %v2874_v51, %v3954_v6  ;;  %v2261_v12 = vpop.f32.mrb[1].mxu1 }
 0x273   : > { %1830 = vst.msk [vmem:[#allocation2 + $0x70] sm:$0xff] %vm704_vm6, %v1797_v56  ;;  %v2347_v13 = vmul.f32 %v3954_v6, %v2261_v12 }
 0x274   : > { %v2371_v48 = vadd.f32 %v3961_v10, %v2348_v53  ;;  %v1799_v16 = vpop.permute.xlu1 %1798  ;;  %v2135_v17 = vld [vmem:[#allocation2 + $0x60] sm:$0xff] }
 0x275   : > { %v2370_v14 = vadd.f32 %v3961_v10, %v2347_v13  ;;  %v2086_v29 = vpop.permute.xlu0 %2085  ;;  %1831 = vst.msk [vmem:[#allocation2 + $0x78] sm:$0xff] %vm704_vm6, %v1799_v16  ;;  %2890 = vmatprep.mubr.msk.f32.mxu1 %vm1036_vm10, %v2135_v17 }
 0x276   : > { %v2387_v57 = vmax.f32 %v2371_v48, 0.0  ;;  %2120 = vst.msk [vmem:[#allocation2 + $0x68] sm:$0xff] %vm998_vm9, %v2086_v29 }
 0x277   : > { %v2386_v49 = vmax.f32 %v2370_v14, 0.0 }
 0x278   : > { %2768 = vst.msk [vmem:[%s3971_s24 + $0x88] sm:$0xff] %vm1298_vm11, %v2387_v57  ;;  %v1898_v59 = vpop.permute.xlu1 %1897 }
 0x279   : > { %2767 = vst.msk [vmem:[%s3971_s24 + $0x80] sm:$0xff] %vm1298_vm11, %v2386_v49  ;;  %v1896_v58 = vpop.permute.xlu0 %1895 }
 0x27a   : > { %1929 = vst.msk [vmem:[#allocation2 + $0x70] sm:$0xff] %vm804_vm7, %v1896_v58  ;;  %1930 = vst.msk [vmem:[#allocation2 + $0x78] sm:$0xff] %vm804_vm7, %v1898_v59 }
 0x27c   : > { %v1994_v52 = vpop.permute.xlu1 %1993 }
 0x27d   : > { %v1992_v18 = vpop.permute.xlu0 %1991  ;;  %v2136_v19 = vld [vmem:[#allocation2 + $0x68] sm:$0xff]  ;;  %2026 = vst.msk [vmem:[#allocation2 + $0x78] sm:$0xff] %vm901_vm8, %v1994_v52 }
 0x27e   : > { %2025 = vst.msk [vmem:[#allocation2 + $0x70] sm:$0xff] %vm901_vm8, %v1992_v18  ;;  %2891 = vmatmul.mubr.msk.f32.gmra.mrb[12].mxu1 %vm1036_vm10, %v2136_v19 }
 0x280   : > { %v2090_v20 = vpop.permute.xlu1 %2089 }
 0x281   : > { %v2088_v60 = vpop.permute.xlu0 %2087  ;;  %2122 = vst.msk [vmem:[#allocation2 + $0x78] sm:$0xff] %vm998_vm9, %v2090_v20 }
 0x282   : > { %2121 = vst.msk [vmem:[#allocation2 + $0x70] sm:$0xff] %vm998_vm9, %v2088_v60 }
 0x288   : > { %v2138_v28 = vld [vmem:[#allocation2 + $0x78] sm:$0xff] }
 0x289   : > { %v2137_v15 = vld [vmem:[#allocation2 + $0x70] sm:$0xff] }
 0x28a   : > { %2893 = vmatprep.mubr.msk.f32.mxu1 %vm1036_vm10, %v2137_v15 }
 0x28b   : > { %2894 = vmatmul.mubr.msk.f32.gmra.mrb[14].mxu1 %vm1036_vm10, %v2138_v28 }
 0x290   : > { %v2855_v45 = vpop.f32.mrb[10].mxu0 }
 0x291   : > { %v1252_v55 = vmul.f32 %v2855_v45, %v3954_v6  ;;  %v1205_v21 = vpop.f32.mrb[11].mxu0 }
 0x292   : > { %v1251_v61 = vmul.f32 %v3954_v6, %v1205_v21 }
 0x293   : > { %v1275_v5 = vadd.f32 %v3961_v10, %v1252_v55 }
 0x294   : > { %v1274_v44 = vadd.f32 %v3961_v10, %v1251_v61 }
 0x295   : > { %v1291_v23 = vmax.f32 %v1275_v5, 0.0 }
 0x296   : > { %v1290_v54 = vmax.f32 %v1274_v44, 0.0 }
 0x297   : > { %1310 = vst.msk [vmem:[%s3971_s24 + $0x58] sm:$0xff] %vm1298_vm11, %v1291_v23 }
 0x298   : > { %1309 = vst.msk [vmem:[%s3971_s24 + $0x50] sm:$0xff] %vm1298_vm11, %v1290_v54  ;;  %v2877_v33 = vpop.f32.mrb[2].mxu1 }
 0x299   : > { %v2350_v62 = vmul.f32 %v2877_v33, %v3954_v6  ;;  %v2271_v63 = vpop.f32.mrb[3].mxu1 }
 0x29a   : > { %v2349_v4 = vmul.f32 %v3954_v6, %v2271_v63 }
 0x29b   : > { %v2373_v7 = vadd.f32 %v3961_v10, %v2350_v62 }
 0x29c   : > { %v2372_v37 = vadd.f32 %v3961_v10, %v2349_v4 }
 0x29d   : > { %v2389_v36 = vmax.f32 %v2373_v7, 0.0 }
 0x29e   : > { %v2388_v32 = vmax.f32 %v2372_v37, 0.0 }
 0x29f   : > { %2770 = vst.msk [vmem:[%s3971_s24 + $0x98] sm:$0xff] %vm1298_vm11, %v2389_v36 }
 0x2a0   : > { %2769 = vst.msk [vmem:[%s3971_s24 + $0x90] sm:$0xff] %vm1298_vm11, %v2388_v32 }
 0x2bc   : > { %v2858_v39 = vpop.f32.mrb[12].mxu0 }
 0x2bd   : > { %v1254_v38 = vmul.f32 %v2858_v39, %v3954_v6  ;;  %v1215_v9 = vpop.f32.mrb[13].mxu0 }
 0x2be   : > { %v1253_v22 = vmul.f32 %v3954_v6, %v1215_v9 }
 0x2bf   : > { %v1277_v41 = vadd.f32 %v3961_v10, %v1254_v38 }
 0x2c0   : > { %v1276_v40 = vadd.f32 %v3961_v10, %v1253_v22 }
 0x2c1   : > { %v1293_v0 = vmax.f32 %v1277_v41, 0.0 }
 0x2c2   : > { %v1292_v31 = vmax.f32 %v1276_v40, 0.0 }
 0x2c3   : > { %1312 = vst.msk [vmem:[%s3971_s24 + $0x68] sm:$0xff] %vm1298_vm11, %v1293_v0 }
 0x2c4   : > { %1311 = vst.msk [vmem:[%s3971_s24 + $0x60] sm:$0xff] %vm1298_vm11, %v1292_v31  ;;  %v2880_v1 = vpop.f32.mrb[4].mxu1 }
 0x2c5   : > { %v2352_v3 = vmul.f32 %v2880_v1, %v3954_v6  ;;  %v2281_v2 = vpop.f32.mrb[5].mxu1 }
 0x2c6   : > { %v2351_v25 = vmul.f32 %v3954_v6, %v2281_v2 }
 0x2c7   : > { %v2375_v8 = vadd.f32 %v3961_v10, %v2352_v3 }
 0x2c8   : > { %v2374_v30 = vadd.f32 %v3961_v10, %v2351_v25 }
 0x2c9   : > { %v2391_v26 = vmax.f32 %v2375_v8, 0.0 }
 0x2ca   : > { %v2390_v11 = vmax.f32 %v2374_v30, 0.0 }
 0x2cb   : > { %2772 = vst.msk [vmem:[%s3971_s24 + $0xa8] sm:$0xff] %vm1298_vm11, %v2391_v26 }
 0x2cc   : > { %2771 = vst.msk [vmem:[%s3971_s24 + $0xa0] sm:$0xff] %vm1298_vm11, %v2390_v11 }
 0x2e8   : > { %v2861_v27 = vpop.f32.mrb[14].mxu0 }
 0x2e9   : > { %v1256_v47 = vmul.f32 %v2861_v27, %v3954_v6  ;;  %v1225_v24 = vpop.f32.mrb[15].mxu0 }
 0x2ea   : > { %v1255_v34 = vmul.f32 %v3954_v6, %v1225_v24 }
 0x2eb   : > { %v1279_v43 = vadd.f32 %v3961_v10, %v1256_v47 }
 0x2ec   : > { %v1278_v46 = vadd.f32 %v3961_v10, %v1255_v34 }
 0x2ed   : > { %v1295_v42 = vmax.f32 %v1279_v43, 0.0 }
 0x2ee   : > { %v1294_v35 = vmax.f32 %v1278_v46, 0.0 }
 0x2ef   : > { %1314 = vst.msk [vmem:[%s3971_s24 + $0x78] sm:$0xff] %vm1298_vm11, %v1295_v42 }
 0x2f0   : > { %1313 = vst.msk [vmem:[%s3971_s24 + $0x70] sm:$0xff] %vm1298_vm11, %v1294_v35  ;;  %v2883_v50 = vpop.f32.mrb[6].mxu1 }
 0x2f1   : > { %v2354_v51 = vmul.f32 %v2883_v50, %v3954_v6  ;;  %v2291_v53 = vpop.f32.mrb[7].mxu1 }
 0x2f2   : > { %v2353_v56 = vmul.f32 %v3954_v6, %v2291_v53 }
 0x2f3   : > { %v2377_v12 = vadd.f32 %v3961_v10, %v2354_v51 }
 0x2f4   : > { %v2376_v13 = vadd.f32 %v3961_v10, %v2353_v56 }
 0x2f5   : > { %v2393_v48 = vmax.f32 %v2377_v12, 0.0 }
 0x2f6   : > { %v2392_v14 = vmax.f32 %v2376_v13, 0.0 }
 0x2f7   : > { %2774 = vst.msk [vmem:[%s3971_s24 + $0xb8] sm:$0xff] %vm1298_vm11, %v2393_v48 }
 0x2f8   : > { %2773 = vst.msk [vmem:[%s3971_s24 + $0xb0] sm:$0xff] %vm1298_vm11, %v2392_v14 }
 0x311   : > { %v2886_v29 = vpop.f32.mrb[8].mxu1 }
 0x312   : > { %v2356_v57 = vmul.f32 %v2886_v29, %v3954_v6  ;;  %v2301_v16 = vpop.f32.mrb[9].mxu1 }
 0x313   : > { %v2355_v17 = vmul.f32 %v3954_v6, %v2301_v16 }
 0x314   : > { %v2379_v49 = vadd.f32 %v3961_v10, %v2356_v57 }
 0x315   : > { %v2378_v58 = vadd.f32 %v3961_v10, %v2355_v17 }
 0x316   : > { %v2395_v59 = vmax.f32 %v2379_v49, 0.0 }
 0x317   : > { %v2394_v18 = vmax.f32 %v2378_v58, 0.0 }
 0x318   : > { %2776 = vst.msk [vmem:[%s3971_s24 + $0xc8] sm:$0xff] %vm1298_vm11, %v2395_v59 }
 0x319   : > { %2775 = vst.msk [vmem:[%s3971_s24 + $0xc0] sm:$0xff] %vm1298_vm11, %v2394_v18 }
 0x330   : > { %v2889_v19 = vpop.f32.mrb[10].mxu1 }
 0x331   : > { %v2358_v52 = vmul.f32 %v2889_v19, %v3954_v6  ;;  %v2311_v60 = vpop.f32.mrb[11].mxu1 }
 0x332   : > { %v2357_v20 = vmul.f32 %v3954_v6, %v2311_v60 }
 0x333   : > { %v2381_v15 = vadd.f32 %v3961_v10, %v2358_v52 }
 0x334   : > { %v2380_v28 = vadd.f32 %v3961_v10, %v2357_v20 }
 0x335   : > { %v2397_v45 = vmax.f32 %v2381_v15, 0.0 }
 0x336   : > { %v2396_v55 = vmax.f32 %v2380_v28, 0.0 }
 0x337   : > { %2778 = vst.msk [vmem:[%s3971_s24 + $0xd8] sm:$0xff] %vm1298_vm11, %v2397_v45 }
 0x338   : > { %2777 = vst.msk [vmem:[%s3971_s24 + $0xd0] sm:$0xff] %vm1298_vm11, %v2396_v55 }
 0x351   : > { %v2892_v21 = vpop.f32.mrb[12].mxu1 }
 0x352   : > { %v2360_v61 = vmul.f32 %v2892_v21, %v3954_v6  ;;  %v2321_v5 = vpop.f32.mrb[13].mxu1 }
 0x353   : > { %v2359_v44 = vmul.f32 %v3954_v6, %v2321_v5 }
 0x354   : > { %v2383_v23 = vadd.f32 %v3961_v10, %v2360_v61 }
 0x355   : > { %v2382_v54 = vadd.f32 %v3961_v10, %v2359_v44 }
 0x356   : > { %v2399_v33 = vmax.f32 %v2383_v23, 0.0 }
 0x357   : > { %v2398_v62 = vmax.f32 %v2382_v54, 0.0 }
 0x358   : > { %2780 = vst.msk [vmem:[%s3971_s24 + $0xe8] sm:$0xff] %vm1298_vm11, %v2399_v33 }
 0x359   : > { %2779 = vst.msk [vmem:[%s3971_s24 + $0xe0] sm:$0xff] %vm1298_vm11, %v2398_v62 }
 0x35e   : > { %v2895_v63 = vpop.f32.mrb[14].mxu1 }
 0x35f   : > { %v2362_v4 = vmul.f32 %v2895_v63, %v3954_v6  ;;  %v2331_v7 = vpop.f32.mrb[15].mxu1 }
 0x360   : > { %v2361_v37 = vmul.f32 %v3954_v6, %v2331_v7 }
 0x361   : > { %v2385_v36 = vadd.f32 %v3961_v10, %v2362_v4 }
 0x362   : > { %v2384_v32 = vadd.f32 %v3961_v10, %v2361_v37 }
 0x363   : > { %v2401_v39 = vmax.f32 %v2385_v36, 0.0 }
 0x364   : > { %v2400_v38 = vmax.f32 %v2384_v32, 0.0 }
 0x365   : > { %2782 = vst.msk [vmem:[%s3971_s24 + $0xf8] sm:$0xff] %vm1298_vm11, %v2401_v39 }
 0x366   : > { %2781 = vst.msk [vmem:[%s3971_s24 + $0xf0] sm:$0xff] %vm1298_vm11, %v2400_v38 }
 0x367 PF: > { %s14_s15 = sadd.s32 1, %s2935_s15  }
 0x368   : > { %p11_p4 = scmp.ge.s32.totalorder %s14_s15, 4  }
 0x36a   :  { %13 = sbr.rel (!%p11_p4) target bundleno = 1 (0x1), region = 74 }

</bundles_post_ra>
